<compile_context>
chip_gen: v6e
topology: v6e:2x2x1
jax: 0.10.0
libtpu: 0.0.40
codegen_flags: <defaults>
</compile_context>

<pallas_src>
import jax
import jax.numpy as jnp
from jax.experimental import pallas as pl
from jax.experimental.pallas import tpu as pltpu

# ---- model hyperparameters (mirroring train.py) ----
N_LAYERS = 3
N_EMBD = 32
SEQ_SIZE = 8
NUM_HEADS = 4
HEAD_SIZE = N_EMBD // NUM_HEADS          # 8
FFN_HIDDEN = 4 * N_EMBD                  # 128
VOCAB_SIZE = 128                         # not fixed by the spec; chosen lane-dense
LN_EPS = 1e-5
ATTN_SCALE = N_EMBD ** (-0.5)            # spec scales scores by C**-0.5, C = n_embd
LANES = 128

# ---- per-layer weight slab row layout (lane dim = 128) ----
_R_QKV = 0                                # rows [0, C):      w_qkv  (C, 3C), Q cols pre-scaled
_R_PROJ = N_EMBD                          # rows [C, 2C):     w_proj (C, C)
_R_FF1 = 2 * N_EMBD                       # rows [2C, 3C):    w_ff1  (C, 4C)
_R_FF2 = 3 * N_EMBD                       # rows [3C, 3C+4C): w_ff2  (4C, C)
_R_VEC = 3 * N_EMBD + FFN_HIDDEN          # 224: ln1_g,ln1_b,ln2_g,ln2_b,b_proj,b_ff2,b_ff1
_R_TOT = _R_VEC + 8                       # 232 rows (multiple of 8)

# ---- globals slab row layout ----
_G_TOK = 0                                # rows [0, V):      tok_emb (V, C)
_G_POS = VOCAB_SIZE                       # rows [V, V+T):    pos_emb (T, C)
_G_HEAD = VOCAB_SIZE + SEQ_SIZE           # rows [.., ..+C):  w_head  (C, V)
_G_VEC = VOCAB_SIZE + SEQ_SIZE + N_EMBD   # 168: lnf_g, lnf_b, b_head
_G_TOT = _G_VEC + 8                       # 176 rows


def _layer_norm(x, gamma, beta):
    mu = jnp.mean(x, axis=-1, keepdims=True)
    xc = x - mu
    var = jnp.mean(xc * xc, axis=-1, keepdims=True)
    return xc * jax.lax.rsqrt(var + LN_EPS) * gamma + beta


def gpt_forward_kernel(idx_ref, wl_ref, g_ref, logits_ref):
    BT, V = logits_ref.shape
    C, T, H, hs, F = N_EMBD, SEQ_SIZE, NUM_HEADS, HEAD_SIZE, FFN_HIDDEN
    B = BT // T

    # ---- embeddings: gather via one-hot matmul (stays on the MXU, no gather op) ----
    ids = idx_ref[...]                                                  # (BT, 1) int32
    onehot = (jax.lax.broadcasted_iota(jnp.int32, (BT, V), 1) == ids)
    x = jnp.dot(onehot.astype(jnp.float32), g_ref[_G_TOK:_G_TOK + V, 0:C],
                preferred_element_type=jnp.float32)                    # (BT, C)
    pos = g_ref[_G_POS:_G_POS + T, 0:C]                                # (T, C)
    x = (x.reshape(B, T, C) + pos[None, :, :]).reshape(BT, C)          # broadcast over B

    # ---- causal-mask additive bias: built ONCE, reused by every layer/head ----
    row = jax.lax.broadcasted_iota(jnp.int32, (1, T, T), 1)
    col = jax.lax.broadcasted_iota(jnp.int32, (1, T, T), 2)
    neg_bias = jnp.where(col <= row, 0.0, -1e30).astype(jnp.float32)   # (1, T, T)

    # ---- transformer blocks (statically unrolled; tiny shapes, no spill risk) ----
    for l in range(N_LAYERS):
        w_qkv = wl_ref[l, _R_QKV:_R_QKV + C, 0:3 * C]       # (C, 3C), Q pre-scaled
        w_proj = wl_ref[l, _R_PROJ:_R_PROJ + C, 0:C]        # (C, C)
        w_ff1 = wl_ref[l, _R_FF1:_R_FF1 + C, 0:F]           # (C, 4C)
        w_ff2 = wl_ref[l, _R_FF2:_R_FF2 + F, 0:C]           # (4C, C)
        ln1_g = wl_ref[l, _R_VEC + 0:_R_VEC + 1, 0:C]
        ln1_b = wl_ref[l, _R_VEC + 1:_R_VEC + 2, 0:C]
        ln2_g = wl_ref[l, _R_VEC + 2:_R_VEC + 3, 0:C]
        ln2_b = wl_ref[l, _R_VEC + 3:_R_VEC + 4, 0:C]
        b_proj = wl_ref[l, _R_VEC + 4:_R_VEC + 5, 0:C]
        b_ff2 = wl_ref[l, _R_VEC + 5:_R_VEC + 6, 0:C]
        b_ff1 = wl_ref[l, _R_VEC + 6:_R_VEC + 7, 0:F]

        # x = ln1(x); x = x + mha(x)  (residual from the NORMALIZED activations,
        #                              exactly as the spec's TransformerBlock does)
        h = _layer_norm(x, ln1_g, ln1_b)                                # (BT, C)

        # fused QKV for ALL heads: one (BT,C)@(C,3C) MXU pass
        qkv = jnp.dot(h, w_qkv, preferred_element_type=jnp.float32)    # (BT, 3C)
        qkv3 = qkv.reshape(B, T, 3 * C)
        q_all = qkv3[:, :, 0:C]              # split ONCE per layer
        k_all = qkv3[:, :, C:2 * C]
        v_all = qkv3[:, :, 2 * C:3 * C]

        heads = []
        for hd in range(H):
            lo = hd * hs
            q = q_all[:, :, lo:lo + hs]                                 # (B, T, hs)
            k = k_all[:, :, lo:lo + hs]
            v = v_all[:, :, lo:lo + hs]
            # scores (scale already folded into Q weights) + hoisted causal bias
            s = jnp.einsum('bqd,bkd->bqk', q, k,
                           preferred_element_type=jnp.float32) + neg_bias
            m = jnp.max(s, axis=-1, keepdims=True)
            p = jnp.exp(s - m)
            w = p / jnp.sum(p, axis=-1, keepdims=True)                  # exact softmax
            heads.append(jnp.einsum('bqk,bkd->bqd', w, v,
                                    preferred_element_type=jnp.float32))
        # head concat (lane assembly) + ONE (BT,C)@(C,C) output projection
        o = jnp.concatenate(heads, axis=-1).reshape(BT, C)
        x = h + jnp.dot(o, w_proj, preferred_element_type=jnp.float32) + b_proj

        # x = ln2(x); x = x + ffn(x)
        h2 = _layer_norm(x, ln2_g, ln2_b)
        ff = jnp.maximum(
            jnp.dot(h2, w_ff1, preferred_element_type=jnp.float32) + b_ff1, 0.0)
        ff = jnp.dot(ff, w_ff2, preferred_element_type=jnp.float32) + b_ff2
        x = h2 + ff

    # ---- final LayerNorm + LM head (lane-dense (BT, 128) unmasked store) ----
    xf = _layer_norm(x, g_ref[_G_VEC:_G_VEC + 1, 0:C],
                     g_ref[_G_VEC + 1:_G_VEC + 2, 0:C])
    logits = jnp.dot(xf, g_ref[_G_HEAD:_G_HEAD + C, 0:V],
                     preferred_element_type=jnp.float32)
    logits = logits + g_ref[_G_VEC + 2:_G_VEC + 3, 0:V]
    logits_ref[...] = logits.astype(logits_ref.dtype)


def pack_params(params):
    """Pack the 17 weight arrays into two lane-dense f32 slabs (2 weight DMAs)."""
    C, T, V, F = N_EMBD, SEQ_SIZE, VOCAB_SIZE, FFN_HIDDEN

    wl = jnp.zeros((N_LAYERS, _R_TOT, LANES), jnp.float32)
    w_qkv = params['w_qkv'].at[:, :, 0:C].multiply(ATTN_SCALE)   # fold attn scale into Q
    wl = wl.at[:, _R_QKV:_R_QKV + C, 0:3 * C].set(w_qkv)
    wl = wl.at[:, _R_PROJ:_R_PROJ + C, 0:C].set(params['w_proj'])
    wl = wl.at[:, _R_FF1:_R_FF1 + C, 0:F].set(params['w_ff1'])
    wl = wl.at[:, _R_FF2:_R_FF2 + F, 0:C].set(params['w_ff2'])
    wl = wl.at[:, _R_VEC + 0, 0:C].set(params['ln1_g'][:, 0, :])
    wl = wl.at[:, _R_VEC + 1, 0:C].set(params['ln1_b'][:, 0, :])
    wl = wl.at[:, _R_VEC + 2, 0:C].set(params['ln2_g'][:, 0, :])
    wl = wl.at[:, _R_VEC + 3, 0:C].set(params['ln2_b'][:, 0, :])
    wl = wl.at[:, _R_VEC + 4, 0:C].set(params['b_proj'][:, 0, :])
    wl = wl.at[:, _R_VEC + 5, 0:C].set(params['b_ff2'][:, 0, :])
    wl = wl.at[:, _R_VEC + 6, 0:F].set(params['b_ff1'][:, 0, :])

    g = jnp.zeros((_G_TOT, LANES), jnp.float32)
    g = g.at[_G_TOK:_G_TOK + V, 0:C].set(params['tok_emb'])
    g = g.at[_G_POS:_G_POS + T, 0:C].set(params['pos_emb'])
    g = g.at[_G_HEAD:_G_HEAD + C, 0:V].set(params['w_head'])
    g = g.at[_G_VEC + 0, 0:C].set(params['lnf_g'][0])
    g = g.at[_G_VEC + 1, 0:C].set(params['lnf_b'][0])
    g = g.at[_G_VEC + 2, 0:V].set(params['b_head'][0])
    return wl, g


@jax.jit
def gpt_forward(idx, params):
    """idx: (B, T) int32 token ids. Returns logits (B, T, vocab_size)."""
    B, T = idx.shape
    V = VOCAB_SIZE
    wl_slab, g_slab = pack_params(params)
    idx_flat = idx.reshape(B * T, 1).astype(jnp.int32)

    vmem = pl.BlockSpec(memory_space=pltpu.MemorySpace.VMEM)
    logits_flat = pl.pallas_call(
        gpt_forward_kernel,
        out_shape=jax.ShapeDtypeStruct((B * T, V), jnp.float32),
        in_specs=[vmem, vmem, vmem],
        out_specs=vmem,
    )(idx_flat, wl_slab, g_slab)
    return logits_flat.reshape(B, T, V)
    # TODO(synk): if B*T ever grows, add a leading grid axis over batch tiles with
    # dimension_semantics=("parallel",) so v7x's second TensorCore is used.


def reference_forward(idx, params):
    """Pure-JAX reference mirroring the PyTorch GPTLanguageModel forward exactly."""
    B, T = idx.shape
    C = N_EMBD

    def ln(v, g, b):
        mu = jnp.mean(v, axis=-1, keepdims=True)
        var = jnp.mean((v - mu) ** 2, axis=-1, keepdims=True)
        return (v - mu) / jnp.sqrt(var + LN_EPS) * g + b

    x = params['tok_emb'][idx] + params['pos_emb'][:T]
    mask = jnp.tril(jnp.ones((T, T)))
    for l in range(N_LAYERS):
        h = ln(x, params['ln1_g'][l, 0], params['ln1_b'][l, 0])
        wqkv = params['w_qkv'][l]
        heads = []
        for hd in range(NUM_HEADS):
            lo = hd * HEAD_SIZE
            q = h @ wqkv[:, lo:lo + HEAD_SIZE]
            k = h @ wqkv[:, C + lo:C + lo + HEAD_SIZE]
            v = h @ wqkv[:, 2 * C + lo:2 * C + lo + HEAD_SIZE]
            s = (q @ jnp.swapaxes(k, -2, -1)) * (C ** (-0.5))
            s = jnp.where(mask == 0, -jnp.inf, s)
            a = jax.nn.softmax(s, axis=-1)
            heads.append(a @ v)
        cat = jnp.concatenate(heads, axis=-1)
        x = h + cat @ params['w_proj'][l] + params['b_proj'][l, 0]
        h2 = ln(x, params['ln2_g'][l, 0], params['ln2_b'][l, 0])
        ff = jax.nn.relu(h2 @ params['w_ff1'][l] + params['b_ff1'][l, 0])
        ff = ff @ params['w_ff2'][l] + params['b_ff2'][l, 0]
        x = h2 + ff
    xf = ln(x, params['lnf_g'][0], params['lnf_b'][0])
    return xf @ params['w_head'] + params['b_head'][0]


if __name__ == "__main__":
    key = jax.random.PRNGKey(0)
    keys = jax.random.split(key, 18)
    B, T, C, V, L = 2, SEQ_SIZE, N_EMBD, VOCAB_SIZE, N_LAYERS

    def normal(k, shape, scale):
        return jax.random.normal(k, shape, dtype=jnp.float32) * scale

    params = {
        'tok_emb': normal(keys[0], (V, C), 0.02),
        'pos_emb': normal(keys[1], (T, C), 0.02),
        'ln1_g': 1.0 + normal(keys[2], (L, 1, C), 0.02),
        'ln1_b': normal(keys[3], (L, 1, C), 0.02),
        'w_qkv': normal(keys[4], (L, C, 3 * C), C ** -0.5),   # [Q_all | K_all | V_all]
        'w_proj': normal(keys[5], (L, C, C), C ** -0.5),
        'b_proj': normal(keys[6], (L, 1, C), 0.02),
        'ln2_g': 1.0 + normal(keys[7], (L, 1, C), 0.02),
        'ln2_b': normal(keys[8], (L, 1, C), 0.02),
        'w_ff1': normal(keys[9], (L, C, FFN_HIDDEN), C ** -0.5),
        'b_ff1': normal(keys[10], (L, 1, FFN_HIDDEN), 0.02),
        'w_ff2': normal(keys[11], (L, FFN_HIDDEN, C), FFN_HIDDEN ** -0.5),
        'b_ff2': normal(keys[12], (L, 1, C), 0.02),
        'lnf_g': 1.0 + normal(keys[13], (1, C), 0.02),
        'lnf_b': normal(keys[14], (1, C), 0.02),
        'w_head': normal(keys[15], (C, V), C ** -0.5),
        'b_head': normal(keys[16], (1, V), 0.02),
    }
    idx = jax.random.randint(keys[17], (B, T), 0, V, dtype=jnp.int32)

    logits = gpt_forward(idx, params)
    logits = jax.block_until_ready(logits)

    ref = reference_forward(idx, params)
    assert logits.shape == (B, T, V)
    # exact softmax division in-kernel -> tight tolerance (catches layout/index bugs)
    assert jnp.allclose(logits, ref, atol=1e-4, rtol=1e-4), (
        "mismatch vs reference, max abs err = "
        f"{float(jnp.max(jnp.abs(logits - ref)))}")

    # TODO(synk): cross-entropy loss (targets path) and generate()'s multinomial
    # sampling loop are host-level control flow and are intentionally not kernelized.
    print("KERNEL_OK")
</pallas_src>

<mosaic_0001>
module attributes {stable_mosaic.version = 11 : i64} {
  func.func @gpt_forward_kernel(%arg0: memref<16x1xi32, #tpu.memory_space<vmem>>, %arg1: memref<3x232x128xf32, #tpu.memory_space<vmem>>, %arg2: memref<176x128xf32, #tpu.memory_space<vmem>>, %arg3: memref<16x128xf32, #tpu.memory_space<vmem>>) attributes {dimension_semantics = [], scalar_prefetch = 0 : i64, scratch_operands = 0 : i64, tpu.core_type = #tpu.core_type<tc>} {
    %c0 = arith.constant 0 : index
    %c0_0 = arith.constant 0 : index
    %0 = vector.load %arg0[%c0, %c0_0] : memref<16x1xi32, #tpu.memory_space<vmem>>, vector<16x1xi32>
    %1 = tpu.iota {dimensions = array<i32: 1>} : vector<16x128xi32>
    %2 = vector.broadcast %0 : vector<16x1xi32> to vector<16x128xi32>
    %3 = arith.cmpi eq, %1, %2 : vector<16x128xi32>
    %4 = arith.extui %3 : vector<16x128xi1> to vector<16x128xi32>
    %5 = arith.sitofp %4 : vector<16x128xi32> to vector<16x128xf32>
    %c0_1 = arith.constant 0 : index
    %c0_2 = arith.constant 0 : index
    %6 = vector.load %arg2[%c0_1, %c0_2] : memref<176x128xf32, #tpu.memory_space<vmem>>, vector<128x32xf32>
    %cst = arith.constant dense<0.000000e+00> : vector<16x32xf32>
    %7 = tpu.matmul %5, %6, %cst {dimension_numbers = #tpu.dot_dimension_numbers<[1], [0], [0], [1], [0, 0, 1, 1], [], []>} : vector<16x128xf32>, vector<128x32xf32>, vector<16x32xf32> -> vector<16x32xf32>
    %c128 = arith.constant 128 : index
    %c0_3 = arith.constant 0 : index
    %8 = vector.load %arg2[%c128, %c0_3] : memref<176x128xf32, #tpu.memory_space<vmem>>, vector<8x32xf32>
    %9 = vector.shape_cast %7 : vector<16x32xf32> to vector<2x8x32xf32>
    %10 = vector.shape_cast %8 : vector<8x32xf32> to vector<1x8x32xf32>
    %11 = vector.broadcast %10 : vector<1x8x32xf32> to vector<2x8x32xf32>
    %12 = arith.addf %9, %11 : vector<2x8x32xf32>
    %13 = vector.shape_cast %12 : vector<2x8x32xf32> to vector<16x32xf32>
    %14 = tpu.iota {dimensions = array<i32: 1>} : vector<1x8x8xi32>
    %15 = tpu.iota {dimensions = array<i32: 2>} : vector<1x8x8xi32>
    %16 = arith.cmpi sle, %15, %14 : vector<1x8x8xi32>
    %cst_4 = arith.constant 0.000000e+00 : f32
    %cst_5 = arith.constant -1.000000e+30 : f32
    %17 = vector.broadcast %cst_4 : f32 to vector<1x8x8xf32>
    %18 = vector.broadcast %cst_5 : f32 to vector<1x8x8xf32>
    %19 = arith.select %16, %17, %18 : vector<1x8x8xi1>, vector<1x8x8xf32>
    %c0_6 = arith.constant 0 : index
    %c0_7 = arith.constant 0 : index
    %c0_8 = arith.constant 0 : index
    %20 = vector.load %arg1[%c0_6, %c0_7, %c0_8] : memref<3x232x128xf32, #tpu.memory_space<vmem>>, vector<1x32x96xf32>
    %21 = vector.shape_cast %20 : vector<1x32x96xf32> to vector<32x96xf32>
    %c0_9 = arith.constant 0 : index
    %c32 = arith.constant 32 : index
    %c0_10 = arith.constant 0 : index
    %22 = vector.load %arg1[%c0_9, %c32, %c0_10] : memref<3x232x128xf32, #tpu.memory_space<vmem>>, vector<1x32x32xf32>
    %23 = vector.shape_cast %22 : vector<1x32x32xf32> to vector<32x32xf32>
    %c0_11 = arith.constant 0 : index
    %c64 = arith.constant 64 : index
    %c0_12 = arith.constant 0 : index
    %24 = vector.load %arg1[%c0_11, %c64, %c0_12] : memref<3x232x128xf32, #tpu.memory_space<vmem>>, vector<1x32x128xf32>
    %25 = vector.shape_cast %24 : vector<1x32x128xf32> to vector<32x128xf32>
    %c0_13 = arith.constant 0 : index
    %c96 = arith.constant 96 : index
    %c0_14 = arith.constant 0 : index
    %26 = vector.load %arg1[%c0_13, %c96, %c0_14] : memref<3x232x128xf32, #tpu.memory_space<vmem>>, vector<1x128x32xf32>
    %27 = vector.shape_cast %26 : vector<1x128x32xf32> to vector<128x32xf32>
    %c0_15 = arith.constant 0 : index
    %c224 = arith.constant 224 : index
    %c0_16 = arith.constant 0 : index
    %28 = vector.load %arg1[%c0_15, %c224, %c0_16] : memref<3x232x128xf32, #tpu.memory_space<vmem>>, vector<1x1x32xf32>
    %29 = vector.shape_cast %28 : vector<1x1x32xf32> to vector<1x32xf32>
    %c0_17 = arith.constant 0 : index
    %c225 = arith.constant 225 : index
    %c0_18 = arith.constant 0 : index
    %30 = vector.load %arg1[%c0_17, %c225, %c0_18] : memref<3x232x128xf32, #tpu.memory_space<vmem>>, vector<1x1x32xf32>
    %31 = vector.shape_cast %30 : vector<1x1x32xf32> to vector<1x32xf32>
    %c0_19 = arith.constant 0 : index
    %c226 = arith.constant 226 : index
    %c0_20 = arith.constant 0 : index
    %32 = vector.load %arg1[%c0_19, %c226, %c0_20] : memref<3x232x128xf32, #tpu.memory_space<vmem>>, vector<1x1x32xf32>
    %33 = vector.shape_cast %32 : vector<1x1x32xf32> to vector<1x32xf32>
    %c0_21 = arith.constant 0 : index
    %c227 = arith.constant 227 : index
    %c0_22 = arith.constant 0 : index
    %34 = vector.load %arg1[%c0_21, %c227, %c0_22] : memref<3x232x128xf32, #tpu.memory_space<vmem>>, vector<1x1x32xf32>
    %35 = vector.shape_cast %34 : vector<1x1x32xf32> to vector<1x32xf32>
    %c0_23 = arith.constant 0 : index
    %c228 = arith.constant 228 : index
    %c0_24 = arith.constant 0 : index
    %36 = vector.load %arg1[%c0_23, %c228, %c0_24] : memref<3x232x128xf32, #tpu.memory_space<vmem>>, vector<1x1x32xf32>
    %37 = vector.shape_cast %36 : vector<1x1x32xf32> to vector<1x32xf32>
    %c0_25 = arith.constant 0 : index
    %c229 = arith.constant 229 : index
    %c0_26 = arith.constant 0 : index
    %38 = vector.load %arg1[%c0_25, %c229, %c0_26] : memref<3x232x128xf32, #tpu.memory_space<vmem>>, vector<1x1x32xf32>
    %39 = vector.shape_cast %38 : vector<1x1x32xf32> to vector<1x32xf32>
    %c0_27 = arith.constant 0 : index
    %c230 = arith.constant 230 : index
    %c0_28 = arith.constant 0 : index
    %40 = vector.load %arg1[%c0_27, %c230, %c0_28] : memref<3x232x128xf32, #tpu.memory_space<vmem>>, vector<1x1x128xf32>
    %41 = vector.shape_cast %40 : vector<1x1x128xf32> to vector<1x128xf32>
    %cst_29 = arith.constant dense<0.000000e+00> : vector<16xf32>
    %42 = vector.multi_reduction <add>, %13, %cst_29 [1] : vector<16x32xf32> to vector<16xf32>
    %43 = vector.shape_cast %42 : vector<16xf32> to vector<16x1xf32>
    %cst_30 = arith.constant 3.200000e+01 : f32
    %44 = vector.broadcast %cst_30 : f32 to vector<16x1xf32>
    %45 = arith.divf %43, %44 : vector<16x1xf32>
    %46 = vector.broadcast %45 : vector<16x1xf32> to vector<16x32xf32>
    %47 = arith.subf %13, %46 : vector<16x32xf32>
    %48 = arith.mulf %47, %47 : vector<16x32xf32>
    %cst_31 = arith.constant dense<0.000000e+00> : vector<16xf32>
    %49 = vector.multi_reduction <add>, %48, %cst_31 [1] : vector<16x32xf32> to vector<16xf32>
    %50 = vector.shape_cast %49 : vector<16xf32> to vector<16x1xf32>
    %cst_32 = arith.constant 3.200000e+01 : f32
    %51 = vector.broadcast %cst_32 : f32 to vector<16x1xf32>
    %52 = arith.divf %50, %51 : vector<16x1xf32>
    %cst_33 = arith.constant 9.99999974E-6 : f32
    %53 = vector.broadcast %cst_33 : f32 to vector<16x1xf32>
    %54 = arith.addf %52, %53 : vector<16x1xf32>
    %55 = math.rsqrt %54 : vector<16x1xf32>
    %56 = vector.broadcast %55 : vector<16x1xf32> to vector<16x32xf32>
    %57 = arith.mulf %47, %56 : vector<16x32xf32>
    %58 = vector.broadcast %29 : vector<1x32xf32> to vector<16x32xf32>
    %59 = arith.mulf %57, %58 : vector<16x32xf32>
    %60 = vector.broadcast %31 : vector<1x32xf32> to vector<16x32xf32>
    %61 = arith.addf %59, %60 : vector<16x32xf32>
    %cst_34 = arith.constant dense<0.000000e+00> : vector<16x96xf32>
    %62 = tpu.matmul %61, %21, %cst_34 {dimension_numbers = #tpu.dot_dimension_numbers<[1], [0], [0], [1], [0, 0, 1, 1], [], []>} : vector<16x32xf32>, vector<32x96xf32>, vector<16x96xf32> -> vector<16x96xf32>
    %63 = vector.shape_cast %62 : vector<16x96xf32> to vector<2x8x96xf32>
    %64 = vector.extract_strided_slice %63 {offsets = [0, 0, 0], sizes = [2, 8, 32], strides = [1, 1, 1]} : vector<2x8x96xf32> to vector<2x8x32xf32>
    %65 = vector.extract_strided_slice %63 {offsets = [0, 0, 32], sizes = [2, 8, 32], strides = [1, 1, 1]} : vector<2x8x96xf32> to vector<2x8x32xf32>
    %66 = vector.extract_strided_slice %63 {offsets = [0, 0, 64], sizes = [2, 8, 32], strides = [1, 1, 1]} : vector<2x8x96xf32> to vector<2x8x32xf32>
    %67 = vector.extract_strided_slice %64 {offsets = [0, 0, 0], sizes = [2, 8, 8], strides = [1, 1, 1]} : vector<2x8x32xf32> to vector<2x8x8xf32>
    %68 = vector.extract_strided_slice %65 {offsets = [0, 0, 0], sizes = [2, 8, 8], strides = [1, 1, 1]} : vector<2x8x32xf32> to vector<2x8x8xf32>
    %69 = vector.extract_strided_slice %66 {offsets = [0, 0, 0], sizes = [2, 8, 8], strides = [1, 1, 1]} : vector<2x8x32xf32> to vector<2x8x8xf32>
    "tpu.trace_start"() <{level = 10 : i32, message = "bqd,bkd->bqk"}> : () -> ()
    %cst_35 = arith.constant dense<0.000000e+00> : vector<2x8x8xf32>
    %70 = tpu.matmul %67, %68, %cst_35 {dimension_numbers = #tpu.dot_dimension_numbers<[2], [2], [1], [1], [0, 0, 0, 1, 1, 1], [0], [0]>} : vector<2x8x8xf32>, vector<2x8x8xf32>, vector<2x8x8xf32> -> vector<2x8x8xf32>
    "tpu.trace_stop"() : () -> ()
    %71 = vector.broadcast %19 : vector<1x8x8xf32> to vector<2x8x8xf32>
    %72 = arith.addf %70, %71 : vector<2x8x8xf32>
    %cst_36 = arith.constant dense<0xFF800000> : vector<2x8xf32>
    %73 = vector.multi_reduction <maximumf>, %72, %cst_36 [2] : vector<2x8x8xf32> to vector<2x8xf32>
    %74 = vector.shape_cast %73 : vector<2x8xf32> to vector<2x8x1xf32>
    %75 = vector.broadcast %74 : vector<2x8x1xf32> to vector<2x8x8xf32>
    %76 = arith.subf %72, %75 : vector<2x8x8xf32>
    %77 = math.exp %76 : vector<2x8x8xf32>
    %cst_37 = arith.constant dense<0.000000e+00> : vector<2x8xf32>
    %78 = vector.multi_reduction <add>, %77, %cst_37 [2] : vector<2x8x8xf32> to vector<2x8xf32>
    %79 = vector.shape_cast %78 : vector<2x8xf32> to vector<2x8x1xf32>
    %80 = vector.broadcast %79 : vector<2x8x1xf32> to vector<2x8x8xf32>
    %81 = arith.divf %77, %80 : vector<2x8x8xf32>
    "tpu.trace_start"() <{level = 10 : i32, message = "bqk,bkd->bqd"}> : () -> ()
    %cst_38 = arith.constant dense<0.000000e+00> : vector<2x8x8xf32>
    %82 = tpu.matmul %81, %69, %cst_38 {dimension_numbers = #tpu.dot_dimension_numbers<[2], [1], [1], [2], [0, 0, 0, 1, 1, 2], [0], [0]>} : vector<2x8x8xf32>, vector<2x8x8xf32>, vector<2x8x8xf32> -> vector<2x8x8xf32>
    "tpu.trace_stop"() : () -> ()
    %83 = vector.extract_strided_slice %64 {offsets = [0, 0, 8], sizes = [2, 8, 8], strides = [1, 1, 1]} : vector<2x8x32xf32> to vector<2x8x8xf32>
    %84 = vector.extract_strided_slice %65 {offsets = [0, 0, 8], sizes = [2, 8, 8], strides = [1, 1, 1]} : vector<2x8x32xf32> to vector<2x8x8xf32>
    %85 = vector.extract_strided_slice %66 {offsets = [0, 0, 8], sizes = [2, 8, 8], strides = [1, 1, 1]} : vector<2x8x32xf32> to vector<2x8x8xf32>
    "tpu.trace_start"() <{level = 10 : i32, message = "bqd,bkd->bqk"}> : () -> ()
    %cst_39 = arith.constant dense<0.000000e+00> : vector<2x8x8xf32>
    %86 = tpu.matmul %83, %84, %cst_39 {dimension_numbers = #tpu.dot_dimension_numbers<[2], [2], [1], [1], [0, 0, 0, 1, 1, 1], [0], [0]>} : vector<2x8x8xf32>, vector<2x8x8xf32>, vector<2x8x8xf32> -> vector<2x8x8xf32>
    "tpu.trace_stop"() : () -> ()
    %87 = vector.broadcast %19 : vector<1x8x8xf32> to vector<2x8x8xf32>
    %88 = arith.addf %86, %87 : vector<2x8x8xf32>
    %cst_40 = arith.constant dense<0xFF800000> : vector<2x8xf32>
    %89 = vector.multi_reduction <maximumf>, %88, %cst_40 [2] : vector<2x8x8xf32> to vector<2x8xf32>
    %90 = vector.shape_cast %89 : vector<2x8xf32> to vector<2x8x1xf32>
    %91 = vector.broadcast %90 : vector<2x8x1xf32> to vector<2x8x8xf32>
    %92 = arith.subf %88, %91 : vector<2x8x8xf32>
    %93 = math.exp %92 : vector<2x8x8xf32>
    %cst_41 = arith.constant dense<0.000000e+00> : vector<2x8xf32>
    %94 = vector.multi_reduction <add>, %93, %cst_41 [2] : vector<2x8x8xf32> to vector<2x8xf32>
    %95 = vector.shape_cast %94 : vector<2x8xf32> to vector<2x8x1xf32>
    %96 = vector.broadcast %95 : vector<2x8x1xf32> to vector<2x8x8xf32>
    %97 = arith.divf %93, %96 : vector<2x8x8xf32>
    "tpu.trace_start"() <{level = 10 : i32, message = "bqk,bkd->bqd"}> : () -> ()
    %cst_42 = arith.constant dense<0.000000e+00> : vector<2x8x8xf32>
    %98 = tpu.matmul %97, %85, %cst_42 {dimension_numbers = #tpu.dot_dimension_numbers<[2], [1], [1], [2], [0, 0, 0, 1, 1, 2], [0], [0]>} : vector<2x8x8xf32>, vector<2x8x8xf32>, vector<2x8x8xf32> -> vector<2x8x8xf32>
    "tpu.trace_stop"() : () -> ()
    %99 = vector.extract_strided_slice %64 {offsets = [0, 0, 16], sizes = [2, 8, 8], strides = [1, 1, 1]} : vector<2x8x32xf32> to vector<2x8x8xf32>
    %100 = vector.extract_strided_slice %65 {offsets = [0, 0, 16], sizes = [2, 8, 8], strides = [1, 1, 1]} : vector<2x8x32xf32> to vector<2x8x8xf32>
    %101 = vector.extract_strided_slice %66 {offsets = [0, 0, 16], sizes = [2, 8, 8], strides = [1, 1, 1]} : vector<2x8x32xf32> to vector<2x8x8xf32>
    "tpu.trace_start"() <{level = 10 : i32, message = "bqd,bkd->bqk"}> : () -> ()
    %cst_43 = arith.constant dense<0.000000e+00> : vector<2x8x8xf32>
    %102 = tpu.matmul %99, %100, %cst_43 {dimension_numbers = #tpu.dot_dimension_numbers<[2], [2], [1], [1], [0, 0, 0, 1, 1, 1], [0], [0]>} : vector<2x8x8xf32>, vector<2x8x8xf32>, vector<2x8x8xf32> -> vector<2x8x8xf32>
    "tpu.trace_stop"() : () -> ()
    %103 = vector.broadcast %19 : vector<1x8x8xf32> to vector<2x8x8xf32>
    %104 = arith.addf %102, %103 : vector<2x8x8xf32>
    %cst_44 = arith.constant dense<0xFF800000> : vector<2x8xf32>
    %105 = vector.multi_reduction <maximumf>, %104, %cst_44 [2] : vector<2x8x8xf32> to vector<2x8xf32>
    %106 = vector.shape_cast %105 : vector<2x8xf32> to vector<2x8x1xf32>
    %107 = vector.broadcast %106 : vector<2x8x1xf32> to vector<2x8x8xf32>
    %108 = arith.subf %104, %107 : vector<2x8x8xf32>
    %109 = math.exp %108 : vector<2x8x8xf32>
    %cst_45 = arith.constant dense<0.000000e+00> : vector<2x8xf32>
    %110 = vector.multi_reduction <add>, %109, %cst_45 [2] : vector<2x8x8xf32> to vector<2x8xf32>
    %111 = vector.shape_cast %110 : vector<2x8xf32> to vector<2x8x1xf32>
    %112 = vector.broadcast %111 : vector<2x8x1xf32> to vector<2x8x8xf32>
    %113 = arith.divf %109, %112 : vector<2x8x8xf32>
    "tpu.trace_start"() <{level = 10 : i32, message = "bqk,bkd->bqd"}> : () -> ()
    %cst_46 = arith.constant dense<0.000000e+00> : vector<2x8x8xf32>
    %114 = tpu.matmul %113, %101, %cst_46 {dimension_numbers = #tpu.dot_dimension_numbers<[2], [1], [1], [2], [0, 0, 0, 1, 1, 2], [0], [0]>} : vector<2x8x8xf32>, vector<2x8x8xf32>, vector<2x8x8xf32> -> vector<2x8x8xf32>
    "tpu.trace_stop"() : () -> ()
    %115 = vector.extract_strided_slice %64 {offsets = [0, 0, 24], sizes = [2, 8, 8], strides = [1, 1, 1]} : vector<2x8x32xf32> to vector<2x8x8xf32>
    %116 = vector.extract_strided_slice %65 {offsets = [0, 0, 24], sizes = [2, 8, 8], strides = [1, 1, 1]} : vector<2x8x32xf32> to vector<2x8x8xf32>
    %117 = vector.extract_strided_slice %66 {offsets = [0, 0, 24], sizes = [2, 8, 8], strides = [1, 1, 1]} : vector<2x8x32xf32> to vector<2x8x8xf32>
    "tpu.trace_start"() <{level = 10 : i32, message = "bqd,bkd->bqk"}> : () -> ()
    %cst_47 = arith.constant dense<0.000000e+00> : vector<2x8x8xf32>
    %118 = tpu.matmul %115, %116, %cst_47 {dimension_numbers = #tpu.dot_dimension_numbers<[2], [2], [1], [1], [0, 0, 0, 1, 1, 1], [0], [0]>} : vector<2x8x8xf32>, vector<2x8x8xf32>, vector<2x8x8xf32> -> vector<2x8x8xf32>
    "tpu.trace_stop"() : () -> ()
    %119 = vector.broadcast %19 : vector<1x8x8xf32> to vector<2x8x8xf32>
    %120 = arith.addf %118, %119 : vector<2x8x8xf32>
    %cst_48 = arith.constant dense<0xFF800000> : vector<2x8xf32>
    %121 = vector.multi_reduction <maximumf>, %120, %cst_48 [2] : vector<2x8x8xf32> to vector<2x8xf32>
    %122 = vector.shape_cast %121 : vector<2x8xf32> to vector<2x8x1xf32>
    %123 = vector.broadcast %122 : vector<2x8x1xf32> to vector<2x8x8xf32>
    %124 = arith.subf %120, %123 : vector<2x8x8xf32>
    %125 = math.exp %124 : vector<2x8x8xf32>
    %cst_49 = arith.constant dense<0.000000e+00> : vector<2x8xf32>
    %126 = vector.multi_reduction <add>, %125, %cst_49 [2] : vector<2x8x8xf32> to vector<2x8xf32>
    %127 = vector.shape_cast %126 : vector<2x8xf32> to vector<2x8x1xf32>
    %128 = vector.broadcast %127 : vector<2x8x1xf32> to vector<2x8x8xf32>
    %129 = arith.divf %125, %128 : vector<2x8x8xf32>
    "tpu.trace_start"() <{level = 10 : i32, message = "bqk,bkd->bqd"}> : () -> ()
    %cst_50 = arith.constant dense<0.000000e+00> : vector<2x8x8xf32>
    %130 = tpu.matmul %129, %117, %cst_50 {dimension_numbers = #tpu.dot_dimension_numbers<[2], [1], [1], [2], [0, 0, 0, 1, 1, 2], [0], [0]>} : vector<2x8x8xf32>, vector<2x8x8xf32>, vector<2x8x8xf32> -> vector<2x8x8xf32>
    "tpu.trace_stop"() : () -> ()
    %131 = tpu.concatenate %82, %98, %114, %130 in 2 : vector<2x8x8xf32>, vector<2x8x8xf32>, vector<2x8x8xf32>, vector<2x8x8xf32> -> vector<2x8x32xf32>
    %132 = vector.shape_cast %131 : vector<2x8x32xf32> to vector<16x32xf32>
    %cst_51 = arith.constant dense<0.000000e+00> : vector<16x32xf32>
    %133 = tpu.matmul %132, %23, %cst_51 {dimension_numbers = #tpu.dot_dimension_numbers<[1], [0], [0], [1], [0, 0, 1, 1], [], []>} : vector<16x32xf32>, vector<32x32xf32>, vector<16x32xf32> -> vector<16x32xf32>
    %134 = arith.addf %61, %133 : vector<16x32xf32>
    %135 = vector.broadcast %37 : vector<1x32xf32> to vector<16x32xf32>
    %136 = arith.addf %134, %135 : vector<16x32xf32>
    %cst_52 = arith.constant dense<0.000000e+00> : vector<16xf32>
    %137 = vector.multi_reduction <add>, %136, %cst_52 [1] : vector<16x32xf32> to vector<16xf32>
    %138 = vector.shape_cast %137 : vector<16xf32> to vector<16x1xf32>
    %cst_53 = arith.constant 3.200000e+01 : f32
    %139 = vector.broadcast %cst_53 : f32 to vector<16x1xf32>
    %140 = arith.divf %138, %139 : vector<16x1xf32>
    %141 = vector.broadcast %140 : vector<16x1xf32> to vector<16x32xf32>
    %142 = arith.subf %136, %141 : vector<16x32xf32>
    %143 = arith.mulf %142, %142 : vector<16x32xf32>
    %cst_54 = arith.constant dense<0.000000e+00> : vector<16xf32>
    %144 = vector.multi_reduction <add>, %143, %cst_54 [1] : vector<16x32xf32> to vector<16xf32>
    %145 = vector.shape_cast %144 : vector<16xf32> to vector<16x1xf32>
    %cst_55 = arith.constant 3.200000e+01 : f32
    %146 = vector.broadcast %cst_55 : f32 to vector<16x1xf32>
    %147 = arith.divf %145, %146 : vector<16x1xf32>
    %cst_56 = arith.constant 9.99999974E-6 : f32
    %148 = vector.broadcast %cst_56 : f32 to vector<16x1xf32>
    %149 = arith.addf %147, %148 : vector<16x1xf32>
    %150 = math.rsqrt %149 : vector<16x1xf32>
    %151 = vector.broadcast %150 : vector<16x1xf32> to vector<16x32xf32>
    %152 = arith.mulf %142, %151 : vector<16x32xf32>
    %153 = vector.broadcast %33 : vector<1x32xf32> to vector<16x32xf32>
    %154 = arith.mulf %152, %153 : vector<16x32xf32>
    %155 = vector.broadcast %35 : vector<1x32xf32> to vector<16x32xf32>
    %156 = arith.addf %154, %155 : vector<16x32xf32>
    %cst_57 = arith.constant dense<0.000000e+00> : vector<16x128xf32>
    %157 = tpu.matmul %156, %25, %cst_57 {dimension_numbers = #tpu.dot_dimension_numbers<[1], [0], [0], [1], [0, 0, 1, 1], [], []>} : vector<16x32xf32>, vector<32x128xf32>, vector<16x128xf32> -> vector<16x128xf32>
    %158 = vector.broadcast %41 : vector<1x128xf32> to vector<16x128xf32>
    %159 = arith.addf %157, %158 : vector<16x128xf32>
    %cst_58 = arith.constant 0.000000e+00 : f32
    %160 = vector.broadcast %cst_58 : f32 to vector<16x128xf32>
    %161 = arith.maximumf %159, %160 : vector<16x128xf32>
    %cst_59 = arith.constant dense<0.000000e+00> : vector<16x32xf32>
    %162 = tpu.matmul %161, %27, %cst_59 {dimension_numbers = #tpu.dot_dimension_numbers<[1], [0], [0], [1], [0, 0, 1, 1], [], []>} : vector<16x128xf32>, vector<128x32xf32>, vector<16x32xf32> -> vector<16x32xf32>
    %163 = vector.broadcast %39 : vector<1x32xf32> to vector<16x32xf32>
    %164 = arith.addf %162, %163 : vector<16x32xf32>
    %165 = arith.addf %156, %164 : vector<16x32xf32>
    %c1 = arith.constant 1 : index
    %c0_60 = arith.constant 0 : index
    %c0_61 = arith.constant 0 : index
    %166 = vector.load %arg1[%c1, %c0_60, %c0_61] : memref<3x232x128xf32, #tpu.memory_space<vmem>>, vector<1x32x96xf32>
    %167 = vector.shape_cast %166 : vector<1x32x96xf32> to vector<32x96xf32>
    %c1_62 = arith.constant 1 : index
    %c32_63 = arith.constant 32 : index
    %c0_64 = arith.constant 0 : index
    %168 = vector.load %arg1[%c1_62, %c32_63, %c0_64] : memref<3x232x128xf32, #tpu.memory_space<vmem>>, vector<1x32x32xf32>
    %169 = vector.shape_cast %168 : vector<1x32x32xf32> to vector<32x32xf32>
    %c1_65 = arith.constant 1 : index
    %c64_66 = arith.constant 64 : index
    %c0_67 = arith.constant 0 : index
    %170 = vector.load %arg1[%c1_65, %c64_66, %c0_67] : memref<3x232x128xf32, #tpu.memory_space<vmem>>, vector<1x32x128xf32>
    %171 = vector.shape_cast %170 : vector<1x32x128xf32> to vector<32x128xf32>
    %c1_68 = arith.constant 1 : index
    %c96_69 = arith.constant 96 : index
    %c0_70 = arith.constant 0 : index
    %172 = vector.load %arg1[%c1_68, %c96_69, %c0_70] : memref<3x232x128xf32, #tpu.memory_space<vmem>>, vector<1x128x32xf32>
    %173 = vector.shape_cast %172 : vector<1x128x32xf32> to vector<128x32xf32>
    %c1_71 = arith.constant 1 : index
    %c224_72 = arith.constant 224 : index
    %c0_73 = arith.constant 0 : index
    %174 = vector.load %arg1[%c1_71, %c224_72, %c0_73] : memref<3x232x128xf32, #tpu.memory_space<vmem>>, vector<1x1x32xf32>
    %175 = vector.shape_cast %174 : vector<1x1x32xf32> to vector<1x32xf32>
    %c1_74 = arith.constant 1 : index
    %c225_75 = arith.constant 225 : index
    %c0_76 = arith.constant 0 : index
    %176 = vector.load %arg1[%c1_74, %c225_75, %c0_76] : memref<3x232x128xf32, #tpu.memory_space<vmem>>, vector<1x1x32xf32>
    %177 = vector.shape_cast %176 : vector<1x1x32xf32> to vector<1x32xf32>
    %c1_77 = arith.constant 1 : index
    %c226_78 = arith.constant 226 : index
    %c0_79 = arith.constant 0 : index
    %178 = vector.load %arg1[%c1_77, %c226_78, %c0_79] : memref<3x232x128xf32, #tpu.memory_space<vmem>>, vector<1x1x32xf32>
    %179 = vector.shape_cast %178 : vector<1x1x32xf32> to vector<1x32xf32>
    %c1_80 = arith.constant 1 : index
    %c227_81 = arith.constant 227 : index
    %c0_82 = arith.constant 0 : index
    %180 = vector.load %arg1[%c1_80, %c227_81, %c0_82] : memref<3x232x128xf32, #tpu.memory_space<vmem>>, vector<1x1x32xf32>
    %181 = vector.shape_cast %180 : vector<1x1x32xf32> to vector<1x32xf32>
    %c1_83 = arith.constant 1 : index
    %c228_84 = arith.constant 228 : index
    %c0_85 = arith.constant 0 : index
    %182 = vector.load %arg1[%c1_83, %c228_84, %c0_85] : memref<3x232x128xf32, #tpu.memory_space<vmem>>, vector<1x1x32xf32>
    %183 = vector.shape_cast %182 : vector<1x1x32xf32> to vector<1x32xf32>
    %c1_86 = arith.constant 1 : index
    %c229_87 = arith.constant 229 : index
    %c0_88 = arith.constant 0 : index
    %184 = vector.load %arg1[%c1_86, %c229_87, %c0_88] : memref<3x232x128xf32, #tpu.memory_space<vmem>>, vector<1x1x32xf32>
    %185 = vector.shape_cast %184 : vector<1x1x32xf32> to vector<1x32xf32>
    %c1_89 = arith.constant 1 : index
    %c230_90 = arith.constant 230 : index
    %c0_91 = arith.constant 0 : index
    %186 = vector.load %arg1[%c1_89, %c230_90, %c0_91] : memref<3x232x128xf32, #tpu.memory_space<vmem>>, vector<1x1x128xf32>
    %187 = vector.shape_cast %186 : vector<1x1x128xf32> to vector<1x128xf32>
    %cst_92 = arith.constant dense<0.000000e+00> : vector<16xf32>
    %188 = vector.multi_reduction <add>, %165, %cst_92 [1] : vector<16x32xf32> to vector<16xf32>
    %189 = vector.shape_cast %188 : vector<16xf32> to vector<16x1xf32>
    %cst_93 = arith.constant 3.200000e+01 : f32
    %190 = vector.broadcast %cst_93 : f32 to vector<16x1xf32>
    %191 = arith.divf %189, %190 : vector<16x1xf32>
    %192 = vector.broadcast %191 : vector<16x1xf32> to vector<16x32xf32>
    %193 = arith.subf %165, %192 : vector<16x32xf32>
    %194 = arith.mulf %193, %193 : vector<16x32xf32>
    %cst_94 = arith.constant dense<0.000000e+00> : vector<16xf32>
    %195 = vector.multi_reduction <add>, %194, %cst_94 [1] : vector<16x32xf32> to vector<16xf32>
    %196 = vector.shape_cast %195 : vector<16xf32> to vector<16x1xf32>
    %cst_95 = arith.constant 3.200000e+01 : f32
    %197 = vector.broadcast %cst_95 : f32 to vector<16x1xf32>
    %198 = arith.divf %196, %197 : vector<16x1xf32>
    %cst_96 = arith.constant 9.99999974E-6 : f32
    %199 = vector.broadcast %cst_96 : f32 to vector<16x1xf32>
    %200 = arith.addf %198, %199 : vector<16x1xf32>
    %201 = math.rsqrt %200 : vector<16x1xf32>
    %202 = vector.broadcast %201 : vector<16x1xf32> to vector<16x32xf32>
    %203 = arith.mulf %193, %202 : vector<16x32xf32>
    %204 = vector.broadcast %175 : vector<1x32xf32> to vector<16x32xf32>
    %205 = arith.mulf %203, %204 : vector<16x32xf32>
    %206 = vector.broadcast %177 : vector<1x32xf32> to vector<16x32xf32>
    %207 = arith.addf %205, %206 : vector<16x32xf32>
    %cst_97 = arith.constant dense<0.000000e+00> : vector<16x96xf32>
    %208 = tpu.matmul %207, %167, %cst_97 {dimension_numbers = #tpu.dot_dimension_numbers<[1], [0], [0], [1], [0, 0, 1, 1], [], []>} : vector<16x32xf32>, vector<32x96xf32>, vector<16x96xf32> -> vector<16x96xf32>
    %209 = vector.shape_cast %208 : vector<16x96xf32> to vector<2x8x96xf32>
    %210 = vector.extract_strided_slice %209 {offsets = [0, 0, 0], sizes = [2, 8, 32], strides = [1, 1, 1]} : vector<2x8x96xf32> to vector<2x8x32xf32>
    %211 = vector.extract_strided_slice %209 {offsets = [0, 0, 32], sizes = [2, 8, 32], strides = [1, 1, 1]} : vector<2x8x96xf32> to vector<2x8x32xf32>
    %212 = vector.extract_strided_slice %209 {offsets = [0, 0, 64], sizes = [2, 8, 32], strides = [1, 1, 1]} : vector<2x8x96xf32> to vector<2x8x32xf32>
    %213 = vector.extract_strided_slice %210 {offsets = [0, 0, 0], sizes = [2, 8, 8], strides = [1, 1, 1]} : vector<2x8x32xf32> to vector<2x8x8xf32>
    %214 = vector.extract_strided_slice %211 {offsets = [0, 0, 0], sizes = [2, 8, 8], strides = [1, 1, 1]} : vector<2x8x32xf32> to vector<2x8x8xf32>
    %215 = vector.extract_strided_slice %212 {offsets = [0, 0, 0], sizes = [2, 8, 8], strides = [1, 1, 1]} : vector<2x8x32xf32> to vector<2x8x8xf32>
    "tpu.trace_start"() <{level = 10 : i32, message = "bqd,bkd->bqk"}> : () -> ()
    %cst_98 = arith.constant dense<0.000000e+00> : vector<2x8x8xf32>
    %216 = tpu.matmul %213, %214, %cst_98 {dimension_numbers = #tpu.dot_dimension_numbers<[2], [2], [1], [1], [0, 0, 0, 1, 1, 1], [0], [0]>} : vector<2x8x8xf32>, vector<2x8x8xf32>, vector<2x8x8xf32> -> vector<2x8x8xf32>
    "tpu.trace_stop"() : () -> ()
    %217 = vector.broadcast %19 : vector<1x8x8xf32> to vector<2x8x8xf32>
    %218 = arith.addf %216, %217 : vector<2x8x8xf32>
    %cst_99 = arith.constant dense<0xFF800000> : vector<2x8xf32>
    %219 = vector.multi_reduction <maximumf>, %218, %cst_99 [2] : vector<2x8x8xf32> to vector<2x8xf32>
    %220 = vector.shape_cast %219 : vector<2x8xf32> to vector<2x8x1xf32>
    %221 = vector.broadcast %220 : vector<2x8x1xf32> to vector<2x8x8xf32>
    %222 = arith.subf %218, %221 : vector<2x8x8xf32>
    %223 = math.exp %222 : vector<2x8x8xf32>
    %cst_100 = arith.constant dense<0.000000e+00> : vector<2x8xf32>
    %224 = vector.multi_reduction <add>, %223, %cst_100 [2] : vector<2x8x8xf32> to vector<2x8xf32>
    %225 = vector.shape_cast %224 : vector<2x8xf32> to vector<2x8x1xf32>
    %226 = vector.broadcast %225 : vector<2x8x1xf32> to vector<2x8x8xf32>
    %227 = arith.divf %223, %226 : vector<2x8x8xf32>
    "tpu.trace_start"() <{level = 10 : i32, message = "bqk,bkd->bqd"}> : () -> ()
    %cst_101 = arith.constant dense<0.000000e+00> : vector<2x8x8xf32>
    %228 = tpu.matmul %227, %215, %cst_101 {dimension_numbers = #tpu.dot_dimension_numbers<[2], [1], [1], [2], [0, 0, 0, 1, 1, 2], [0], [0]>} : vector<2x8x8xf32>, vector<2x8x8xf32>, vector<2x8x8xf32> -> vector<2x8x8xf32>
    "tpu.trace_stop"() : () -> ()
    %229 = vector.extract_strided_slice %210 {offsets = [0, 0, 8], sizes = [2, 8, 8], strides = [1, 1, 1]} : vector<2x8x32xf32> to vector<2x8x8xf32>
    %230 = vector.extract_strided_slice %211 {offsets = [0, 0, 8], sizes = [2, 8, 8], strides = [1, 1, 1]} : vector<2x8x32xf32> to vector<2x8x8xf32>
    %231 = vector.extract_strided_slice %212 {offsets = [0, 0, 8], sizes = [2, 8, 8], strides = [1, 1, 1]} : vector<2x8x32xf32> to vector<2x8x8xf32>
    "tpu.trace_start"() <{level = 10 : i32, message = "bqd,bkd->bqk"}> : () -> ()
    %cst_102 = arith.constant dense<0.000000e+00> : vector<2x8x8xf32>
    %232 = tpu.matmul %229, %230, %cst_102 {dimension_numbers = #tpu.dot_dimension_numbers<[2], [2], [1], [1], [0, 0, 0, 1, 1, 1], [0], [0]>} : vector<2x8x8xf32>, vector<2x8x8xf32>, vector<2x8x8xf32> -> vector<2x8x8xf32>
    "tpu.trace_stop"() : () -> ()
    %233 = vector.broadcast %19 : vector<1x8x8xf32> to vector<2x8x8xf32>
    %234 = arith.addf %232, %233 : vector<2x8x8xf32>
    %cst_103 = arith.constant dense<0xFF800000> : vector<2x8xf32>
    %235 = vector.multi_reduction <maximumf>, %234, %cst_103 [2] : vector<2x8x8xf32> to vector<2x8xf32>
    %236 = vector.shape_cast %235 : vector<2x8xf32> to vector<2x8x1xf32>
    %237 = vector.broadcast %236 : vector<2x8x1xf32> to vector<2x8x8xf32>
    %238 = arith.subf %234, %237 : vector<2x8x8xf32>
    %239 = math.exp %238 : vector<2x8x8xf32>
    %cst_104 = arith.constant dense<0.000000e+00> : vector<2x8xf32>
    %240 = vector.multi_reduction <add>, %239, %cst_104 [2] : vector<2x8x8xf32> to vector<2x8xf32>
    %241 = vector.shape_cast %240 : vector<2x8xf32> to vector<2x8x1xf32>
    %242 = vector.broadcast %241 : vector<2x8x1xf32> to vector<2x8x8xf32>
    %243 = arith.divf %239, %242 : vector<2x8x8xf32>
    "tpu.trace_start"() <{level = 10 : i32, message = "bqk,bkd->bqd"}> : () -> ()
    %cst_105 = arith.constant dense<0.000000e+00> : vector<2x8x8xf32>
    %244 = tpu.matmul %243, %231, %cst_105 {dimension_numbers = #tpu.dot_dimension_numbers<[2], [1], [1], [2], [0, 0, 0, 1, 1, 2], [0], [0]>} : vector<2x8x8xf32>, vector<2x8x8xf32>, vector<2x8x8xf32> -> vector<2x8x8xf32>
    "tpu.trace_stop"() : () -> ()
    %245 = vector.extract_strided_slice %210 {offsets = [0, 0, 16], sizes = [2, 8, 8], strides = [1, 1, 1]} : vector<2x8x32xf32> to vector<2x8x8xf32>
    %246 = vector.extract_strided_slice %211 {offsets = [0, 0, 16], sizes = [2, 8, 8], strides = [1, 1, 1]} : vector<2x8x32xf32> to vector<2x8x8xf32>
    %247 = vector.extract_strided_slice %212 {offsets = [0, 0, 16], sizes = [2, 8, 8], strides = [1, 1, 1]} : vector<2x8x32xf32> to vector<2x8x8xf32>
    "tpu.trace_start"() <{level = 10 : i32, message = "bqd,bkd->bqk"}> : () -> ()
    %cst_106 = arith.constant dense<0.000000e+00> : vector<2x8x8xf32>
    %248 = tpu.matmul %245, %246, %cst_106 {dimension_numbers = #tpu.dot_dimension_numbers<[2], [2], [1], [1], [0, 0, 0, 1, 1, 1], [0], [0]>} : vector<2x8x8xf32>, vector<2x8x8xf32>, vector<2x8x8xf32> -> vector<2x8x8xf32>
    "tpu.trace_stop"() : () -> ()
    %249 = vector.broadcast %19 : vector<1x8x8xf32> to vector<2x8x8xf32>
    %250 = arith.addf %248, %249 : vector<2x8x8xf32>
    %cst_107 = arith.constant dense<0xFF800000> : vector<2x8xf32>
    %251 = vector.multi_reduction <maximumf>, %250, %cst_107 [2] : vector<2x8x8xf32> to vector<2x8xf32>
    %252 = vector.shape_cast %251 : vector<2x8xf32> to vector<2x8x1xf32>
    %253 = vector.broadcast %252 : vector<2x8x1xf32> to vector<2x8x8xf32>
    %254 = arith.subf %250, %253 : vector<2x8x8xf32>
    %255 = math.exp %254 : vector<2x8x8xf32>
    %cst_108 = arith.constant dense<0.000000e+00> : vector<2x8xf32>
    %256 = vector.multi_reduction <add>, %255, %cst_108 [2] : vector<2x8x8xf32> to vector<2x8xf32>
    %257 = vector.shape_cast %256 : vector<2x8xf32> to vector<2x8x1xf32>
    %258 = vector.broadcast %257 : vector<2x8x1xf32> to vector<2x8x8xf32>
    %259 = arith.divf %255, %258 : vector<2x8x8xf32>
    "tpu.trace_start"() <{level = 10 : i32, message = "bqk,bkd->bqd"}> : () -> ()
    %cst_109 = arith.constant dense<0.000000e+00> : vector<2x8x8xf32>
    %260 = tpu.matmul %259, %247, %cst_109 {dimension_numbers = #tpu.dot_dimension_numbers<[2], [1], [1], [2], [0, 0, 0, 1, 1, 2], [0], [0]>} : vector<2x8x8xf32>, vector<2x8x8xf32>, vector<2x8x8xf32> -> vector<2x8x8xf32>
    "tpu.trace_stop"() : () -> ()
    %261 = vector.extract_strided_slice %210 {offsets = [0, 0, 24], sizes = [2, 8, 8], strides = [1, 1, 1]} : vector<2x8x32xf32> to vector<2x8x8xf32>
    %262 = vector.extract_strided_slice %211 {offsets = [0, 0, 24], sizes = [2, 8, 8], strides = [1, 1, 1]} : vector<2x8x32xf32> to vector<2x8x8xf32>
    %263 = vector.extract_strided_slice %212 {offsets = [0, 0, 24], sizes = [2, 8, 8], strides = [1, 1, 1]} : vector<2x8x32xf32> to vector<2x8x8xf32>
    "tpu.trace_start"() <{level = 10 : i32, message = "bqd,bkd->bqk"}> : () -> ()
    %cst_110 = arith.constant dense<0.000000e+00> : vector<2x8x8xf32>
    %264 = tpu.matmul %261, %262, %cst_110 {dimension_numbers = #tpu.dot_dimension_numbers<[2], [2], [1], [1], [0, 0, 0, 1, 1, 1], [0], [0]>} : vector<2x8x8xf32>, vector<2x8x8xf32>, vector<2x8x8xf32> -> vector<2x8x8xf32>
    "tpu.trace_stop"() : () -> ()
    %265 = vector.broadcast %19 : vector<1x8x8xf32> to vector<2x8x8xf32>
    %266 = arith.addf %264, %265 : vector<2x8x8xf32>
    %cst_111 = arith.constant dense<0xFF800000> : vector<2x8xf32>
    %267 = vector.multi_reduction <maximumf>, %266, %cst_111 [2] : vector<2x8x8xf32> to vector<2x8xf32>
    %268 = vector.shape_cast %267 : vector<2x8xf32> to vector<2x8x1xf32>
    %269 = vector.broadcast %268 : vector<2x8x1xf32> to vector<2x8x8xf32>
    %270 = arith.subf %266, %269 : vector<2x8x8xf32>
    %271 = math.exp %270 : vector<2x8x8xf32>
    %cst_112 = arith.constant dense<0.000000e+00> : vector<2x8xf32>
    %272 = vector.multi_reduction <add>, %271, %cst_112 [2] : vector<2x8x8xf32> to vector<2x8xf32>
    %273 = vector.shape_cast %272 : vector<2x8xf32> to vector<2x8x1xf32>
    %274 = vector.broadcast %273 : vector<2x8x1xf32> to vector<2x8x8xf32>
    %275 = arith.divf %271, %274 : vector<2x8x8xf32>
    "tpu.trace_start"() <{level = 10 : i32, message = "bqk,bkd->bqd"}> : () -> ()
    %cst_113 = arith.constant dense<0.000000e+00> : vector<2x8x8xf32>
    %276 = tpu.matmul %275, %263, %cst_113 {dimension_numbers = #tpu.dot_dimension_numbers<[2], [1], [1], [2], [0, 0, 0, 1, 1, 2], [0], [0]>} : vector<2x8x8xf32>, vector<2x8x8xf32>, vector<2x8x8xf32> -> vector<2x8x8xf32>
    "tpu.trace_stop"() : () -> ()
    %277 = tpu.concatenate %228, %244, %260, %276 in 2 : vector<2x8x8xf32>, vector<2x8x8xf32>, vector<2x8x8xf32>, vector<2x8x8xf32> -> vector<2x8x32xf32>
    %278 = vector.shape_cast %277 : vector<2x8x32xf32> to vector<16x32xf32>
    %cst_114 = arith.constant dense<0.000000e+00> : vector<16x32xf32>
    %279 = tpu.matmul %278, %169, %cst_114 {dimension_numbers = #tpu.dot_dimension_numbers<[1], [0], [0], [1], [0, 0, 1, 1], [], []>} : vector<16x32xf32>, vector<32x32xf32>, vector<16x32xf32> -> vector<16x32xf32>
    %280 = arith.addf %207, %279 : vector<16x32xf32>
    %281 = vector.broadcast %183 : vector<1x32xf32> to vector<16x32xf32>
    %282 = arith.addf %280, %281 : vector<16x32xf32>
    %cst_115 = arith.constant dense<0.000000e+00> : vector<16xf32>
    %283 = vector.multi_reduction <add>, %282, %cst_115 [1] : vector<16x32xf32> to vector<16xf32>
    %284 = vector.shape_cast %283 : vector<16xf32> to vector<16x1xf32>
    %cst_116 = arith.constant 3.200000e+01 : f32
    %285 = vector.broadcast %cst_116 : f32 to vector<16x1xf32>
    %286 = arith.divf %284, %285 : vector<16x1xf32>
    %287 = vector.broadcast %286 : vector<16x1xf32> to vector<16x32xf32>
    %288 = arith.subf %282, %287 : vector<16x32xf32>
    %289 = arith.mulf %288, %288 : vector<16x32xf32>
    %cst_117 = arith.constant dense<0.000000e+00> : vector<16xf32>
    %290 = vector.multi_reduction <add>, %289, %cst_117 [1] : vector<16x32xf32> to vector<16xf32>
    %291 = vector.shape_cast %290 : vector<16xf32> to vector<16x1xf32>
    %cst_118 = arith.constant 3.200000e+01 : f32
    %292 = vector.broadcast %cst_118 : f32 to vector<16x1xf32>
    %293 = arith.divf %291, %292 : vector<16x1xf32>
    %cst_119 = arith.constant 9.99999974E-6 : f32
    %294 = vector.broadcast %cst_119 : f32 to vector<16x1xf32>
    %295 = arith.addf %293, %294 : vector<16x1xf32>
    %296 = math.rsqrt %295 : vector<16x1xf32>
    %297 = vector.broadcast %296 : vector<16x1xf32> to vector<16x32xf32>
    %298 = arith.mulf %288, %297 : vector<16x32xf32>
    %299 = vector.broadcast %179 : vector<1x32xf32> to vector<16x32xf32>
    %300 = arith.mulf %298, %299 : vector<16x32xf32>
    %301 = vector.broadcast %181 : vector<1x32xf32> to vector<16x32xf32>
    %302 = arith.addf %300, %301 : vector<16x32xf32>
    %cst_120 = arith.constant dense<0.000000e+00> : vector<16x128xf32>
    %303 = tpu.matmul %302, %171, %cst_120 {dimension_numbers = #tpu.dot_dimension_numbers<[1], [0], [0], [1], [0, 0, 1, 1], [], []>} : vector<16x32xf32>, vector<32x128xf32>, vector<16x128xf32> -> vector<16x128xf32>
    %304 = vector.broadcast %187 : vector<1x128xf32> to vector<16x128xf32>
    %305 = arith.addf %303, %304 : vector<16x128xf32>
    %cst_121 = arith.constant 0.000000e+00 : f32
    %306 = vector.broadcast %cst_121 : f32 to vector<16x128xf32>
    %307 = arith.maximumf %305, %306 : vector<16x128xf32>
    %cst_122 = arith.constant dense<0.000000e+00> : vector<16x32xf32>
    %308 = tpu.matmul %307, %173, %cst_122 {dimension_numbers = #tpu.dot_dimension_numbers<[1], [0], [0], [1], [0, 0, 1, 1], [], []>} : vector<16x128xf32>, vector<128x32xf32>, vector<16x32xf32> -> vector<16x32xf32>
    %309 = vector.broadcast %185 : vector<1x32xf32> to vector<16x32xf32>
    %310 = arith.addf %308, %309 : vector<16x32xf32>
    %311 = arith.addf %302, %310 : vector<16x32xf32>
    %c2 = arith.constant 2 : index
    %c0_123 = arith.constant 0 : index
    %c0_124 = arith.constant 0 : index
    %312 = vector.load %arg1[%c2, %c0_123, %c0_124] : memref<3x232x128xf32, #tpu.memory_space<vmem>>, vector<1x32x96xf32>
    %313 = vector.shape_cast %312 : vector<1x32x96xf32> to vector<32x96xf32>
    %c2_125 = arith.constant 2 : index
    %c32_126 = arith.constant 32 : index
    %c0_127 = arith.constant 0 : index
    %314 = vector.load %arg1[%c2_125, %c32_126, %c0_127] : memref<3x232x128xf32, #tpu.memory_space<vmem>>, vector<1x32x32xf32>
    %315 = vector.shape_cast %314 : vector<1x32x32xf32> to vector<32x32xf32>
    %c2_128 = arith.constant 2 : index
    %c64_129 = arith.constant 64 : index
    %c0_130 = arith.constant 0 : index
    %316 = vector.load %arg1[%c2_128, %c64_129, %c0_130] : memref<3x232x128xf32, #tpu.memory_space<vmem>>, vector<1x32x128xf32>
    %317 = vector.shape_cast %316 : vector<1x32x128xf32> to vector<32x128xf32>
    %c2_131 = arith.constant 2 : index
    %c96_132 = arith.constant 96 : index
    %c0_133 = arith.constant 0 : index
    %318 = vector.load %arg1[%c2_131, %c96_132, %c0_133] : memref<3x232x128xf32, #tpu.memory_space<vmem>>, vector<1x128x32xf32>
    %319 = vector.shape_cast %318 : vector<1x128x32xf32> to vector<128x32xf32>
    %c2_134 = arith.constant 2 : index
    %c224_135 = arith.constant 224 : index
    %c0_136 = arith.constant 0 : index
    %320 = vector.load %arg1[%c2_134, %c224_135, %c0_136] : memref<3x232x128xf32, #tpu.memory_space<vmem>>, vector<1x1x32xf32>
    %321 = vector.shape_cast %320 : vector<1x1x32xf32> to vector<1x32xf32>
    %c2_137 = arith.constant 2 : index
    %c225_138 = arith.constant 225 : index
    %c0_139 = arith.constant 0 : index
    %322 = vector.load %arg1[%c2_137, %c225_138, %c0_139] : memref<3x232x128xf32, #tpu.memory_space<vmem>>, vector<1x1x32xf32>
    %323 = vector.shape_cast %322 : vector<1x1x32xf32> to vector<1x32xf32>
    %c2_140 = arith.constant 2 : index
    %c226_141 = arith.constant 226 : index
    %c0_142 = arith.constant 0 : index
    %324 = vector.load %arg1[%c2_140, %c226_141, %c0_142] : memref<3x232x128xf32, #tpu.memory_space<vmem>>, vector<1x1x32xf32>
    %325 = vector.shape_cast %324 : vector<1x1x32xf32> to vector<1x32xf32>
    %c2_143 = arith.constant 2 : index
    %c227_144 = arith.constant 227 : index
    %c0_145 = arith.constant 0 : index
    %326 = vector.load %arg1[%c2_143, %c227_144, %c0_145] : memref<3x232x128xf32, #tpu.memory_space<vmem>>, vector<1x1x32xf32>
    %327 = vector.shape_cast %326 : vector<1x1x32xf32> to vector<1x32xf32>
    %c2_146 = arith.constant 2 : index
    %c228_147 = arith.constant 228 : index
    %c0_148 = arith.constant 0 : index
    %328 = vector.load %arg1[%c2_146, %c228_147, %c0_148] : memref<3x232x128xf32, #tpu.memory_space<vmem>>, vector<1x1x32xf32>
    %329 = vector.shape_cast %328 : vector<1x1x32xf32> to vector<1x32xf32>
    %c2_149 = arith.constant 2 : index
    %c229_150 = arith.constant 229 : index
    %c0_151 = arith.constant 0 : index
    %330 = vector.load %arg1[%c2_149, %c229_150, %c0_151] : memref<3x232x128xf32, #tpu.memory_space<vmem>>, vector<1x1x32xf32>
    %331 = vector.shape_cast %330 : vector<1x1x32xf32> to vector<1x32xf32>
    %c2_152 = arith.constant 2 : index
    %c230_153 = arith.constant 230 : index
    %c0_154 = arith.constant 0 : index
    %332 = vector.load %arg1[%c2_152, %c230_153, %c0_154] : memref<3x232x128xf32, #tpu.memory_space<vmem>>, vector<1x1x128xf32>
    %333 = vector.shape_cast %332 : vector<1x1x128xf32> to vector<1x128xf32>
    %cst_155 = arith.constant dense<0.000000e+00> : vector<16xf32>
    %334 = vector.multi_reduction <add>, %311, %cst_155 [1] : vector<16x32xf32> to vector<16xf32>
    %335 = vector.shape_cast %334 : vector<16xf32> to vector<16x1xf32>
    %cst_156 = arith.constant 3.200000e+01 : f32
    %336 = vector.broadcast %cst_156 : f32 to vector<16x1xf32>
    %337 = arith.divf %335, %336 : vector<16x1xf32>
    %338 = vector.broadcast %337 : vector<16x1xf32> to vector<16x32xf32>
    %339 = arith.subf %311, %338 : vector<16x32xf32>
    %340 = arith.mulf %339, %339 : vector<16x32xf32>
    %cst_157 = arith.constant dense<0.000000e+00> : vector<16xf32>
    %341 = vector.multi_reduction <add>, %340, %cst_157 [1] : vector<16x32xf32> to vector<16xf32>
    %342 = vector.shape_cast %341 : vector<16xf32> to vector<16x1xf32>
    %cst_158 = arith.constant 3.200000e+01 : f32
    %343 = vector.broadcast %cst_158 : f32 to vector<16x1xf32>
    %344 = arith.divf %342, %343 : vector<16x1xf32>
    %cst_159 = arith.constant 9.99999974E-6 : f32
    %345 = vector.broadcast %cst_159 : f32 to vector<16x1xf32>
    %346 = arith.addf %344, %345 : vector<16x1xf32>
    %347 = math.rsqrt %346 : vector<16x1xf32>
    %348 = vector.broadcast %347 : vector<16x1xf32> to vector<16x32xf32>
    %349 = arith.mulf %339, %348 : vector<16x32xf32>
    %350 = vector.broadcast %321 : vector<1x32xf32> to vector<16x32xf32>
    %351 = arith.mulf %349, %350 : vector<16x32xf32>
    %352 = vector.broadcast %323 : vector<1x32xf32> to vector<16x32xf32>
    %353 = arith.addf %351, %352 : vector<16x32xf32>
    %cst_160 = arith.constant dense<0.000000e+00> : vector<16x96xf32>
    %354 = tpu.matmul %353, %313, %cst_160 {dimension_numbers = #tpu.dot_dimension_numbers<[1], [0], [0], [1], [0, 0, 1, 1], [], []>} : vector<16x32xf32>, vector<32x96xf32>, vector<16x96xf32> -> vector<16x96xf32>
    %355 = vector.shape_cast %354 : vector<16x96xf32> to vector<2x8x96xf32>
    %356 = vector.extract_strided_slice %355 {offsets = [0, 0, 0], sizes = [2, 8, 32], strides = [1, 1, 1]} : vector<2x8x96xf32> to vector<2x8x32xf32>
    %357 = vector.extract_strided_slice %355 {offsets = [0, 0, 32], sizes = [2, 8, 32], strides = [1, 1, 1]} : vector<2x8x96xf32> to vector<2x8x32xf32>
    %358 = vector.extract_strided_slice %355 {offsets = [0, 0, 64], sizes = [2, 8, 32], strides = [1, 1, 1]} : vector<2x8x96xf32> to vector<2x8x32xf32>
    %359 = vector.extract_strided_slice %356 {offsets = [0, 0, 0], sizes = [2, 8, 8], strides = [1, 1, 1]} : vector<2x8x32xf32> to vector<2x8x8xf32>
    %360 = vector.extract_strided_slice %357 {offsets = [0, 0, 0], sizes = [2, 8, 8], strides = [1, 1, 1]} : vector<2x8x32xf32> to vector<2x8x8xf32>
    %361 = vector.extract_strided_slice %358 {offsets = [0, 0, 0], sizes = [2, 8, 8], strides = [1, 1, 1]} : vector<2x8x32xf32> to vector<2x8x8xf32>
    "tpu.trace_start"() <{level = 10 : i32, message = "bqd,bkd->bqk"}> : () -> ()
    %cst_161 = arith.constant dense<0.000000e+00> : vector<2x8x8xf32>
    %362 = tpu.matmul %359, %360, %cst_161 {dimension_numbers = #tpu.dot_dimension_numbers<[2], [2], [1], [1], [0, 0, 0, 1, 1, 1], [0], [0]>} : vector<2x8x8xf32>, vector<2x8x8xf32>, vector<2x8x8xf32> -> vector<2x8x8xf32>
    "tpu.trace_stop"() : () -> ()
    %363 = vector.broadcast %19 : vector<1x8x8xf32> to vector<2x8x8xf32>
    %364 = arith.addf %362, %363 : vector<2x8x8xf32>
    %cst_162 = arith.constant dense<0xFF800000> : vector<2x8xf32>
    %365 = vector.multi_reduction <maximumf>, %364, %cst_162 [2] : vector<2x8x8xf32> to vector<2x8xf32>
    %366 = vector.shape_cast %365 : vector<2x8xf32> to vector<2x8x1xf32>
    %367 = vector.broadcast %366 : vector<2x8x1xf32> to vector<2x8x8xf32>
    %368 = arith.subf %364, %367 : vector<2x8x8xf32>
    %369 = math.exp %368 : vector<2x8x8xf32>
    %cst_163 = arith.constant dense<0.000000e+00> : vector<2x8xf32>
    %370 = vector.multi_reduction <add>, %369, %cst_163 [2] : vector<2x8x8xf32> to vector<2x8xf32>
    %371 = vector.shape_cast %370 : vector<2x8xf32> to vector<2x8x1xf32>
    %372 = vector.broadcast %371 : vector<2x8x1xf32> to vector<2x8x8xf32>
    %373 = arith.divf %369, %372 : vector<2x8x8xf32>
    "tpu.trace_start"() <{level = 10 : i32, message = "bqk,bkd->bqd"}> : () -> ()
    %cst_164 = arith.constant dense<0.000000e+00> : vector<2x8x8xf32>
    %374 = tpu.matmul %373, %361, %cst_164 {dimension_numbers = #tpu.dot_dimension_numbers<[2], [1], [1], [2], [0, 0, 0, 1, 1, 2], [0], [0]>} : vector<2x8x8xf32>, vector<2x8x8xf32>, vector<2x8x8xf32> -> vector<2x8x8xf32>
    "tpu.trace_stop"() : () -> ()
    %375 = vector.extract_strided_slice %356 {offsets = [0, 0, 8], sizes = [2, 8, 8], strides = [1, 1, 1]} : vector<2x8x32xf32> to vector<2x8x8xf32>
    %376 = vector.extract_strided_slice %357 {offsets = [0, 0, 8], sizes = [2, 8, 8], strides = [1, 1, 1]} : vector<2x8x32xf32> to vector<2x8x8xf32>
    %377 = vector.extract_strided_slice %358 {offsets = [0, 0, 8], sizes = [2, 8, 8], strides = [1, 1, 1]} : vector<2x8x32xf32> to vector<2x8x8xf32>
    "tpu.trace_start"() <{level = 10 : i32, message = "bqd,bkd->bqk"}> : () -> ()
    %cst_165 = arith.constant dense<0.000000e+00> : vector<2x8x8xf32>
    %378 = tpu.matmul %375, %376, %cst_165 {dimension_numbers = #tpu.dot_dimension_numbers<[2], [2], [1], [1], [0, 0, 0, 1, 1, 1], [0], [0]>} : vector<2x8x8xf32>, vector<2x8x8xf32>, vector<2x8x8xf32> -> vector<2x8x8xf32>
    "tpu.trace_stop"() : () -> ()
    %379 = vector.broadcast %19 : vector<1x8x8xf32> to vector<2x8x8xf32>
    %380 = arith.addf %378, %379 : vector<2x8x8xf32>
    %cst_166 = arith.constant dense<0xFF800000> : vector<2x8xf32>
    %381 = vector.multi_reduction <maximumf>, %380, %cst_166 [2] : vector<2x8x8xf32> to vector<2x8xf32>
    %382 = vector.shape_cast %381 : vector<2x8xf32> to vector<2x8x1xf32>
    %383 = vector.broadcast %382 : vector<2x8x1xf32> to vector<2x8x8xf32>
    %384 = arith.subf %380, %383 : vector<2x8x8xf32>
    %385 = math.exp %384 : vector<2x8x8xf32>
    %cst_167 = arith.constant dense<0.000000e+00> : vector<2x8xf32>
    %386 = vector.multi_reduction <add>, %385, %cst_167 [2] : vector<2x8x8xf32> to vector<2x8xf32>
    %387 = vector.shape_cast %386 : vector<2x8xf32> to vector<2x8x1xf32>
    %388 = vector.broadcast %387 : vector<2x8x1xf32> to vector<2x8x8xf32>
    %389 = arith.divf %385, %388 : vector<2x8x8xf32>
    "tpu.trace_start"() <{level = 10 : i32, message = "bqk,bkd->bqd"}> : () -> ()
    %cst_168 = arith.constant dense<0.000000e+00> : vector<2x8x8xf32>
    %390 = tpu.matmul %389, %377, %cst_168 {dimension_numbers = #tpu.dot_dimension_numbers<[2], [1], [1], [2], [0, 0, 0, 1, 1, 2], [0], [0]>} : vector<2x8x8xf32>, vector<2x8x8xf32>, vector<2x8x8xf32> -> vector<2x8x8xf32>
    "tpu.trace_stop"() : () -> ()
    %391 = vector.extract_strided_slice %356 {offsets = [0, 0, 16], sizes = [2, 8, 8], strides = [1, 1, 1]} : vector<2x8x32xf32> to vector<2x8x8xf32>
    %392 = vector.extract_strided_slice %357 {offsets = [0, 0, 16], sizes = [2, 8, 8], strides = [1, 1, 1]} : vector<2x8x32xf32> to vector<2x8x8xf32>
    %393 = vector.extract_strided_slice %358 {offsets = [0, 0, 16], sizes = [2, 8, 8], strides = [1, 1, 1]} : vector<2x8x32xf32> to vector<2x8x8xf32>
    "tpu.trace_start"() <{level = 10 : i32, message = "bqd,bkd->bqk"}> : () -> ()
    %cst_169 = arith.constant dense<0.000000e+00> : vector<2x8x8xf32>
    %394 = tpu.matmul %391, %392, %cst_169 {dimension_numbers = #tpu.dot_dimension_numbers<[2], [2], [1], [1], [0, 0, 0, 1, 1, 1], [0], [0]>} : vector<2x8x8xf32>, vector<2x8x8xf32>, vector<2x8x8xf32> -> vector<2x8x8xf32>
    "tpu.trace_stop"() : () -> ()
    %395 = vector.broadcast %19 : vector<1x8x8xf32> to vector<2x8x8xf32>
    %396 = arith.addf %394, %395 : vector<2x8x8xf32>
    %cst_170 = arith.constant dense<0xFF800000> : vector<2x8xf32>
    %397 = vector.multi_reduction <maximumf>, %396, %cst_170 [2] : vector<2x8x8xf32> to vector<2x8xf32>
    %398 = vector.shape_cast %397 : vector<2x8xf32> to vector<2x8x1xf32>
    %399 = vector.broadcast %398 : vector<2x8x1xf32> to vector<2x8x8xf32>
    %400 = arith.subf %396, %399 : vector<2x8x8xf32>
    %401 = math.exp %400 : vector<2x8x8xf32>
    %cst_171 = arith.constant dense<0.000000e+00> : vector<2x8xf32>
    %402 = vector.multi_reduction <add>, %401, %cst_171 [2] : vector<2x8x8xf32> to vector<2x8xf32>
    %403 = vector.shape_cast %402 : vector<2x8xf32> to vector<2x8x1xf32>
    %404 = vector.broadcast %403 : vector<2x8x1xf32> to vector<2x8x8xf32>
    %405 = arith.divf %401, %404 : vector<2x8x8xf32>
    "tpu.trace_start"() <{level = 10 : i32, message = "bqk,bkd->bqd"}> : () -> ()
    %cst_172 = arith.constant dense<0.000000e+00> : vector<2x8x8xf32>
    %406 = tpu.matmul %405, %393, %cst_172 {dimension_numbers = #tpu.dot_dimension_numbers<[2], [1], [1], [2], [0, 0, 0, 1, 1, 2], [0], [0]>} : vector<2x8x8xf32>, vector<2x8x8xf32>, vector<2x8x8xf32> -> vector<2x8x8xf32>
    "tpu.trace_stop"() : () -> ()
    %407 = vector.extract_strided_slice %356 {offsets = [0, 0, 24], sizes = [2, 8, 8], strides = [1, 1, 1]} : vector<2x8x32xf32> to vector<2x8x8xf32>
    %408 = vector.extract_strided_slice %357 {offsets = [0, 0, 24], sizes = [2, 8, 8], strides = [1, 1, 1]} : vector<2x8x32xf32> to vector<2x8x8xf32>
    %409 = vector.extract_strided_slice %358 {offsets = [0, 0, 24], sizes = [2, 8, 8], strides = [1, 1, 1]} : vector<2x8x32xf32> to vector<2x8x8xf32>
    "tpu.trace_start"() <{level = 10 : i32, message = "bqd,bkd->bqk"}> : () -> ()
    %cst_173 = arith.constant dense<0.000000e+00> : vector<2x8x8xf32>
    %410 = tpu.matmul %407, %408, %cst_173 {dimension_numbers = #tpu.dot_dimension_numbers<[2], [2], [1], [1], [0, 0, 0, 1, 1, 1], [0], [0]>} : vector<2x8x8xf32>, vector<2x8x8xf32>, vector<2x8x8xf32> -> vector<2x8x8xf32>
    "tpu.trace_stop"() : () -> ()
    %411 = vector.broadcast %19 : vector<1x8x8xf32> to vector<2x8x8xf32>
    %412 = arith.addf %410, %411 : vector<2x8x8xf32>
    %cst_174 = arith.constant dense<0xFF800000> : vector<2x8xf32>
    %413 = vector.multi_reduction <maximumf>, %412, %cst_174 [2] : vector<2x8x8xf32> to vector<2x8xf32>
    %414 = vector.shape_cast %413 : vector<2x8xf32> to vector<2x8x1xf32>
    %415 = vector.broadcast %414 : vector<2x8x1xf32> to vector<2x8x8xf32>
    %416 = arith.subf %412, %415 : vector<2x8x8xf32>
    %417 = math.exp %416 : vector<2x8x8xf32>
    %cst_175 = arith.constant dense<0.000000e+00> : vector<2x8xf32>
    %418 = vector.multi_reduction <add>, %417, %cst_175 [2] : vector<2x8x8xf32> to vector<2x8xf32>
    %419 = vector.shape_cast %418 : vector<2x8xf32> to vector<2x8x1xf32>
    %420 = vector.broadcast %419 : vector<2x8x1xf32> to vector<2x8x8xf32>
    %421 = arith.divf %417, %420 : vector<2x8x8xf32>
    "tpu.trace_start"() <{level = 10 : i32, message = "bqk,bkd->bqd"}> : () -> ()
    %cst_176 = arith.constant dense<0.000000e+00> : vector<2x8x8xf32>
    %422 = tpu.matmul %421, %409, %cst_176 {dimension_numbers = #tpu.dot_dimension_numbers<[2], [1], [1], [2], [0, 0, 0, 1, 1, 2], [0], [0]>} : vector<2x8x8xf32>, vector<2x8x8xf32>, vector<2x8x8xf32> -> vector<2x8x8xf32>
    "tpu.trace_stop"() : () -> ()
    %423 = tpu.concatenate %374, %390, %406, %422 in 2 : vector<2x8x8xf32>, vector<2x8x8xf32>, vector<2x8x8xf32>, vector<2x8x8xf32> -> vector<2x8x32xf32>
    %424 = vector.shape_cast %423 : vector<2x8x32xf32> to vector<16x32xf32>
    %cst_177 = arith.constant dense<0.000000e+00> : vector<16x32xf32>
    %425 = tpu.matmul %424, %315, %cst_177 {dimension_numbers = #tpu.dot_dimension_numbers<[1], [0], [0], [1], [0, 0, 1, 1], [], []>} : vector<16x32xf32>, vector<32x32xf32>, vector<16x32xf32> -> vector<16x32xf32>
    %426 = arith.addf %353, %425 : vector<16x32xf32>
    %427 = vector.broadcast %329 : vector<1x32xf32> to vector<16x32xf32>
    %428 = arith.addf %426, %427 : vector<16x32xf32>
    %cst_178 = arith.constant dense<0.000000e+00> : vector<16xf32>
    %429 = vector.multi_reduction <add>, %428, %cst_178 [1] : vector<16x32xf32> to vector<16xf32>
    %430 = vector.shape_cast %429 : vector<16xf32> to vector<16x1xf32>
    %cst_179 = arith.constant 3.200000e+01 : f32
    %431 = vector.broadcast %cst_179 : f32 to vector<16x1xf32>
    %432 = arith.divf %430, %431 : vector<16x1xf32>
    %433 = vector.broadcast %432 : vector<16x1xf32> to vector<16x32xf32>
    %434 = arith.subf %428, %433 : vector<16x32xf32>
    %435 = arith.mulf %434, %434 : vector<16x32xf32>
    %cst_180 = arith.constant dense<0.000000e+00> : vector<16xf32>
    %436 = vector.multi_reduction <add>, %435, %cst_180 [1] : vector<16x32xf32> to vector<16xf32>
    %437 = vector.shape_cast %436 : vector<16xf32> to vector<16x1xf32>
    %cst_181 = arith.constant 3.200000e+01 : f32
    %438 = vector.broadcast %cst_181 : f32 to vector<16x1xf32>
    %439 = arith.divf %437, %438 : vector<16x1xf32>
    %cst_182 = arith.constant 9.99999974E-6 : f32
    %440 = vector.broadcast %cst_182 : f32 to vector<16x1xf32>
    %441 = arith.addf %439, %440 : vector<16x1xf32>
    %442 = math.rsqrt %441 : vector<16x1xf32>
    %443 = vector.broadcast %442 : vector<16x1xf32> to vector<16x32xf32>
    %444 = arith.mulf %434, %443 : vector<16x32xf32>
    %445 = vector.broadcast %325 : vector<1x32xf32> to vector<16x32xf32>
    %446 = arith.mulf %444, %445 : vector<16x32xf32>
    %447 = vector.broadcast %327 : vector<1x32xf32> to vector<16x32xf32>
    %448 = arith.addf %446, %447 : vector<16x32xf32>
    %cst_183 = arith.constant dense<0.000000e+00> : vector<16x128xf32>
    %449 = tpu.matmul %448, %317, %cst_183 {dimension_numbers = #tpu.dot_dimension_numbers<[1], [0], [0], [1], [0, 0, 1, 1], [], []>} : vector<16x32xf32>, vector<32x128xf32>, vector<16x128xf32> -> vector<16x128xf32>
    %450 = vector.broadcast %333 : vector<1x128xf32> to vector<16x128xf32>
    %451 = arith.addf %449, %450 : vector<16x128xf32>
    %cst_184 = arith.constant 0.000000e+00 : f32
    %452 = vector.broadcast %cst_184 : f32 to vector<16x128xf32>
    %453 = arith.maximumf %451, %452 : vector<16x128xf32>
    %cst_185 = arith.constant dense<0.000000e+00> : vector<16x32xf32>
    %454 = tpu.matmul %453, %319, %cst_185 {dimension_numbers = #tpu.dot_dimension_numbers<[1], [0], [0], [1], [0, 0, 1, 1], [], []>} : vector<16x128xf32>, vector<128x32xf32>, vector<16x32xf32> -> vector<16x32xf32>
    %455 = vector.broadcast %331 : vector<1x32xf32> to vector<16x32xf32>
    %456 = arith.addf %454, %455 : vector<16x32xf32>
    %457 = arith.addf %448, %456 : vector<16x32xf32>
    %c168 = arith.constant 168 : index
    %c0_186 = arith.constant 0 : index
    %458 = vector.load %arg2[%c168, %c0_186] : memref<176x128xf32, #tpu.memory_space<vmem>>, vector<1x32xf32>
    %c169 = arith.constant 169 : index
    %c0_187 = arith.constant 0 : index
    %459 = vector.load %arg2[%c169, %c0_187] : memref<176x128xf32, #tpu.memory_space<vmem>>, vector<1x32xf32>
    %cst_188 = arith.constant dense<0.000000e+00> : vector<16xf32>
    %460 = vector.multi_reduction <add>, %457, %cst_188 [1] : vector<16x32xf32> to vector<16xf32>
    %461 = vector.shape_cast %460 : vector<16xf32> to vector<16x1xf32>
    %cst_189 = arith.constant 3.200000e+01 : f32
    %462 = vector.broadcast %cst_189 : f32 to vector<16x1xf32>
    %463 = arith.divf %461, %462 : vector<16x1xf32>
    %464 = vector.broadcast %463 : vector<16x1xf32> to vector<16x32xf32>
    %465 = arith.subf %457, %464 : vector<16x32xf32>
    %466 = arith.mulf %465, %465 : vector<16x32xf32>
    %cst_190 = arith.constant dense<0.000000e+00> : vector<16xf32>
    %467 = vector.multi_reduction <add>, %466, %cst_190 [1] : vector<16x32xf32> to vector<16xf32>
    %468 = vector.shape_cast %467 : vector<16xf32> to vector<16x1xf32>
    %cst_191 = arith.constant 3.200000e+01 : f32
    %469 = vector.broadcast %cst_191 : f32 to vector<16x1xf32>
    %470 = arith.divf %468, %469 : vector<16x1xf32>
    %cst_192 = arith.constant 9.99999974E-6 : f32
    %471 = vector.broadcast %cst_192 : f32 to vector<16x1xf32>
    %472 = arith.addf %470, %471 : vector<16x1xf32>
    %473 = math.rsqrt %472 : vector<16x1xf32>
    %474 = vector.broadcast %473 : vector<16x1xf32> to vector<16x32xf32>
    %475 = arith.mulf %465, %474 : vector<16x32xf32>
    %476 = vector.broadcast %458 : vector<1x32xf32> to vector<16x32xf32>
    %477 = arith.mulf %475, %476 : vector<16x32xf32>
    %478 = vector.broadcast %459 : vector<1x32xf32> to vector<16x32xf32>
    %479 = arith.addf %477, %478 : vector<16x32xf32>
    %c136 = arith.constant 136 : index
    %c0_193 = arith.constant 0 : index
    %480 = vector.load %arg2[%c136, %c0_193] : memref<176x128xf32, #tpu.memory_space<vmem>>, vector<32x128xf32>
    %cst_194 = arith.constant dense<0.000000e+00> : vector<16x128xf32>
    %481 = tpu.matmul %479, %480, %cst_194 {dimension_numbers = #tpu.dot_dimension_numbers<[1], [0], [0], [1], [0, 0, 1, 1], [], []>} : vector<16x32xf32>, vector<32x128xf32>, vector<16x128xf32> -> vector<16x128xf32>
    %c170 = arith.constant 170 : index
    %c0_195 = arith.constant 0 : index
    %482 = vector.load %arg2[%c170, %c0_195] : memref<176x128xf32, #tpu.memory_space<vmem>>, vector<1x128xf32>
    %483 = vector.broadcast %482 : vector<1x128xf32> to vector<16x128xf32>
    %484 = arith.addf %481, %483 : vector<16x128xf32>
    %c0_196 = arith.constant 0 : index
    %c0_197 = arith.constant 0 : index
    %485 = vector.load %arg3[%c0_196, %c0_197] : memref<16x128xf32, #tpu.memory_space<vmem>>, vector<16x128xf32>
    tpu.vector_store %arg3[%c0_196, %c0_197], %484 {strides = array<i32>} : memref<16x128xf32, #tpu.memory_space<vmem>>, vector<16x128xf32>,
    return
  }
}

</mosaic_0001>

<bundles_post_ra>
// kernel: gpt_forward.1
= control target key start
LH: loop header
LB: loop body
LE: loop exit
PB: predicated region body
PF: predicated region fallthrough
CT: control target
= control target key end

     0   :  { %v6751_v2 = vmov 0   ;;  %s7810_s0 = inlined_call_operand.vmem [shape: s32[16,1], index: 0, kind: input, shape index: {}]   ;;  %s7811_s1 = inlined_call_operand.vmem [shape: f32[3,232,128], index: 1, kind: input, shape index: {}]   ;;  %s7812_s2 = inlined_call_operand.vmem [shape: f32[176,128], index: 2, kind: input, shape index: {}]   ;;  %s7813_s3 = inlined_call_operand.hbm [shape: f32[16,128], index: 3, kind: output, shape index: {}]  }
   0x1   :  { %v15_v0 = vld [vmem:[%s7810_s0] sm:$0xff]  ;;  %v46_v1 = vld [vmem:[%s7812_s2 + $0x78] sm:$0xff]  ;;  %6604 = vset.pattern.permute.xlu0 %v6751_v2  ;;  %v45_v3 = vld [vmem:[%s7812_s2 + $0x70] sm:$0xff] }
   0x2   :  { %6093 = vmatprep.subr.mxu0 %v46_v1  ;;  %20 = vperm.xlu0 %6604, %v15_v0   ;;  %v44_v4 = vld [vmem:[%s7812_s2 + $0x68] sm:$0xff]  ;;  %v43_v6 = vld [vmem:[%s7812_s2 + $0x60] sm:$0xff]  ;;  %v42_v7 = vld [vmem:[%s7812_s2 + $0x58] sm:$0xff] }
   0x3   :  { %6094 = vmatpush3.msra.mxu0 %v46_v1  ;;  %v16_v5 = vld [vmem:[%s7810_s0 + $0x8] sm:$0xff] }
   0x4   :  { %6095 = vmatprep.subr.mxu0 %v45_v3 }
   0x5   :  { %6096 = vmatpush3.msra.mxu0 %v45_v3 }
   0x6   :  { %6097 = vmatprep.subr.mxu0 %v44_v4  ;;  %23 = vperm.xlu0 %6604, %v16_v5  }
   0x7   :  { %6098 = vmatpush3.msra.mxu0 %v44_v4 }
   0x8   :  { %8 = vsyncpa [#allocation3], 0  ;;  %6099 = vmatprep.subr.mxu0 %v43_v6  ;;  %v41_v8 = vld [vmem:[%s7812_s2 + $0x50] sm:$0xff]  ;;  %v40_v9 = vld [vmem:[%s7812_s2 + $0x48] sm:$0xff]  ;;  %v17_v19 = vlaneseq  ;;  %v6752_v22 = vmov 1.0   ;;  %vm164_vm2 = vcmask 261120  }
   0x9   :  { %6100 = vmatpush3.msra.mxu0 %v43_v6  ;;  %v39_v10 = vld [vmem:[%s7812_s2 + $0x40] sm:$0xff]  ;;  %v38_v11 = vld [vmem:[%s7812_s2 + $0x38] sm:$0xff]  ;;  %v37_v12 = vld [vmem:[%s7812_s2 + $0x30] sm:$0xff]  ;;  %v6753_v61 = vmov 0.0   ;;  %vm6754_vm3 = vmmov 0   ;;  %s6755_s6 = smov 96  }
   0xa   :  { %6101 = vmatprep.subr.mxu0 %v42_v7  ;;  %v36_v13 = vld [vmem:[%s7812_s2 + $0x28] sm:$0xff]  ;;  %v35_v14 = vld [vmem:[%s7812_s2 + $0x20] sm:$0xff]  ;;  %v34_v15 = vld [vmem:[%s7812_s2 + $0x18] sm:$0xff]  ;;  %v6847_v20 = vand.u32 127, %v17_v19  ;;  %vm288_vm4 = vcmask 64512   ;;  %v126_v2 = vshrl.u32 %v17_v19, 7 }
   0xb   :  { %6102 = vmatpush3.msra.mxu0 %v42_v7  ;;  %v33_v16 = vld [vmem:[%s7812_s2 + $0x10] sm:$0xff]  ;;  %v32_v17 = vld [vmem:[%s7812_s2 + $0x8] sm:$0xff]  ;;  %v31_v18 = vld [vmem:[%s7812_s2] sm:$0xff]  ;;  %v6756_v3 = vmov -1e+30   ;;  %s6757_s7 = smov 64  }
   0xc   :  { %6103 = vmatprep.subr.mxu0 %v41_v8  ;;  %v122_v25 = vld [vmem:[%s7812_s2 + $0x80] sm:$0xff]  ;;  %v132_v41 = vld [vmem:[%s7811_s1 + $0x18] sm:$0xff]  ;;  %v131_v42 = vld [vmem:[%s7811_s1 + $0x10] sm:$0xff]  ;;  %vm127_vm5 = vcmp.le.s32.totalorder %v6847_v20, %v126_v2  ;;  %s6758_s8 = smov 88   ;;  %s6759_s9 = smov 120   ;;  %vm1633_vm6 = vcmask 195584  }
   0xd   :  { %6104 = vmatpush3.msra.mxu0 %v41_v8  ;;  %6128 = vmatprep.subr.mxu1 %v132_v41  ;;  %v130_v43 = vld [vmem:[%s7811_s1 + $0x8] sm:$0xff]  ;;  %v129_v44 = vld [vmem:[%s7811_s1] sm:$0xff]  ;;  %v6912_v4 = vsel %vm127_vm5, 0.0, %v6756_v3  ;;  %s6760_s10 = smov 56   ;;  %s6761_s11 = smov 80   ;;  %vm1630_vm7 = vcmask 130048  }
   0xe   :  { %6105 = vmatprep.subr.mxu0 %v40_v9  ;;  %6129 = vmatpush3.msra.mxu1 %v132_v41  ;;  %v5679_v52 = vld [vmem:[%s7811_s1 + $0xe0] ss:$0 sm:$0xff]  ;;  %v5680_v54 = vld [vmem:[%s7811_s1 + $0xe1] ss:$0 sm:$0xff]  ;;  %s6762_s12 = smov 112   ;;  %s6763_s13 = smov 48  }
   0xf   :  { %6106 = vmatpush3.msra.mxu0 %v40_v9  ;;  %6130 = vmatprep.subr.mxu1 %v131_v42  ;;  %s6764_s14 = smov 72   ;;  %s6765_s15 = smov 104  }
  0x10   :  { %6107 = vmatprep.subr.mxu0 %v39_v10  ;;  %6131 = vmatpush3.msra.mxu1 %v131_v42  ;;  %s6766_s16 = smov 40   ;;  %s6767_s17 = smov 8  }
  0x11   :  { %6108 = vmatpush3.msra.mxu0 %v39_v10  ;;  %6132 = vmatprep.subr.mxu1 %v130_v43  ;;  %s6768_s18 = smov 16   ;;  %s6769_s27 = smov 24  }
  0x12   :  { %6109 = vmatprep.subr.mxu0 %v38_v11  ;;  %6133 = vmatpush3.msra.mxu1 %v130_v43  ;;  %s6770_s23 = smov [#allocation2]  }
  0x13   :  { %6110 = vmatpush3.msra.mxu0 %v38_v11  ;;  %6134 = vmatprep.subr.mxu1 %v129_v44  ;;  %s5664_s24 = sshll.u32 %s6770_s23, 4  ;;  %s5665_s24 = int_to_ptr.vmem [resolvable:$true] %s5664_s24 }
  0x14   :  { %6111 = vmatprep.subr.mxu0 %v37_v12  ;;  %6135 = vmatpush3.msra.mxu1 %v129_v44  ;;  %s6729_s25 = scalar_lea.vmem %s5665_s24, 256  ;;  %p6734_p1 = scmp.lt.s32.totalorder %s5665_s24, %s5665_s24 }
  0x15   :  { %6112 = vmatpush3.msra.mxu0 %v37_v12  ;;  %6139 = vmatprep.subr.mxu1 %v6753_v61  ;;  %p6730_p0 = scmp.ne.s32.totalorder %s5665_s24, %s6729_s25  ;;  %p6735_p2 = scmp.lt.s32.totalorder %s6729_s25, %s6729_s25 }
  0x16   :  { %6113 = vmatprep.subr.mxu0 %v36_v13 }
  0x17   :  { %6114 = vmatpush3.msra.mxu0 %v36_v13  ;;  %p6736_p3 = por %p6735_p2, %p6734_p1 }
  0x18   :  { %6115 = vmatprep.subr.mxu0 %v35_v14 }
  0x19   :  { %6116 = vmatpush3.msra.mxu0 %v35_v14  ;;  %p6737_p4 = pnand %p6736_p3, %p6730_p0 }
  0x1a   :  { %6117 = vmatprep.subr.mxu0 %v34_v15 }
  0x1b   :  { %6118 = vmatpush3.msra.mxu0 %v34_v15 }
  0x1c   :  { %6119 = vmatprep.subr.mxu0 %v33_v16 }
  0x1d   :  { %6120 = vmatpush3.msra.mxu0 %v33_v16 }
  0x1e   :  { %6121 = vmatprep.subr.mxu0 %v32_v17 }
  0x1f   :  { %6122 = vmatpush3.msra.mxu0 %v32_v17 }
  0x20   :  { %6123 = vmatprep.subr.mxu0 %v31_v18 }
  0x21   :  { %6124 = vmatpush3.msra.mxu0 %v31_v18 }
  0x22   :  { %6179 = vmatprep.subr.mxu0 %v6753_v61 }
  0x7d   :  { %v21_v21 = vpop.permute.xlu0 %20 }
  0x7e   :  { %vm25_vm0 = vcmp.eq.s32.totalorder %v6847_v20, %v21_v21 }
  0x7f   :  { %6125 = vmatprep.mubr.msk.f32.mxu0 %vm25_vm0, %v6752_v22 }
  0x81   :  { %v24_v23 = vpop.permute.xlu0 %23 }
  0x82   :  { %vm26_vm1 = vcmp.eq.s32.totalorder %v6847_v20, %v24_v23 }
  0x83   :  { %6126 = vmatmul.mubr.msk.f32.vlgmr.msra.gmra.mxu0 %vm26_vm1, %v6752_v22 }
  0x84   :  { %6181 = vmatprep.mubr.msk.f32.mxu0 %vm6754_vm3, %v6753_v61 }
 0x143   :  { %v6127_v24 = vpop.f32.mrf.mxu0 }
 0x144   :  { %v124_v28 = vadd.f32 %v6127_v24, %v122_v25 }
 0x145   :  { %v113_v26 = vpop.f32.mrf.mxu0 }
 0x146   :  { %v123_v27 = vadd.f32 %v122_v25, %v113_v26  ;;  %v168_v30 = vsel %vm164_vm2, %v124_v28, 0.0 }
 0x148   :  { %v165_v29 = vsel %vm164_vm2, %v123_v27, 0.0 }
 0x149   :  { %166 = vadd.xlane.f32.xlu1 %v165_v29 }
 0x14d   :  { %169 = vadd.xlane.f32.xlu1 %v168_v30 }
 0x1d2   :  { %v167_v31 = vpop.xlane.xlu1 %166 }
 0x1d3   :  { %v172_v32 = vmul.f32 0.03125, %v167_v31 }
 0x1d5   :  { %v174_v33 = vsub.f32 %v123_v27, %v172_v32 }
 0x1d6   :  { %v170_v34 = vpop.xlane.xlu1 %169 }
 0x1d7   :  { %v173_v35 = vmul.f32 0.03125, %v170_v34  ;;  %v176_v36 = vmul.f32 %v174_v33, %v174_v33 }
 0x1d9   :  { %v175_v37 = vsub.f32 %v124_v28, %v173_v35  ;;  %v178_v38 = vsel %vm164_vm2, %v176_v36, 0.0 }
 0x1da   :  { %179 = vadd.xlane.f32.xlu0 %v178_v38 }
 0x1db   :  { %v177_v39 = vmul.f32 %v175_v37, %v175_v37 }
 0x1dd   :  { %v181_v40 = vsel %vm164_vm2, %v177_v39, 0.0 }
 0x1de   :  { %182 = vadd.xlane.f32.xlu1 %v181_v40 }
 0x263   :  { %v180_v45 = vpop.xlane.xlu0 %179 }
 0x264   :  { %v184_v46 = vmul.f32 0.03125, %v180_v45 }
 0x266   :  { %v186_v47 = vadd.f32 1e-05, %v184_v46 }
 0x267   :  { %v183_v48 = vpop.xlane.xlu1 %182 }
 0x268   :  { %6605 = vrsqrt.f32 %v186_v47  ;;  %v185_v49 = vmul.f32 0.03125, %v183_v48 }
 0x26a   :  { %v187_v50 = vadd.f32 1e-05, %v185_v49 }
 0x26c   :  { %6607 = vrsqrt.f32 %v187_v50 }
 0x275   :  { %v6606_v51 = vpop.eup %6605 }
 0x276   :  { %v190_v53 = vmul.f32 %v6606_v51, %v174_v33 }
 0x278   :  { %v196_v55 = vmul.f32 %v5679_v52, %v190_v53 }
 0x279   :  { %v6608_v56 = vpop.eup %6607 }
 0x27a   :  { %v191_v57 = vmul.f32 %v6608_v56, %v175_v37  ;;  %v6876_v58 = vadd.f32 %v5680_v54, %v196_v55 }
 0x27c   :  { %v197_v59 = vmul.f32 %v5679_v52, %v191_v57  ;;  %6136 = vmatprep.mubr.msk.f32.mxu1 %vm164_vm2, %v6876_v58 }
 0x27e   :  { %v6880_v60 = vadd.f32 %v5680_v54, %v197_v59 }
 0x280   :  { %6137 = vmatmul.mubr.msk.f32.vlgmr.msra.gmra.mxu1 %vm164_vm2, %v6880_v60 }
 0x281   :  { %6141 = vmatprep.mubr.msk.f32.mxu1 %vm6754_vm3, %v6753_v61 }
 0x340   :  { %v6890_v62 = vpop.f32.mrf.mxu1 }
 0x342   :  { %v6892_v63 = vpop.f32.mrf.mxu1 }
 0x343   :  { %286 = vrot.lane.b32.xlu1 %v6892_v63, %s6755_s6 }
 0x347   :  { %364 = vrot.lane.b32.xlu1 %v6890_v62, %s6755_s6 }
 0x3b5   :  { %v287_v0 = vpop.permute.xlu1 %286 }
 0x3b6   :  { %6140 = vmatpush3.xpose.msk.msra.mxu1 %vm288_vm4, %v287_v0 }
 0x3b7   :  { %6144 = vmatprep.subr.mxu1 %v6753_v61 }
 0x3b9   :  { %6142 = vmatmul.mubr.msk.f32.vlgmr.msra.gmra.mxu1 %vm288_vm4, %v6892_v63  ;;  %v365_v1 = vpop.permute.xlu1 %364 }
 0x3ba   :  { %6145 = vmatpush3.xpose.msk.msra.mxu1 %vm288_vm4, %v365_v1  ;;  %6146 = vmatprep.mubr.msk.f32.mxu1 %vm6754_vm3, %v6753_v61 }
 0x3bb   :  { %6149 = vmatprep.subr.mxu1 %v6753_v61 }
 0x3bd   :  { %6147 = vmatmul.mubr.msk.f32.vlgmr.msra.gmra.mxu1 %vm288_vm4, %v6890_v62 }
 0x3be   :  { %6151 = vmatprep.mubr.msk.f32.mxu1 %vm6754_vm3, %v6753_v61 }
 0x479   :  { %v359_v5 = vpop.f32.mrf.mxu1 }
 0x47a   :  { %v360_v6 = vadd.f32 %v359_v5, %v6912_v4 }
 0x47b   :  { %v6143_v7 = vpop.f32.mrf.mxu1 }
 0x47c   :  { %v440_v8 = vsel %vm288_vm4, %v360_v6, -inf }
 0x47d   :  { %441 = vmax.xlane.f32.xlu1 %v440_v8  ;;  %v436_v9 = vpop.f32.mrf.mxu1 }
 0x47e   :  { %v437_v10 = vadd.f32 %v436_v9, %v6912_v4 }
 0x47f   :  { %v6148_v11 = vpop.f32.mrf.mxu1 }
 0x480   :  { %v443_v12 = vsel %vm288_vm4, %v437_v10, -inf }
 0x481   :  { %444 = vmax.xlane.f32.xlu0 %v443_v12 }
 0x48e   :  { %538 = vrot.lane.b32.xlu1 %v6890_v62, %s6757_s7 }
 0x497   :  { %462 = vrot.lane.b32.xlu0 %v6892_v63, %s6757_s7 }
 0x49b   :  { %616 = vrot.lane.b32.xlu0 %v6892_v63, %s6758_s8 }
 0x506   :  { %v442_v13 = vpop.xlane.xlu1 %441 }
 0x507   :  { %v446_v14 = vsub.f32 %v360_v6, %v442_v13 }
 0x509   :  { %v448_v15 = vmul.f32 1.442695, %v446_v14 }
 0x50a   :  { %v445_v16 = vpop.xlane.xlu0 %444  ;;  %v539_v30 = vpop.permute.xlu1 %538 }
 0x50b   :  { %6609 = vpow2.f32 %v448_v15  ;;  %v447_v17 = vsub.f32 %v437_v10, %v445_v16 }
 0x50d   :  { %v450_v18 = vmul.f32 1.442695, %v447_v17 }
 0x50e   :  { %v463_v19 = vpop.permute.xlu0 %462 }
 0x50f   :  { %6611 = vpow2.f32 %v450_v18  ;;  %6150 = vmatpush3.msra.mxu1 %v463_v19 }
 0x510   :  { %6154 = vmatprep.subr.mxu1 %v6753_v61 }
 0x512   :  { %v617_v24 = vpop.permute.xlu0 %616 }
 0x518   :  { %v6610_v20 = vpop.eup %6609 }
 0x519   :  { %v452_v21 = vsel %vm288_vm4, %v6610_v20, 0.0 }
 0x51a   :  { %453 = vadd.xlane.f32.xlu0 %v452_v21 }
 0x51c   :  { %v6612_v22 = vpop.eup %6611 }
 0x51d   :  { %v455_v23 = vsel %vm288_vm4, %v6612_v22, 0.0 }
 0x51e   :  { %456 = vadd.xlane.f32.xlu0 %v455_v23 }
 0x534   :  { %614 = vrot.lane.b32.xlu0 %v6892_v63, %s6759_s9 }
 0x538   :  { %694 = vrot.lane.b32.xlu0 %v6890_v62, %s6758_s8 }
 0x53c   :  { %692 = vrot.lane.b32.xlu0 %v6890_v62, %s6759_s9 }
 0x5a3   :  { %v454_v25 = vpop.xlane.xlu0 %453 }
 0x5a4   :  { %6613 = vrcp.f32 %v454_v25 }
 0x5a7   :  { %v457_v26 = vpop.xlane.xlu0 %456 }
 0x5a8   :  { %6615 = vrcp.f32 %v457_v26 }
 0x5ab   :  { %v615_v29 = vpop.permute.xlu0 %614 }
 0x5af   :  { %v695_v33 = vpop.permute.xlu0 %694 }
 0x5b1   :  { %v6614_v27 = vpop.eup %6613 }
 0x5b2   :  { %v459_v28 = vmul.f32 %v6614_v27, %v6610_v20 }
 0x5b3   :  { %v693_v34 = vpop.permute.xlu0 %692 }
 0x5b4   :  { %6152 = vmatmul.mubr.msk.f32.vlgmr.msra.gmra.mxu1 %vm288_vm4, %v459_v28 }
 0x5b5   :  { %v6616_v31 = vpop.eup %6615  ;;  %6155 = vmatpush3.msra.mxu1 %v539_v30  ;;  %6156 = vmatprep.mubr.msk.f32.mxu1 %vm6754_vm3, %v6753_v61 }
 0x5b6   :  { %6159 = vmatprep.subr.mxu1 %v6753_v61  ;;  %v461_v32 = vmul.f32 %v6616_v31, %v6612_v22 }
 0x5b8   :  { %6157 = vmatmul.mubr.msk.f32.vlgmr.msra.gmra.mxu1 %vm288_vm4, %v461_v32 }
 0x5b9   :  { %6160 = vmatpush3.xpose.msk.msra.mxu1 %vm288_vm4, %v617_v24  ;;  %6161 = vmatprep.mubr.msk.f32.mxu1 %vm6754_vm3, %v6753_v61 }
 0x5ba   :  { %6164 = vmatprep.subr.mxu1 %v6753_v61 }
 0x5bc   :  { %6162 = vmatmul.mubr.msk.f32.vlgmr.msra.gmra.mxu1 %vm288_vm4, %v615_v29 }
 0x5bd   :  { %6165 = vmatpush3.xpose.msk.msra.mxu1 %vm288_vm4, %v695_v33  ;;  %6166 = vmatprep.mubr.msk.f32.mxu1 %vm6754_vm3, %v6753_v61 }
 0x5be   :  { %6169 = vmatprep.subr.mxu1 %v6753_v61 }
 0x5c0   :  { %6167 = vmatmul.mubr.msk.f32.vlgmr.msra.gmra.mxu1 %vm288_vm4, %v693_v34 }
 0x5c1   :  { %6171 = vmatprep.mubr.msk.f32.mxu1 %vm6754_vm3, %v6753_v61 }
 0x674   :  { %v6950_v35 = vpop.f32.mrf.mxu1 }
 0x676   :  { %v6153_v36 = vpop.f32.mrf.mxu1 }
 0x678   :  { %v6952_v37 = vpop.f32.mrf.mxu1 }
 0x67a   :  { %v6158_v38 = vpop.f32.mrf.mxu1 }
 0x67c   :  { %v688_v39 = vpop.f32.mrf.mxu1 }
 0x67d   :  { %v689_v40 = vadd.f32 %v688_v39, %v6912_v4 }
 0x67e   :  { %v6163_v41 = vpop.f32.mrf.mxu1 }
 0x67f   :  { %v770_v42 = vsel %vm288_vm4, %v689_v40, -inf }
 0x680   :  { %771 = vmax.xlane.f32.xlu1 %v770_v42  ;;  %v766_v43 = vpop.f32.mrf.mxu1 }
 0x681   :  { %v767_v44 = vadd.f32 %v766_v43, %v6912_v4 }
 0x682   :  { %v6168_v45 = vpop.f32.mrf.mxu1 }
 0x683   :  { %v773_v46 = vsel %vm288_vm4, %v767_v44, -inf }
 0x684   :  { %774 = vmax.xlane.f32.xlu0 %v773_v46 }
 0x691   :  { %868 = vrot.lane.b32.xlu1 %v6890_v62, %s6760_s10 }
 0x695   :  { %946 = vrot.lane.b32.xlu1 %v6892_v63, %s6761_s11 }
 0x709   :  { %v772_v47 = vpop.xlane.xlu1 %771 }
 0x70a   :  { %v776_v48 = vsub.f32 %v689_v40, %v772_v47 }
 0x70c   :  { %v778_v49 = vmul.f32 1.442695, %v776_v48 }
 0x70d   :  { %v869_v50 = vpop.permute.xlu1 %868  ;;  %v775_v51 = vpop.xlane.xlu0 %774 }
 0x70e   :  { %6617 = vpow2.f32 %v778_v49  ;;  %v777_v52 = vsub.f32 %v767_v44, %v775_v51 }
 0x710   :  { %v780_v53 = vmul.f32 1.442695, %v777_v52 }
 0x711   :  { %v947_v54 = vpop.permute.xlu1 %946 }
 0x712   :  { %6619 = vpow2.f32 %v780_v53  ;;  %6180 = vmatpush3.xpose.msk.msra.mxu0 %vm288_vm4, %v947_v54 }
 0x713   :  { %6189 = vmatprep.subr.mxu0 %v6753_v61 }
 0x71b   :  { %v6618_v55 = vpop.eup %6617 }
 0x71c   :  { %v782_v56 = vsel %vm288_vm4, %v6618_v55, 0.0 }
 0x71d   :  { %783 = vadd.xlane.f32.xlu0 %v782_v56 }
 0x71f   :  { %v6620_v57 = vpop.eup %6619 }
 0x720   :  { %v785_v59 = vsel %vm288_vm4, %v6620_v57, 0.0 }
 0x721   :  { %786 = vadd.xlane.f32.xlu1 %v785_v59 }
 0x732   :  { %944 = vrot.lane.b32.xlu1 %v6892_v63, %s6762_s12 }
 0x733   :  { %792 = vrot.lane.b32.xlu0 %v6892_v63, %s6760_s10 }
 0x737   :  { %1024 = vrot.lane.b32.xlu0 %v6890_v62, %s6761_s11 }
 0x73b   :  { %1022 = vrot.lane.b32.xlu0 %v6890_v62, %s6762_s12 }
 0x7a6   :  { %v784_v0 = vpop.xlane.xlu0 %783 }
 0x7a7   :  { %6621 = vrcp.f32 %v784_v0 }
 0x7aa   :  { %v787_v1 = vpop.xlane.xlu1 %786  ;;  %v793_v2 = vpop.permute.xlu0 %792 }
 0x7ab   :  { %6623 = vrcp.f32 %v787_v1  ;;  %6170 = vmatpush3.msra.mxu1 %v793_v2 }
 0x7ac   :  { %6174 = vmatprep.subr.mxu1 %v6753_v61 }
 0x7ae   :  { %v945_v3 = vpop.permute.xlu1 %944  ;;  %v1025_v8 = vpop.permute.xlu0 %1024 }
 0x7af   :  { %6182 = vmatmul.mubr.msk.f32.vlgmr.msra.gmra.mxu0 %vm288_vm4, %v945_v3 }
 0x7b0   :  { %6191 = vmatprep.mubr.msk.f32.mxu0 %vm6754_vm3, %v6753_v61 }
 0x7b2   :  { %v1023_v10 = vpop.permute.xlu0 %1022 }
 0x7b4   :  { %v6622_v5 = vpop.eup %6621 }
 0x7b5   :  { %v789_v6 = vmul.f32 %v6622_v5, %v6618_v55 }
 0x7b7   :  { %6172 = vmatmul.mubr.msk.f32.vlgmr.msra.gmra.mxu1 %vm288_vm4, %v789_v6 }
 0x7b8   :  { %v6624_v7 = vpop.eup %6623  ;;  %6175 = vmatpush3.msra.mxu1 %v869_v50  ;;  %6176 = vmatprep.mubr.msk.f32.mxu1 %vm6754_vm3, %v6753_v61 }
 0x7b9   :  { %6184 = vmatprep.subr.mxu1 %v6753_v61  ;;  %v791_v9 = vmul.f32 %v6624_v7, %v6620_v57 }
 0x7bb   :  { %6177 = vmatmul.mubr.msk.f32.vlgmr.msra.gmra.mxu1 %vm288_vm4, %v791_v9 }
 0x7bc   :  { %6185 = vmatpush3.xpose.msk.msra.mxu1 %vm288_vm4, %v1025_v8  ;;  %6186 = vmatprep.mubr.msk.f32.mxu1 %vm6754_vm3, %v6753_v61 }
 0x7bd   :  { %6194 = vmatprep.subr.mxu1 %v6753_v61 }
 0x7bf   :  { %6187 = vmatmul.mubr.msk.f32.vlgmr.msra.gmra.mxu1 %vm288_vm4, %v1023_v10 }
 0x7c0   :  { %6196 = vmatprep.mubr.msk.f32.mxu1 %vm6754_vm3, %v6753_v61 }
 0x86f   :  { %v1018_v11 = vpop.f32.mrf.mxu0 }
 0x870   :  { %v1019_v12 = vadd.f32 %v1018_v11, %v6912_v4 }
 0x871   :  { %v6183_v13 = vpop.f32.mrf.mxu0 }
 0x872   :  { %v1100_v14 = vsel %vm288_vm4, %v1019_v12, -inf }
 0x873   :  { %1101 = vmax.xlane.f32.xlu1 %v1100_v14 }
 0x877   :  { %v6992_v15 = vpop.f32.mrf.mxu1 }
 0x879   :  { %v6173_v16 = vpop.f32.mrf.mxu1 }
 0x87b   :  { %v6994_v17 = vpop.f32.mrf.mxu1 }
 0x87d   :  { %v6178_v18 = vpop.f32.mrf.mxu1 }
 0x87f   :  { %v1096_v19 = vpop.f32.mrf.mxu1 }
 0x880   :  { %v1097_v20 = vadd.f32 %v1096_v19, %v6912_v4  ;;  %v134_v19 = vld [vmem:[%s7811_s1 + $0x28] sm:$0xff] }
 0x881   :  { %v6188_v21 = vpop.f32.mrf.mxu1 }
 0x882   :  { %v1103_v22 = vsel %vm288_vm4, %v1097_v20, -inf }
 0x883   :  { %1104 = vmax.xlane.f32.xlu0 %v1103_v22 }
 0x884   :  { %1198 = vrot.lane.b32.xlu1 %v6890_v62, %s6763_s13 }
 0x888   :  { %1276 = vrot.lane.b32.xlu1 %v6892_v63, %s6764_s14 }
 0x8fc   :  { %v1102_v23 = vpop.xlane.xlu1 %1101 }
 0x8fd   :  { %v1106_v24 = vsub.f32 %v1019_v12, %v1102_v23 }
 0x8ff   :  { %v1108_v25 = vmul.f32 1.442695, %v1106_v24 }
 0x900   :  { %v1199_v26 = vpop.permute.xlu1 %1198 }
 0x901   :  { %6625 = vpow2.f32 %v1108_v25  ;;  %6195 = vmatpush3.msra.mxu1 %v1199_v26 }
 0x902   :  { %6204 = vmatprep.subr.mxu1 %v6753_v61 }
 0x904   :  { %v1277_v38 = vpop.permute.xlu1 %1276 }
 0x90c   :  { %v1105_v27 = vpop.xlane.xlu0 %1104 }
 0x90d   :  { %v1107_v28 = vsub.f32 %v1097_v20, %v1105_v27  ;;  %v133_v20 = vld [vmem:[%s7811_s1 + $0x20] sm:$0xff] }
 0x90e   :  { %v6626_v29 = vpop.eup %6625 }
 0x90f   :  { %v1110_v30 = vmul.f32 1.442695, %v1107_v28  ;;  %v1112_v31 = vsel %vm288_vm4, %v6626_v29, 0.0 }
 0x910   :  { %1113 = vadd.xlane.f32.xlu0 %v1112_v31 }
 0x911   :  { %6627 = vpow2.f32 %v1110_v30 }
 0x91e   :  { %v6628_v32 = vpop.eup %6627 }
 0x91f   :  { %v1115_v33 = vsel %vm288_vm4, %v6628_v32, 0.0 }
 0x920   :  { %1116 = vadd.xlane.f32.xlu1 %v1115_v33 }
 0x926   :  { %1122 = vrot.lane.b32.xlu0 %v6892_v63, %s6763_s13 }
 0x92a   :  { %1354 = vrot.lane.b32.xlu0 %v6890_v62, %s6764_s14 }
 0x92e   :  { %1352 = vrot.lane.b32.xlu0 %v6890_v62, %s6765_s15 }
 0x931   :  { %1274 = vrot.lane.b32.xlu1 %v6892_v63, %s6765_s15 }
 0x999   :  { %v1114_v34 = vpop.xlane.xlu0 %1113 }
 0x99a   :  { %6629 = vrcp.f32 %v1114_v34 }
 0x99d   :  { %v1123_v36 = vpop.permute.xlu0 %1122 }
 0x99e   :  { %6190 = vmatpush3.msra.mxu0 %v1123_v36 }
 0x99f   :  { %6199 = vmatprep.subr.mxu0 %v6753_v61 }
 0x9a1   :  { %v1355_v44 = vpop.permute.xlu0 %1354 }
 0x9a5   :  { %v1353_v46 = vpop.permute.xlu0 %1352 }
 0x9a7   :  { %v6630_v39 = vpop.eup %6629 }
 0x9a8   :  { %v1119_v40 = vmul.f32 %v6630_v39, %v6626_v29  ;;  %v5709_v39 = vld [vmem:[%s7811_s1 + $0xe4] ss:$0 sm:$0xff] }
 0x9a9   :  { %v1117_v41 = vpop.xlane.xlu1 %1116 }
 0x9aa   :  { %6631 = vrcp.f32 %v1117_v41  ;;  %6192 = vmatmul.mubr.msk.f32.vlgmr.msra.gmra.mxu0 %vm288_vm4, %v1119_v40 }
 0x9ab   :  { %6200 = vmatpush3.xpose.msk.msra.mxu0 %vm288_vm4, %v1277_v38  ;;  %6201 = vmatprep.mubr.msk.f32.mxu0 %vm6754_vm3, %v6753_v61 }
 0x9ac   :  { %6209 = vmatprep.subr.mxu0 %v6753_v61 }
 0x9ad   :  { %v1275_v42 = vpop.permute.xlu1 %1274 }
 0x9ae   :  { %6202 = vmatmul.mubr.msk.f32.vlgmr.msra.gmra.mxu0 %vm288_vm4, %v1275_v42 }
 0x9af   :  { %6211 = vmatprep.mubr.msk.f32.mxu0 %vm6754_vm3, %v6753_v61 }
 0x9b7   :  { %v6632_v43 = vpop.eup %6631 }
 0x9b8   :  { %v1121_v45 = vmul.f32 %v6632_v43, %v6628_v32 }
 0x9ba   :  { %6197 = vmatmul.mubr.msk.f32.vlgmr.msra.gmra.mxu1 %vm288_vm4, %v1121_v45 }
 0x9bb   :  { %6205 = vmatpush3.xpose.msk.msra.mxu1 %vm288_vm4, %v1355_v44  ;;  %6206 = vmatprep.mubr.msk.f32.mxu1 %vm6754_vm3, %v6753_v61 }
 0x9bc   :  { %6214 = vmatprep.subr.mxu1 %v6753_v61 }
 0x9be   :  { %6207 = vmatmul.mubr.msk.f32.vlgmr.msra.gmra.mxu1 %vm288_vm4, %v1353_v46 }
 0x9bf   :  { %6216 = vmatprep.mubr.msk.f32.mxu1 %vm6754_vm3, %v6753_v61 }
 0xa6a   :  { %v1194_v47 = vpop.f32.mrf.mxu0 }
 0xa6c   :  { %v6193_v48 = vpop.f32.mrf.mxu0 }
 0xa6e   :  { %v1348_v49 = vpop.f32.mrf.mxu0 }
 0xa6f   :  { %v1349_v50 = vadd.f32 %v1348_v49, %v6912_v4 }
 0xa70   :  { %v6203_v51 = vpop.f32.mrf.mxu0 }
 0xa71   :  { %v1430_v52 = vsel %vm288_vm4, %v1349_v50, -inf }
 0xa72   :  { %1431 = vmax.xlane.f32.xlu1 %v1430_v52 }
 0xa7a   :  { %v1270_v53 = vpop.f32.mrf.mxu1 }
 0xa7c   :  { %v6198_v54 = vpop.f32.mrf.mxu1 }
 0xa7d   :  { %v140_v54 = vld [vmem:[%s7811_s1 + $0x58] sm:$0xff] }
 0xa7e   :  { %v1426_v55 = vpop.f32.mrf.mxu1 }
 0xa7f   :  { %v1427_v56 = vadd.f32 %v1426_v55, %v6912_v4  ;;  %v139_v55 = vld [vmem:[%s7811_s1 + $0x50] sm:$0xff] }
 0xa80   :  { %v6208_v57 = vpop.f32.mrf.mxu1 }
 0xa81   :  { %v1433_v59 = vsel %vm288_vm4, %v1427_v56, -inf  ;;  %v137_v57 = vld [vmem:[%s7811_s1 + $0x40] sm:$0xff] }
 0xa82   :  { %1434 = vmax.xlane.f32.xlu0 %v1433_v59  ;;  %v156_v59 = vld [vmem:[%s7811_s1 + $0xd8] sm:$0xff] }
 0xafb   :  { %v1432_v0 = vpop.xlane.xlu1 %1431 }
 0xafc   :  { %v1436_v1 = vsub.f32 %v1349_v50, %v1432_v0  ;;  %v155_v0 = vld [vmem:[%s7811_s1 + $0xd0] sm:$0xff] }
 0xafe   :  { %v1438_v2 = vmul.f32 1.442695, %v1436_v1  ;;  %v154_v1 = vld [vmem:[%s7811_s1 + $0xc8] sm:$0xff] }
 0xb00   :  { %6633 = vpow2.f32 %v1438_v2  ;;  %v153_v2 = vld [vmem:[%s7811_s1 + $0xc0] sm:$0xff] }
 0xb0b   :  { %v1435_v3 = vpop.xlane.xlu0 %1434 }
 0xb0c   :  { %v1437_v5 = vsub.f32 %v1427_v56, %v1435_v3  ;;  %v138_v56 = vld [vmem:[%s7811_s1 + $0x48] sm:$0xff]  ;;  %v152_v3 = vld [vmem:[%s7811_s1 + $0xb8] sm:$0xff] }
 0xb0d   :  { %v6634_v6 = vpop.eup %6633 }
 0xb0e   :  { %v1440_v7 = vmul.f32 1.442695, %v1437_v5  ;;  %v1442_v8 = vsel %vm288_vm4, %v6634_v6, 0.0  ;;  %v151_v5 = vld [vmem:[%s7811_s1 + $0xb0] sm:$0xff] }
 0xb0f   :  { %1443 = vadd.xlane.f32.xlu0 %v1442_v8  ;;  %v148_v8 = vld [vmem:[%s7811_s1 + $0x98] sm:$0xff] }
 0xb10   :  { %6635 = vpow2.f32 %v1440_v7  ;;  %v149_v7 = vld [vmem:[%s7811_s1 + $0xa0] sm:$0xff] }
 0xb1d   :  { %v6636_v9 = vpop.eup %6635 }
 0xb1e   :  { %v1445_v10 = vsel %vm288_vm4, %v6636_v9, 0.0 }
 0xb1f   :  { %1446 = vadd.xlane.f32.xlu1 %v1445_v10  ;;  %v146_v10 = vld [vmem:[%s7811_s1 + $0x88] sm:$0xff] }
 0xb25   :  { %1452 = vrot.lane.b32.xlu0 %v6892_v63, %s6766_s16 }
 0xb29   :  { %1608 = vrot.lane.b32.xlu0 %v6994_v17, %s6767_s17 }
 0xb2d   :  { %1616 = vrot.lane.b32.xlu0 %v1270_v53, %s6768_s18 }
 0xb30   :  { %1528 = vrot.lane.b32.xlu1 %v6890_v62, %s6766_s16  ;;  %v136_v62 = vld [vmem:[%s7811_s1 + $0x38] sm:$0xff] }
 0xb34   :  { %1606 = vrot.lane.b32.xlu1 %v6992_v15, %s6767_s17  ;;  %v135_v15 = vld [vmem:[%s7811_s1 + $0x30] sm:$0xff] }
 0xb38   :  { %1614 = vrot.lane.b32.xlu1 %v1194_v47, %s6768_s18 }
 0xb98   :  { %v1444_v11 = vpop.xlane.xlu0 %1443 }
 0xb99   :  { %6637 = vrcp.f32 %v1444_v11  ;;  %v145_v11 = vld [vmem:[%s7811_s1 + $0x80] sm:$0xff] }
 0xb9c   :  { %v1453_v12 = vpop.permute.xlu0 %1452 }
 0xb9d   :  { %6210 = vmatpush3.msra.mxu0 %v1453_v12 }
 0xb9e   :  { %6241 = vmatprep.subr.mxu0 %v156_v59 }
 0xba0   :  { %v1609_v31 = vpop.permute.xlu0 %1608 }
 0xba1   :  { %v1629_v33 = vsel %vm288_vm4, %v6952_v37, %v1609_v31 }
 0xba4   :  { %v1617_v32 = vpop.permute.xlu0 %1616 }
 0xba5   :  { %v1632_v34 = vsel %vm1630_vm7, %v1629_v33, %v1617_v32 }
 0xba6   :  { %v6638_v63 = vpop.eup %6637 }
 0xba7   :  { %v1449_v13 = vmul.f32 %v6638_v63, %v6634_v6  ;;  %v150_v6 = vld [vmem:[%s7811_s1 + $0xa8] sm:$0xff] }
 0xba8   :  { %v1447_v14 = vpop.xlane.xlu1 %1446 }
 0xba9   :  { %6639 = vrcp.f32 %v1447_v14  ;;  %6212 = vmatmul.mubr.msk.f32.vlgmr.msra.gmra.mxu0 %vm288_vm4, %v1449_v13 }
 0xbaa   :  { %6242 = vmatpush3.msra.mxu0 %v156_v59 }
 0xbab   :  { %6243 = vmatprep.subr.mxu0 %v155_v0 }
 0xbac   :  { %v1529_v16 = vpop.permute.xlu1 %1528  ;;  %6244 = vmatpush3.msra.mxu0 %v155_v0 }
 0xbad   :  { %6215 = vmatpush3.msra.mxu1 %v1529_v16  ;;  %6245 = vmatprep.subr.mxu0 %v154_v1 }
 0xbae   :  { %6219 = vmatprep.subr.mxu1 %v136_v62  ;;  %6246 = vmatpush3.msra.mxu0 %v154_v1 }
 0xbaf   :  { %6247 = vmatprep.subr.mxu0 %v153_v2 }
 0xbb0   :  { %v1607_v25 = vpop.permute.xlu1 %1606  ;;  %6248 = vmatpush3.msra.mxu0 %v153_v2 }
 0xbb1   :  { %v1628_v27 = vsel %vm288_vm4, %v6950_v35, %v1607_v25  ;;  %6249 = vmatprep.subr.mxu0 %v152_v3 }
 0xbb2   :  { %6250 = vmatpush3.msra.mxu0 %v152_v3 }
 0xbb3   :  { %6251 = vmatprep.subr.mxu0 %v151_v5 }
 0xbb4   :  { %v1615_v26 = vpop.permute.xlu1 %1614  ;;  %6252 = vmatpush3.msra.mxu0 %v151_v5 }
 0xbb5   :  { %v1631_v28 = vsel %vm1630_vm7, %v1628_v27, %v1615_v26  ;;  %6253 = vmatprep.subr.mxu0 %v150_v6  ;;  %v144_v26 = vld [vmem:[%s7811_s1 + $0x78] sm:$0xff]  ;;  %v143_v27 = vld [vmem:[%s7811_s1 + $0x70] sm:$0xff] }
 0xbb6   :  { %v6640_v17 = vpop.eup %6639  ;;  %6254 = vmatpush3.msra.mxu0 %v150_v6 }
 0xbb7   :  { %v1451_v18 = vmul.f32 %v6640_v17, %v6636_v9  ;;  %6255 = vmatprep.subr.mxu0 %v149_v7  ;;  %v147_v9 = vld [vmem:[%s7811_s1 + $0x90] sm:$0xff] }
 0xbb8   :  { %6256 = vmatpush3.msra.mxu0 %v149_v7  ;;  %v5751_v7 = vld [vmem:[%s7811_s1 + $0x1c8] ss:$0 sm:$0xff] }
 0xbb9   :  { %6217 = vmatmul.mubr.msk.f32.vlgmr.msra.gmra.mxu1 %vm288_vm4, %v1451_v18  ;;  %6257 = vmatprep.subr.mxu0 %v148_v8 }
 0xbba   :  { %6220 = vmatpush3.msra.mxu1 %v136_v62  ;;  %6258 = vmatpush3.msra.mxu0 %v148_v8  ;;  %v5710_v62 = vld [vmem:[%s7811_s1 + $0xe2] ss:$0 sm:$0xff] }
 0xbbb   :  { %6221 = vmatprep.subr.mxu1 %v135_v15  ;;  %6259 = vmatprep.subr.mxu0 %v147_v9 }
 0xbbc   :  { %6222 = vmatpush3.msra.mxu1 %v135_v15  ;;  %6260 = vmatpush3.msra.mxu0 %v147_v9 }
 0xbbd   :  { %6223 = vmatprep.subr.mxu1 %v134_v19  ;;  %6261 = vmatprep.subr.mxu0 %v146_v10 }
 0xbbe   :  { %6224 = vmatpush3.msra.mxu1 %v134_v19  ;;  %6262 = vmatpush3.msra.mxu0 %v146_v10 }
 0xbbf   :  { %6225 = vmatprep.subr.mxu1 %v133_v20  ;;  %6263 = vmatprep.subr.mxu0 %v145_v11 }
 0xbc0   :  { %6226 = vmatpush3.msra.mxu1 %v133_v20  ;;  %6264 = vmatpush3.msra.mxu0 %v145_v11 }
 0xbc1   :  { %6230 = vmatprep.subr.mxu1 %v140_v54  ;;  %6265 = vmatprep.subr.mxu0 %v144_v26 }
 0xbc2   :  { %6266 = vmatpush3.msra.mxu0 %v144_v26 }
 0xbc3   :  { %6267 = vmatprep.subr.mxu0 %v143_v27 }
 0xbc4   :  { %6268 = vmatpush3.msra.mxu0 %v143_v27 }
 0xc69   :  { %v1524_v21 = vpop.f32.mrf.mxu0 }
 0xc6a   :  { %1622 = vrot.lane.b32.xlu1 %v1524_v21, %s6769_s27 }
 0xc6b   :  { %v6213_v22 = vpop.f32.mrf.mxu0 }
 0xc6c   :  { %v5711_v22 = vld [vmem:[%s7811_s1 + $0xe3] ss:$0 sm:$0xff] }
 0xc79   :  { %v1600_v23 = vpop.f32.mrf.mxu1 }
 0xc7a   :  { %1624 = vrot.lane.b32.xlu0 %v1600_v23, %s6769_s27 }
 0xc7b   :  { %v6218_v24 = vpop.f32.mrf.mxu1 }
 0xcdc   :  { %v1623_v29 = vpop.permute.xlu1 %1622 }
 0xcdd   :  { %v1634_v30 = vsel %vm1633_vm6, %v1631_v28, %v1623_v29  ;;  %v142_v28 = vld [vmem:[%s7811_s1 + $0x68] sm:$0xff]  ;;  %v141_v29 = vld [vmem:[%s7811_s1 + $0x60] sm:$0xff] }
 0xcde   :  { %6227 = vmatprep.mubr.msk.f32.mxu1 %vm164_vm2, %v1634_v30  ;;  %6269 = vmatprep.subr.mxu0 %v142_v28  ;;  %v5712_v30 = vld [vmem:[%s7811_s1 + $0xe6] ss:$0 sm:$0xff] }
 0xcdf   :  { %6270 = vmatpush3.msra.mxu0 %v142_v28 }
 0xce0   :  { %6271 = vmatprep.subr.mxu0 %v141_v29 }
 0xce1   :  { %6272 = vmatpush3.msra.mxu0 %v141_v29 }
 0xce2   :  { %6317 = vmatprep.subr.mxu0 %v6753_v61 }
 0xcec   :  { %v1625_v36 = vpop.permute.xlu0 %1624 }
 0xced   :  { %v1635_v38 = vsel %vm1633_vm6, %v1632_v34, %v1625_v36 }
 0xcee   :  { %6228 = vmatmul.mubr.msk.f32.vlgmr.msra.gmra.mxu1 %vm164_vm2, %v1635_v38 }
 0xcef   :  { %6231 = vmatpush3.msra.mxu1 %v140_v54  ;;  %v5719_v54 = vld [vmem:[%s7811_s1 + $0x100] sm:$0xff] }
 0xcf0   :  { %6232 = vmatprep.subr.mxu1 %v139_v55 }
 0xcf1   :  { %6233 = vmatpush3.msra.mxu1 %v139_v55  ;;  %v5718_v55 = vld [vmem:[%s7811_s1 + $0xf8] sm:$0xff] }
 0xcf2   :  { %6234 = vmatprep.subr.mxu1 %v138_v56 }
 0xcf3   :  { %6235 = vmatpush3.msra.mxu1 %v138_v56  ;;  %v5717_v56 = vld [vmem:[%s7811_s1 + $0xf0] sm:$0xff] }
 0xcf4   :  { %6236 = vmatprep.subr.mxu1 %v137_v57 }
 0xcf5   :  { %6237 = vmatpush3.msra.mxu1 %v137_v57  ;;  %v5716_v57 = vld [vmem:[%s7811_s1 + $0xe8] sm:$0xff] }
 0xcf6   :  { %6276 = vmatprep.subr.mxu1 %v5719_v54 }
 0xdae   :  { %v6229_v35 = vpop.f32.mrf.mxu1 }
 0xdaf   :  { %v1718_v40 = vadd.f32 %v6229_v35, %v6880_v60  ;;  %v5715_v35 = vld [vmem:[%s7811_s1 + $0xe5] ss:$0 sm:$0xff] }
 0xdb0   :  { %v1708_v41 = vpop.f32.mrf.mxu1 }
 0xdb1   :  { %v1717_v42 = vadd.f32 %v1708_v41, %v6876_v58  ;;  %v1724_v43 = vadd.f32 %v5709_v39, %v1718_v40 }
 0xdb3   :  { %v1728_v37 = vsel %vm164_vm2, %v1724_v43, 0.0  ;;  %v1723_v44 = vadd.f32 %v5709_v39, %v1717_v42 }
 0xdb4   :  { %1729 = vadd.xlane.f32.xlu0 %v1728_v37 }
 0xdb5   :  { %v1725_v45 = vsel %vm164_vm2, %v1723_v44, 0.0 }
 0xdb6   :  { %1726 = vadd.xlane.f32.xlu1 %v1725_v45 }
 0xe3d   :  { %v1730_v46 = vpop.xlane.xlu0 %1729 }
 0xe3e   :  { %v1732_v47 = vmul.f32 0.03125, %v1730_v46 }
 0xe3f   :  { %v1727_v48 = vpop.xlane.xlu1 %1726 }
 0xe40   :  { %v7079_v49 = vsub.f32 %v1724_v43, %v1732_v47  ;;  %v1731_v50 = vmul.f32 0.03125, %v1727_v48 }
 0xe42   :  { %v7081_v51 = vsub.f32 %v1723_v44, %v1731_v50  ;;  %v1736_v60 = vmul.f32 %v7079_v49, %v7079_v49 }
 0xe44   :  { %v1740_v58 = vsel %vm164_vm2, %v1736_v60, 0.0  ;;  %v1735_v52 = vmul.f32 %v7081_v51, %v7081_v51 }
 0xe45   :  { %1741 = vadd.xlane.f32.xlu1 %v1740_v58 }
 0xe46   :  { %v1737_v53 = vsel %vm164_vm2, %v1735_v52, 0.0 }
 0xe47   :  { %1738 = vadd.xlane.f32.xlu0 %v1737_v53 }
 0xece   :  { %v1742_v12 = vpop.xlane.xlu1 %1741 }
 0xecf   :  { %v1744_v63 = vmul.f32 0.03125, %v1742_v12  ;;  %v5752_v12 = vld [vmem:[%s7811_s1 + $0x1c9] ss:$0 sm:$0xff] }
 0xed0   :  { %v1739_v13 = vpop.xlane.xlu0 %1738 }
 0xed1   :  { %v1746_v14 = vadd.f32 1e-05, %v1744_v63  ;;  %v1743_v16 = vmul.f32 0.03125, %v1739_v13 }
 0xed3   :  { %6641 = vrsqrt.f32 %v1746_v14  ;;  %v1745_v17 = vadd.f32 1e-05, %v1743_v16 }
 0xed5   :  { %6643 = vrsqrt.f32 %v1745_v17 }
 0xee0   :  { %v6642_v18 = vpop.eup %6641 }
 0xee1   :  { %v1750_v15 = vmul.f32 %v6642_v18, %v7079_v49 }
 0xee2   :  { %v6644_v19 = vpop.eup %6643 }
 0xee3   :  { %v1749_v20 = vmul.f32 %v6644_v19, %v7081_v51  ;;  %v1756_v21 = vmul.f32 %v5710_v62, %v1750_v15 }
 0xee5   :  { %v1755_v23 = vmul.f32 %v5710_v62, %v1749_v20  ;;  %v1762_v25 = vadd.f32 %v5711_v22, %v1756_v21 }
 0xee7   :  { %v1761_v24 = vadd.f32 %v5711_v22, %v1755_v23 }
 0xee9   :  { %6238 = vmatprep.mubr.msk.f32.mxu1 %vm164_vm2, %v1761_v24 }
 0xeea   :  { %6239 = vmatmul.mubr.msk.f32.vlgmr.msra.gmra.mxu1 %vm164_vm2, %v1762_v25 }
 0xeeb   :  { %6277 = vmatpush3.msra.mxu1 %v5719_v54 }
 0xeec   :  { %6278 = vmatprep.subr.mxu1 %v5718_v55 }
 0xeed   :  { %6279 = vmatpush3.msra.mxu1 %v5718_v55 }
 0xeee   :  { %6280 = vmatprep.subr.mxu1 %v5717_v56 }
 0xeef   :  { %6281 = vmatpush3.msra.mxu1 %v5717_v56 }
 0xef0   :  { %6282 = vmatprep.subr.mxu1 %v5716_v57 }
 0xef1   :  { %6283 = vmatpush3.msra.mxu1 %v5716_v57 }
 0xef2   :  { %6287 = vmatprep.subr.mxu1 %v6753_v61 }
 0xfaa   :  { %v6240_v31 = vpop.f32.mrf.mxu1 }
 0xfab   :  { %v1845_v32 = vadd.f32 %v6240_v31, %v5712_v30 }
 0xfac   :  { %v1839_v33 = vpop.f32.mrf.mxu1 }
 0xfad   :  { %v1840_v34 = vadd.f32 %v5712_v30, %v1839_v33  ;;  %v1849_v38 = vmax.f32 %v1845_v32, 0.0 }
 0xfaf   :  { %v1848_v36 = vmax.f32 %v1840_v34, 0.0 }
 0xfb1   :  { %6273 = vmatprep.mubr.f32.mxu0 %v1848_v36 }
 0xfb2   :  { %6274 = vmatmul.mubr.f32.vlgmr.msra.gmra.mxu0 %v1849_v38 }
 0xfb3   :  { %6319 = vmatprep.mubr.msk.f32.mxu0 %vm6754_vm3, %v6753_v61 }
0x1072   :  { %v6275_v39 = vpop.f32.mrf.mxu0 }
0x1073   :  { %v1926_v40 = vadd.f32 %v6275_v39, %v5715_v35 }
0x1074   :  { %v1920_v41 = vpop.f32.mrf.mxu0 }
0x1075   :  { %v1921_v42 = vadd.f32 %v5715_v35, %v1920_v41  ;;  %v1930_v43 = vadd.f32 %v1926_v40, %v1762_v25 }
0x1077   :  { %v1970_v37 = vsel %vm164_vm2, %v1930_v43, 0.0  ;;  %v1929_v44 = vadd.f32 %v1921_v42, %v1761_v24 }
0x1078   :  { %1971 = vadd.xlane.f32.xlu1 %v1970_v37 }
0x1079   :  { %v1967_v45 = vsel %vm164_vm2, %v1929_v44, 0.0 }
0x107a   :  { %1968 = vadd.xlane.f32.xlu0 %v1967_v45 }
0x1101   :  { %v1972_v46 = vpop.xlane.xlu1 %1971 }
0x1102   :  { %v1974_v47 = vmul.f32 0.03125, %v1972_v46 }
0x1103   :  { %v1969_v48 = vpop.xlane.xlu0 %1968 }
0x1104   :  { %v1976_v49 = vsub.f32 %v1930_v43, %v1974_v47  ;;  %v1973_v50 = vmul.f32 0.03125, %v1969_v48 }
0x1106   :  { %v1975_v51 = vsub.f32 %v1929_v44, %v1973_v50  ;;  %v1978_v60 = vmul.f32 %v1976_v49, %v1976_v49 }
0x1108   :  { %v1982_v58 = vsel %vm164_vm2, %v1978_v60, 0.0  ;;  %v1977_v52 = vmul.f32 %v1975_v51, %v1975_v51 }
0x1109   :  { %1983 = vadd.xlane.f32.xlu1 %v1982_v58 }
0x110a   :  { %v1979_v53 = vsel %vm164_vm2, %v1977_v52, 0.0 }
0x110b   :  { %1980 = vadd.xlane.f32.xlu0 %v1979_v53 }
0x1192   :  { %v1984_v59 = vpop.xlane.xlu1 %1983 }
0x1193   :  { %v1986_v0 = vmul.f32 0.03125, %v1984_v59 }
0x1194   :  { %v1981_v1 = vpop.xlane.xlu0 %1980 }
0x1195   :  { %v1988_v2 = vadd.f32 1e-05, %v1986_v0  ;;  %v1985_v3 = vmul.f32 0.03125, %v1981_v1 }
0x1197   :  { %6645 = vrsqrt.f32 %v1988_v2  ;;  %v1987_v5 = vadd.f32 1e-05, %v1985_v3 }
0x1199   :  { %6647 = vrsqrt.f32 %v1987_v5 }
0x11a4   :  { %v6646_v6 = vpop.eup %6645 }
0x11a5   :  { %v1992_v8 = vmul.f32 %v6646_v6, %v1976_v49 }
0x11a6   :  { %v6648_v9 = vpop.eup %6647 }
0x11a7   :  { %v1991_v10 = vmul.f32 %v6648_v9, %v1975_v51  ;;  %v1998_v11 = vmul.f32 %v5751_v7, %v1992_v8 }
0x11a9   :  { %v1997_v63 = vmul.f32 %v5751_v7, %v1991_v10  ;;  %v7193_v14 = vadd.f32 %v5752_v12, %v1998_v11 }
0x11ab   :  { %v7191_v13 = vadd.f32 %v5752_v12, %v1997_v63 }
0x11ad   :  { %6284 = vmatprep.mubr.msk.f32.mxu1 %vm164_vm2, %v7191_v13 }
0x11ae   :  { %6285 = vmatmul.mubr.msk.f32.vlgmr.msra.gmra.mxu1 %vm164_vm2, %v7193_v14 }
0x11af   :  { %6289 = vmatprep.mubr.msk.f32.mxu1 %vm6754_vm3, %v6753_v61 }
0x126e   :  { %v7201_v16 = vpop.f32.mrf.mxu1 }
0x126f   :  { %2164 = vrot.lane.b32.xlu1 %v7201_v16, %s6755_s6 }
0x1270   :  { %v7205_v17 = vpop.f32.mrf.mxu1 }
0x1271   :  { %2087 = vrot.lane.b32.xlu0 %v7205_v17, %s6755_s6 }
0x12e1   :  { %v2165_v62 = vpop.permute.xlu1 %2164 }
0x12e3   :  { %v2088_v18 = vpop.permute.xlu0 %2087 }
0x12e4   :  { %6288 = vmatpush3.xpose.msk.msra.mxu1 %vm288_vm4, %v2088_v18 }
0x12e5   :  { %6292 = vmatprep.subr.mxu1 %v6753_v61 }
0x12e7   :  { %6290 = vmatmul.mubr.msk.f32.vlgmr.msra.gmra.mxu1 %vm288_vm4, %v7205_v17 }
0x12e8   :  { %6293 = vmatpush3.xpose.msk.msra.mxu1 %vm288_vm4, %v2165_v62  ;;  %6294 = vmatprep.mubr.msk.f32.mxu1 %vm6754_vm3, %v6753_v61 }
0x12e9   :  { %6297 = vmatprep.subr.mxu1 %v6753_v61 }
0x12eb   :  { %6295 = vmatmul.mubr.msk.f32.vlgmr.msra.gmra.mxu1 %vm288_vm4, %v7201_v16 }
0x12ec   :  { %6299 = vmatprep.mubr.msk.f32.mxu1 %vm6754_vm3, %v6753_v61 }
0x13a7   :  { %v2159_v15 = vpop.f32.mrf.mxu1 }
0x13a8   :  { %v2160_v19 = vadd.f32 %v2159_v15, %v6912_v4 }
0x13a9   :  { %v6291_v20 = vpop.f32.mrf.mxu1 }
0x13aa   :  { %v2240_v21 = vsel %vm288_vm4, %v2160_v19, -inf }
0x13ab   :  { %2241 = vmax.xlane.f32.xlu1 %v2240_v21  ;;  %v2236_v22 = vpop.f32.mrf.mxu1 }
0x13ac   :  { %v2237_v23 = vadd.f32 %v2236_v22, %v6912_v4 }
0x13ad   :  { %v6296_v24 = vpop.f32.mrf.mxu1 }
0x13ae   :  { %v2243_v25 = vsel %vm288_vm4, %v2237_v23, -inf }
0x13af   :  { %2244 = vmax.xlane.f32.xlu0 %v2243_v25 }
0x13bc   :  { %2338 = vrot.lane.b32.xlu1 %v7201_v16, %s6757_s7 }
0x13c0   :  { %2416 = vrot.lane.b32.xlu1 %v7205_v17, %s6758_s8 }
0x1434   :  { %v2242_v26 = vpop.xlane.xlu1 %2241 }
0x1435   :  { %v2246_v27 = vsub.f32 %v2160_v19, %v2242_v26 }
0x1437   :  { %v2248_v28 = vmul.f32 1.442695, %v2246_v27 }
0x1438   :  { %v2245_v29 = vpop.xlane.xlu0 %2244  ;;  %v2339_v38 = vpop.permute.xlu1 %2338 }
0x1439   :  { %6649 = vpow2.f32 %v2248_v28  ;;  %v2247_v30 = vsub.f32 %v2237_v23, %v2245_v29 }
0x143b   :  { %v2250_v31 = vmul.f32 1.442695, %v2247_v30 }
0x143c   :  { %v2417_v35 = vpop.permute.xlu1 %2416 }
0x143d   :  { %6651 = vpow2.f32 %v2250_v31 }
0x1446   :  { %v6650_v32 = vpop.eup %6649 }
0x1447   :  { %v2252_v33 = vsel %vm288_vm4, %v6650_v32, 0.0 }
0x1448   :  { %2253 = vadd.xlane.f32.xlu0 %v2252_v33 }
0x144a   :  { %v6652_v34 = vpop.eup %6651 }
0x144b   :  { %v2255_v36 = vsel %vm288_vm4, %v6652_v34, 0.0 }
0x144c   :  { %2256 = vadd.xlane.f32.xlu1 %v2255_v36 }
0x145d   :  { %2494 = vrot.lane.b32.xlu1 %v7201_v16, %s6758_s8 }
0x145e   :  { %2262 = vrot.lane.b32.xlu0 %v7205_v17, %s6757_s7 }
0x1462   :  { %2414 = vrot.lane.b32.xlu0 %v7205_v17, %s6759_s9 }
0x1466   :  { %2492 = vrot.lane.b32.xlu0 %v7201_v16, %s6759_s9 }
0x14d1   :  { %v2254_v39 = vpop.xlane.xlu0 %2253 }
0x14d2   :  { %6653 = vrcp.f32 %v2254_v39 }
0x14d5   :  { %v2257_v40 = vpop.xlane.xlu1 %2256  ;;  %v2263_v41 = vpop.permute.xlu0 %2262 }
0x14d6   :  { %6655 = vrcp.f32 %v2257_v40  ;;  %6298 = vmatpush3.msra.mxu1 %v2263_v41 }
0x14d7   :  { %6302 = vmatprep.subr.mxu1 %v6753_v61 }
0x14d9   :  { %v2415_v45 = vpop.permute.xlu0 %2414  ;;  %v2495_v46 = vpop.permute.xlu1 %2494 }
0x14dd   :  { %v2493_v47 = vpop.permute.xlu0 %2492 }
0x14df   :  { %v6654_v42 = vpop.eup %6653 }
0x14e0   :  { %v2259_v43 = vmul.f32 %v6654_v42, %v6650_v32 }
0x14e2   :  { %6300 = vmatmul.mubr.msk.f32.vlgmr.msra.gmra.mxu1 %vm288_vm4, %v2259_v43 }
0x14e3   :  { %v6656_v37 = vpop.eup %6655  ;;  %6303 = vmatpush3.msra.mxu1 %v2339_v38  ;;  %6304 = vmatprep.mubr.msk.f32.mxu1 %vm6754_vm3, %v6753_v61 }
0x14e4   :  { %6307 = vmatprep.subr.mxu1 %v6753_v61  ;;  %v2261_v44 = vmul.f32 %v6656_v37, %v6652_v34 }
0x14e6   :  { %6305 = vmatmul.mubr.msk.f32.vlgmr.msra.gmra.mxu1 %vm288_vm4, %v2261_v44 }
0x14e7   :  { %6308 = vmatpush3.xpose.msk.msra.mxu1 %vm288_vm4, %v2417_v35  ;;  %6309 = vmatprep.mubr.msk.f32.mxu1 %vm6754_vm3, %v6753_v61 }
0x14e8   :  { %6312 = vmatprep.subr.mxu1 %v6753_v61 }
0x14ea   :  { %6310 = vmatmul.mubr.msk.f32.vlgmr.msra.gmra.mxu1 %vm288_vm4, %v2415_v45 }
0x14eb   :  { %6313 = vmatpush3.xpose.msk.msra.mxu1 %vm288_vm4, %v2495_v46  ;;  %6314 = vmatprep.mubr.msk.f32.mxu1 %vm6754_vm3, %v6753_v61 }
0x14ec   :  { %6322 = vmatprep.subr.mxu1 %v6753_v61 }
0x14ee   :  { %6315 = vmatmul.mubr.msk.f32.vlgmr.msra.gmra.mxu1 %vm288_vm4, %v2493_v47 }
0x14ef   :  { %6324 = vmatprep.mubr.msk.f32.mxu1 %vm6754_vm3, %v6753_v61 }
0x15a2   :  { %v7257_v48 = vpop.f32.mrf.mxu1 }
0x15a4   :  { %v6301_v49 = vpop.f32.mrf.mxu1 }
0x15a6   :  { %v7259_v50 = vpop.f32.mrf.mxu1 }
0x15a8   :  { %v6306_v51 = vpop.f32.mrf.mxu1 }
0x15aa   :  { %v2488_v60 = vpop.f32.mrf.mxu1 }
0x15ab   :  { %v2489_v58 = vadd.f32 %v2488_v60, %v6912_v4 }
0x15ac   :  { %v6311_v52 = vpop.f32.mrf.mxu1 }
0x15ad   :  { %v2570_v53 = vsel %vm288_vm4, %v2489_v58, -inf }
0x15ae   :  { %2571 = vmax.xlane.f32.xlu1 %v2570_v53  ;;  %v2566_v54 = vpop.f32.mrf.mxu1 }
0x15af   :  { %v2567_v55 = vadd.f32 %v2566_v54, %v6912_v4 }
0x15b0   :  { %v6316_v56 = vpop.f32.mrf.mxu1 }
0x15b1   :  { %v2573_v57 = vsel %vm288_vm4, %v2567_v55, -inf }
0x15b2   :  { %2574 = vmax.xlane.f32.xlu0 %v2573_v57 }
0x15bf   :  { %2668 = vrot.lane.b32.xlu1 %v7201_v16, %s6760_s10 }
0x15c3   :  { %2746 = vrot.lane.b32.xlu1 %v7205_v17, %s6761_s11 }
0x15c8   :  { %2592 = vrot.lane.b32.xlu0 %v7205_v17, %s6760_s10 }
0x1637   :  { %v2572_v59 = vpop.xlane.xlu1 %2571 }
0x1638   :  { %v2576_v0 = vsub.f32 %v2489_v58, %v2572_v59 }
0x163a   :  { %v2578_v1 = vmul.f32 1.442695, %v2576_v0 }
0x163b   :  { %v2669_v2 = vpop.permute.xlu1 %2668  ;;  %v2575_v3 = vpop.xlane.xlu0 %2574 }
0x163c   :  { %6657 = vpow2.f32 %v2578_v1  ;;  %v2577_v5 = vsub.f32 %v2567_v55, %v2575_v3  ;;  %6323 = vmatpush3.msra.mxu1 %v2669_v2 }
0x163d   :  { %6332 = vmatprep.subr.mxu1 %v6753_v61 }
0x163e   :  { %v2580_v6 = vmul.f32 1.442695, %v2577_v5 }
0x163f   :  { %v2593_v7 = vpop.permute.xlu0 %2592  ;;  %v2747_v12 = vpop.permute.xlu1 %2746 }
0x1640   :  { %6659 = vpow2.f32 %v2580_v6  ;;  %6318 = vmatpush3.msra.mxu0 %v2593_v7 }
0x1641   :  { %6327 = vmatprep.subr.mxu0 %v6753_v61 }
0x1649   :  { %v6658_v8 = vpop.eup %6657 }
0x164a   :  { %v2582_v9 = vsel %vm288_vm4, %v6658_v8, 0.0 }
0x164b   :  { %2583 = vadd.xlane.f32.xlu0 %v2582_v9 }
0x164d   :  { %v6660_v10 = vpop.eup %6659 }
0x164e   :  { %v2585_v11 = vsel %vm288_vm4, %v6660_v10, 0.0 }
0x164f   :  { %2586 = vadd.xlane.f32.xlu1 %v2585_v11 }
0x1660   :  { %2744 = vrot.lane.b32.xlu1 %v7205_v17, %s6762_s12 }
0x1661   :  { %2824 = vrot.lane.b32.xlu0 %v7201_v16, %s6761_s11 }
0x1665   :  { %2822 = vrot.lane.b32.xlu0 %v7201_v16, %s6762_s12 }
0x16d4   :  { %v2584_v63 = vpop.xlane.xlu0 %2583 }
0x16d5   :  { %6661 = vrcp.f32 %v2584_v63 }
0x16d8   :  { %v2587_v18 = vpop.xlane.xlu1 %2586  ;;  %v2825_v20 = vpop.permute.xlu0 %2824 }
0x16d9   :  { %6663 = vrcp.f32 %v2587_v18 }
0x16dc   :  { %v2745_v22 = vpop.permute.xlu1 %2744  ;;  %v2823_v23 = vpop.permute.xlu0 %2822 }
0x16e2   :  { %v6662_v62 = vpop.eup %6661 }
0x16e3   :  { %v2589_v15 = vmul.f32 %v6662_v62, %v6658_v8 }
0x16e5   :  { %6320 = vmatmul.mubr.msk.f32.vlgmr.msra.gmra.mxu0 %vm288_vm4, %v2589_v15 }
0x16e6   :  { %v6664_v19 = vpop.eup %6663  ;;  %6328 = vmatpush3.xpose.msk.msra.mxu0 %vm288_vm4, %v2747_v12  ;;  %6329 = vmatprep.mubr.msk.f32.mxu0 %vm6754_vm3, %v6753_v61 }
0x16e7   :  { %v2591_v21 = vmul.f32 %v6664_v19, %v6660_v10  ;;  %6337 = vmatprep.subr.mxu0 %v6753_v61 }
0x16e9   :  { %6325 = vmatmul.mubr.msk.f32.vlgmr.msra.gmra.mxu1 %vm288_vm4, %v2591_v21  ;;  %6330 = vmatmul.mubr.msk.f32.vlgmr.msra.gmra.mxu0 %vm288_vm4, %v2745_v22 }
0x16ea   :  { %6333 = vmatpush3.xpose.msk.msra.mxu1 %vm288_vm4, %v2825_v20  ;;  %6334 = vmatprep.mubr.msk.f32.mxu1 %vm6754_vm3, %v6753_v61 }
0x16eb   :  { %6342 = vmatprep.subr.mxu1 %v6753_v61  ;;  %6339 = vmatprep.mubr.msk.f32.mxu0 %vm6754_vm3, %v6753_v61 }
0x16ed   :  { %6335 = vmatmul.mubr.msk.f32.vlgmr.msra.gmra.mxu1 %vm288_vm4, %v2823_v23 }
0x16ee   :  { %6344 = vmatprep.mubr.msk.f32.mxu1 %vm6754_vm3, %v6753_v61 }
0x17a5   :  { %v7297_v24 = vpop.f32.mrf.mxu0 }
0x17a7   :  { %v6321_v25 = vpop.f32.mrf.mxu0 }
0x17a9   :  { %v7299_v26 = vpop.f32.mrf.mxu1  ;;  %v2818_v27 = vpop.f32.mrf.mxu0 }
0x17aa   :  { %v2819_v28 = vadd.f32 %v2818_v27, %v6912_v4 }
0x17ab   :  { %v6326_v29 = vpop.f32.mrf.mxu1  ;;  %v6331_v30 = vpop.f32.mrf.mxu0 }
0x17ac   :  { %v2900_v31 = vsel %vm288_vm4, %v2819_v28, -inf }
0x17ad   :  { %2901 = vmax.xlane.f32.xlu1 %v2900_v31  ;;  %v2896_v32 = vpop.f32.mrf.mxu1  ;;  %v5722_v31 = vld [vmem:[%s7811_s1 + $0x118] sm:$0xff] }
0x17ae   :  { %v2897_v33 = vadd.f32 %v2896_v32, %v6912_v4  ;;  %v5721_v32 = vld [vmem:[%s7811_s1 + $0x110] sm:$0xff] }
0x17af   :  { %v6336_v34 = vpop.f32.mrf.mxu1 }
0x17b0   :  { %v2903_v36 = vsel %vm288_vm4, %v2897_v33, -inf }
0x17b1   :  { %2904 = vmax.xlane.f32.xlu0 %v2903_v36 }
0x17be   :  { %2998 = vrot.lane.b32.xlu1 %v7201_v16, %s6763_s13 }
0x17c2   :  { %3076 = vrot.lane.b32.xlu1 %v7205_v17, %s6764_s14 }
0x17c7   :  { %2922 = vrot.lane.b32.xlu0 %v7205_v17, %s6763_s13 }
0x1836   :  { %v2902_v38 = vpop.xlane.xlu1 %2901 }
0x1837   :  { %v2906_v35 = vsub.f32 %v2819_v28, %v2902_v38 }
0x1839   :  { %v2908_v39 = vmul.f32 1.442695, %v2906_v35 }
0x183a   :  { %v2999_v40 = vpop.permute.xlu1 %2998  ;;  %v2905_v41 = vpop.xlane.xlu0 %2904 }
0x183b   :  { %6665 = vpow2.f32 %v2908_v39  ;;  %v2907_v42 = vsub.f32 %v2897_v33, %v2905_v41  ;;  %6343 = vmatpush3.msra.mxu1 %v2999_v40  ;;  %v5720_v33 = vld [vmem:[%s7811_s1 + $0x108] sm:$0xff] }
0x183c   :  { %6352 = vmatprep.subr.mxu1 %v6753_v61 }
0x183d   :  { %v2910_v43 = vmul.f32 1.442695, %v2907_v42 }
0x183e   :  { %v2923_v37 = vpop.permute.xlu0 %2922  ;;  %v3077_v49 = vpop.permute.xlu1 %3076 }
0x183f   :  { %6667 = vpow2.f32 %v2910_v43  ;;  %6338 = vmatpush3.msra.mxu0 %v2923_v37 }
0x1840   :  { %6347 = vmatprep.subr.mxu0 %v6753_v61 }
0x1848   :  { %v6666_v44 = vpop.eup %6665 }
0x1849   :  { %v2912_v45 = vsel %vm288_vm4, %v6666_v44, 0.0 }
0x184a   :  { %2913 = vadd.xlane.f32.xlu0 %v2912_v45 }
0x184c   :  { %v6668_v46 = vpop.eup %6667 }
0x184d   :  { %v2915_v47 = vsel %vm288_vm4, %v6668_v46, 0.0 }
0x184e   :  { %2916 = vadd.xlane.f32.xlu1 %v2915_v47 }
0x185f   :  { %3074 = vrot.lane.b32.xlu1 %v7205_v17, %s6765_s15 }
0x1860   :  { %3154 = vrot.lane.b32.xlu0 %v7201_v16, %s6764_s14 }
0x1864   :  { %3152 = vrot.lane.b32.xlu0 %v7201_v16, %s6765_s15 }
0x18d3   :  { %v2914_v51 = vpop.xlane.xlu0 %2913 }
0x18d4   :  { %6669 = vrcp.f32 %v2914_v51 }
0x18d7   :  { %v2917_v60 = vpop.xlane.xlu1 %2916  ;;  %v3155_v54 = vpop.permute.xlu0 %3154 }
0x18d8   :  { %6671 = vrcp.f32 %v2917_v60 }
0x18db   :  { %v3075_v56 = vpop.permute.xlu1 %3074  ;;  %v3153_v57 = vpop.permute.xlu0 %3152 }
0x18e1   :  { %v6670_v58 = vpop.eup %6669 }
0x18e2   :  { %v2919_v52 = vmul.f32 %v6670_v58, %v6666_v44 }
0x18e4   :  { %6340 = vmatmul.mubr.msk.f32.vlgmr.msra.gmra.mxu0 %vm288_vm4, %v2919_v52 }
0x18e5   :  { %v6672_v53 = vpop.eup %6671  ;;  %6348 = vmatpush3.xpose.msk.msra.mxu0 %vm288_vm4, %v3077_v49  ;;  %6349 = vmatprep.mubr.msk.f32.mxu0 %vm6754_vm3, %v6753_v61 }
0x18e6   :  { %v2921_v55 = vmul.f32 %v6672_v53, %v6668_v46  ;;  %6357 = vmatprep.subr.mxu0 %v6753_v61 }
0x18e8   :  { %6345 = vmatmul.mubr.msk.f32.vlgmr.msra.gmra.mxu1 %vm288_vm4, %v2921_v55  ;;  %6350 = vmatmul.mubr.msk.f32.vlgmr.msra.gmra.mxu0 %vm288_vm4, %v3075_v56 }
0x18e9   :  { %6353 = vmatpush3.xpose.msk.msra.mxu1 %vm288_vm4, %v3155_v54  ;;  %6354 = vmatprep.mubr.msk.f32.mxu1 %vm6754_vm3, %v6753_v61 }
0x18ea   :  { %6362 = vmatprep.subr.mxu1 %v6753_v61  ;;  %6359 = vmatprep.mubr.msk.f32.mxu0 %vm6754_vm3, %v6753_v61 }
0x18ec   :  { %6355 = vmatmul.mubr.msk.f32.vlgmr.msra.gmra.mxu1 %vm288_vm4, %v3153_v57 }
0x18ed   :  { %6364 = vmatprep.mubr.msk.f32.mxu1 %vm6754_vm3, %v6753_v61 }
0x19a4   :  { %v2994_v59 = vpop.f32.mrf.mxu0 }
0x19a6   :  { %v6341_v0 = vpop.f32.mrf.mxu0 }
0x19a8   :  { %v3070_v1 = vpop.f32.mrf.mxu1  ;;  %v3148_v2 = vpop.f32.mrf.mxu0 }
0x19a9   :  { %v3149_v3 = vadd.f32 %v3148_v2, %v6912_v4 }
0x19aa   :  { %v6346_v5 = vpop.f32.mrf.mxu1  ;;  %v6351_v6 = vpop.f32.mrf.mxu0 }
0x19ab   :  { %v3230_v7 = vsel %vm288_vm4, %v3149_v3, -inf }
0x19ac   :  { %3231 = vmax.xlane.f32.xlu1 %v3230_v7  ;;  %v3226_v8 = vpop.f32.mrf.mxu1  ;;  %v5727_v7 = vld [vmem:[%s7811_s1 + $0x140] sm:$0xff] }
0x19ad   :  { %v3227_v9 = vadd.f32 %v3226_v8, %v6912_v4  ;;  %v5726_v8 = vld [vmem:[%s7811_s1 + $0x138] sm:$0xff] }
0x19ae   :  { %v6356_v10 = vpop.f32.mrf.mxu1 }
0x19af   :  { %v3233_v11 = vsel %vm288_vm4, %v3227_v9, -inf  ;;  %v5724_v10 = vld [vmem:[%s7811_s1 + $0x128] sm:$0xff] }
0x19b0   :  { %3234 = vmax.xlane.f32.xlu0 %v3233_v11  ;;  %v5743_v11 = vld [vmem:[%s7811_s1 + $0x1c0] sm:$0xff] }
0x1a35   :  { %v3232_v12 = vpop.xlane.xlu1 %3231 }
0x1a36   :  { %v3236_v63 = vsub.f32 %v3149_v3, %v3232_v12  ;;  %v5742_v12 = vld [vmem:[%s7811_s1 + $0x1b8] sm:$0xff] }
0x1a38   :  { %v3238_v18 = vmul.f32 1.442695, %v3236_v63  ;;  %v5741_v63 = vld [vmem:[%s7811_s1 + $0x1b0] sm:$0xff] }
0x1a39   :  { %v3235_v62 = vpop.xlane.xlu0 %3234 }
0x1a3a   :  { %6673 = vpow2.f32 %v3238_v18  ;;  %v3237_v15 = vsub.f32 %v3227_v9, %v3235_v62  ;;  %v5725_v9 = vld [vmem:[%s7811_s1 + $0x130] sm:$0xff]  ;;  %v5740_v18 = vld [vmem:[%s7811_s1 + $0x1a8] sm:$0xff]  ;;  %v5739_v62 = vld [vmem:[%s7811_s1 + $0x1a0] sm:$0xff] }
0x1a3c   :  { %v3240_v19 = vmul.f32 1.442695, %v3237_v15  ;;  %v5738_v15 = vld [vmem:[%s7811_s1 + $0x198] sm:$0xff] }
0x1a3e   :  { %6675 = vpow2.f32 %v3240_v19  ;;  %v5737_v19 = vld [vmem:[%s7811_s1 + $0x190] sm:$0xff] }
0x1a47   :  { %v6674_v20 = vpop.eup %6673 }
0x1a48   :  { %v3242_v21 = vsel %vm288_vm4, %v6674_v20, 0.0 }
0x1a49   :  { %3243 = vadd.xlane.f32.xlu0 %v3242_v21  ;;  %v5735_v21 = vld [vmem:[%s7811_s1 + $0x180] sm:$0xff] }
0x1a4b   :  { %v6676_v22 = vpop.eup %6675 }
0x1a4c   :  { %v3245_v23 = vsel %vm288_vm4, %v6676_v22, 0.0 }
0x1a4d   :  { %3246 = vadd.xlane.f32.xlu1 %v3245_v23  ;;  %v5733_v23 = vld [vmem:[%s7811_s1 + $0x170] sm:$0xff] }
0x1a5e   :  { %3328 = vrot.lane.b32.xlu1 %v7201_v16, %s6766_s16 }
0x1a5f   :  { %3252 = vrot.lane.b32.xlu0 %v7205_v17, %s6766_s16 }
0x1a62   :  { %3406 = vrot.lane.b32.xlu1 %v7297_v24, %s6767_s17 }
0x1a63   :  { %3408 = vrot.lane.b32.xlu0 %v7299_v26, %s6767_s17  ;;  %v5723_v26 = vld [vmem:[%s7811_s1 + $0x120] sm:$0xff] }
0x1a66   :  { %3414 = vrot.lane.b32.xlu1 %v2994_v59, %s6768_s18 }
0x1a67   :  { %3416 = vrot.lane.b32.xlu0 %v3070_v1, %s6768_s18 }
0x1ad2   :  { %v3244_v25 = vpop.xlane.xlu0 %3243 }
0x1ad3   :  { %6677 = vrcp.f32 %v3244_v25  ;;  %v5732_v25 = vld [vmem:[%s7811_s1 + $0x168] sm:$0xff] }
0x1ad6   :  { %v3247_v27 = vpop.xlane.xlu1 %3246  ;;  %v3253_v28 = vpop.permute.xlu0 %3252 }
0x1ad7   :  { %6679 = vrcp.f32 %v3247_v27  ;;  %6358 = vmatpush3.msra.mxu0 %v3253_v28 }
0x1ad8   :  { %6367 = vmatprep.subr.mxu0 %v5723_v26 }
0x1ada   :  { %v3329_v16 = vpop.permute.xlu1 %3328  ;;  %v3409_v40 = vpop.permute.xlu0 %3408 }
0x1adb   :  { %6363 = vmatpush3.msra.mxu1 %v3329_v16  ;;  %v3429_v46 = vsel %vm288_vm4, %v7259_v50, %v3409_v40  ;;  %v5731_v40 = vld [vmem:[%s7811_s1 + $0x160] sm:$0xff] }
0x1adc   :  { %6378 = vmatprep.subr.mxu1 %v5727_v7 }
0x1ade   :  { %v3407_v39 = vpop.permute.xlu1 %3406  ;;  %v3417_v43 = vpop.permute.xlu0 %3416 }
0x1adf   :  { %v3428_v42 = vsel %vm288_vm4, %v7257_v48, %v3407_v39  ;;  %v3431_v47 = vsel %vm1630_vm7, %v3429_v46, %v3417_v43  ;;  %v5781_v48 = vld [vmem:[%s7811_s1 + $0x1cc] ss:$0 sm:$0xff] }
0x1ae0   :  { %v6678_v29 = vpop.eup %6677  ;;  %v5728_v43 = vld [vmem:[%s7811_s1 + $0x148] sm:$0xff] }
0x1ae1   :  { %v3249_v17 = vmul.f32 %v6678_v29, %v6674_v20  ;;  %v5736_v20 = vld [vmem:[%s7811_s1 + $0x188] sm:$0xff] }
0x1ae2   :  { %v3415_v41 = vpop.permute.xlu1 %3414 }
0x1ae3   :  { %6360 = vmatmul.mubr.msk.f32.vlgmr.msra.gmra.mxu0 %vm288_vm4, %v3249_v17  ;;  %v3430_v37 = vsel %vm1630_vm7, %v3428_v42, %v3415_v41  ;;  %v5730_v41 = vld [vmem:[%s7811_s1 + $0x158] sm:$0xff]  ;;  %v5729_v42 = vld [vmem:[%s7811_s1 + $0x150] sm:$0xff] }
0x1ae4   :  { %v6680_v24 = vpop.eup %6679  ;;  %6368 = vmatpush3.msra.mxu0 %v5723_v26  ;;  %v5782_v26 = vld [vmem:[%s7811_s1 + $0x1ca] ss:$0 sm:$0xff] }
0x1ae5   :  { %v3251_v30 = vmul.f32 %v6680_v24, %v6676_v22  ;;  %6369 = vmatprep.subr.mxu0 %v5722_v31  ;;  %v5734_v22 = vld [vmem:[%s7811_s1 + $0x178] sm:$0xff] }
0x1ae6   :  { %6370 = vmatpush3.msra.mxu0 %v5722_v31 }
0x1ae7   :  { %6365 = vmatmul.mubr.msk.f32.vlgmr.msra.gmra.mxu1 %vm288_vm4, %v3251_v30  ;;  %6371 = vmatprep.subr.mxu0 %v5721_v32 }
0x1ae8   :  { %6372 = vmatpush3.msra.mxu0 %v5721_v32  ;;  %6379 = vmatpush3.msra.mxu1 %v5727_v7  ;;  %v5791_v7 = vld [vmem:[%s7811_s1 + $0x1e8] sm:$0xff] }
0x1ae9   :  { %6373 = vmatprep.subr.mxu0 %v5720_v33  ;;  %6380 = vmatprep.subr.mxu1 %v5726_v8 }
0x1aea   :  { %6374 = vmatpush3.msra.mxu0 %v5720_v33  ;;  %6381 = vmatpush3.msra.mxu1 %v5726_v8  ;;  %v5790_v8 = vld [vmem:[%s7811_s1 + $0x1e0] sm:$0xff] }
0x1aeb   :  { %6382 = vmatprep.subr.mxu1 %v5725_v9  ;;  %6389 = vmatprep.subr.mxu0 %v5743_v11 }
0x1aec   :  { %6383 = vmatpush3.msra.mxu1 %v5725_v9  ;;  %v5789_v9 = vld [vmem:[%s7811_s1 + $0x1d8] sm:$0xff] }
0x1aed   :  { %6384 = vmatprep.subr.mxu1 %v5724_v10 }
0x1aee   :  { %6385 = vmatpush3.msra.mxu1 %v5724_v10  ;;  %v5788_v10 = vld [vmem:[%s7811_s1 + $0x1d0] sm:$0xff] }
0x1aef   :  { %6424 = vmatprep.subr.mxu1 %v5791_v7 }
0x1ba3   :  { %v3324_v34 = vpop.f32.mrf.mxu0 }
0x1ba4   :  { %3422 = vrot.lane.b32.xlu1 %v3324_v34, %s6769_s27 }
0x1ba5   :  { %v6361_v36 = vpop.f32.mrf.mxu0 }
0x1ba6   :  { %v5783_v36 = vld [vmem:[%s7811_s1 + $0x1cb] ss:$0 sm:$0xff] }
0x1ba7   :  { %v3400_v38 = vpop.f32.mrf.mxu1 }
0x1ba8   :  { %3424 = vrot.lane.b32.xlu0 %v3400_v38, %s6769_s27 }
0x1ba9   :  { %v6366_v35 = vpop.f32.mrf.mxu1 }
0x1c16   :  { %v3423_v44 = vpop.permute.xlu1 %3422 }
0x1c17   :  { %v3432_v45 = vsel %vm1633_vm6, %v3430_v37, %v3423_v44  ;;  %v5784_v37 = vld [vmem:[%s7811_s1 + $0x1ce] ss:$0 sm:$0xff] }
0x1c18   :  { %6375 = vmatprep.mubr.msk.f32.mxu0 %vm164_vm2, %v3432_v45 }
0x1c1a   :  { %v3425_v49 = vpop.permute.xlu0 %3424 }
0x1c1b   :  { %v3433_v51 = vsel %vm1633_vm6, %v3431_v47, %v3425_v49 }
0x1c1c   :  { %6376 = vmatmul.mubr.msk.f32.vlgmr.msra.gmra.mxu0 %vm164_vm2, %v3433_v51 }
0x1c1d   :  { %6390 = vmatpush3.msra.mxu0 %v5743_v11 }
0x1c1e   :  { %6391 = vmatprep.subr.mxu0 %v5742_v12 }
0x1c1f   :  { %6392 = vmatpush3.msra.mxu0 %v5742_v12 }
0x1c20   :  { %6393 = vmatprep.subr.mxu0 %v5741_v63 }
0x1c21   :  { %6394 = vmatpush3.msra.mxu0 %v5741_v63 }
0x1c22   :  { %6395 = vmatprep.subr.mxu0 %v5740_v18 }
0x1c23   :  { %6396 = vmatpush3.msra.mxu0 %v5740_v18 }
0x1c24   :  { %6397 = vmatprep.subr.mxu0 %v5739_v62 }
0x1c25   :  { %6398 = vmatpush3.msra.mxu0 %v5739_v62 }
0x1c26   :  { %6399 = vmatprep.subr.mxu0 %v5738_v15 }
0x1c27   :  { %6400 = vmatpush3.msra.mxu0 %v5738_v15 }
0x1c28   :  { %6401 = vmatprep.subr.mxu0 %v5737_v19 }
0x1c29   :  { %6402 = vmatpush3.msra.mxu0 %v5737_v19 }
0x1c2a   :  { %6403 = vmatprep.subr.mxu0 %v5736_v20 }
0x1c2b   :  { %6404 = vmatpush3.msra.mxu0 %v5736_v20  ;;  %v5823_v20 = vld [vmem:[%s7811_s1 + $0x2b0] ss:$0 sm:$0xff] }
0x1c2c   :  { %6405 = vmatprep.subr.mxu0 %v5735_v21 }
0x1c2d   :  { %6406 = vmatpush3.msra.mxu0 %v5735_v21 }
0x1c2e   :  { %6407 = vmatprep.subr.mxu0 %v5734_v22 }
0x1c2f   :  { %6408 = vmatpush3.msra.mxu0 %v5734_v22 }
0x1c30   :  { %6409 = vmatprep.subr.mxu0 %v5733_v23 }
0x1c31   :  { %6410 = vmatpush3.msra.mxu0 %v5733_v23 }
0x1c32   :  { %6411 = vmatprep.subr.mxu0 %v5732_v25 }
0x1c33   :  { %6412 = vmatpush3.msra.mxu0 %v5732_v25 }
0x1c34   :  { %6413 = vmatprep.subr.mxu0 %v5731_v40 }
0x1c35   :  { %6414 = vmatpush3.msra.mxu0 %v5731_v40 }
0x1c36   :  { %6415 = vmatprep.subr.mxu0 %v5730_v41 }
0x1c37   :  { %6416 = vmatpush3.msra.mxu0 %v5730_v41 }
0x1c38   :  { %6417 = vmatprep.subr.mxu0 %v5729_v42 }
0x1c39   :  { %6418 = vmatpush3.msra.mxu0 %v5729_v42 }
0x1c3a   :  { %6419 = vmatprep.subr.mxu0 %v5728_v43 }
0x1c3b   :  { %6420 = vmatpush3.msra.mxu0 %v5728_v43 }
0x1c3c   :  { %6465 = vmatprep.subr.mxu0 %v6753_v61 }
0x1cdc   :  { %v6377_v60 = vpop.f32.mrf.mxu0 }
0x1cdd   :  { %v3516_v58 = vadd.f32 %v6377_v60, %v7193_v14 }
0x1cde   :  { %v3506_v52 = vpop.f32.mrf.mxu0 }
0x1cdf   :  { %v3522_v53 = vadd.f32 %v5781_v48, %v3516_v58  ;;  %v3515_v54 = vadd.f32 %v3506_v52, %v7191_v13 }
0x1ce1   :  { %v3521_v55 = vadd.f32 %v5781_v48, %v3515_v54  ;;  %v3526_v50 = vsel %vm164_vm2, %v3522_v53, 0.0  ;;  %v5787_v48 = vld [vmem:[%s7811_s1 + $0x1cd] ss:$0 sm:$0xff] }
0x1ce2   :  { %3527 = vadd.xlane.f32.xlu0 %v3526_v50 }
0x1ce3   :  { %v3523_v56 = vsel %vm164_vm2, %v3521_v55, 0.0 }
0x1ce4   :  { %3524 = vadd.xlane.f32.xlu1 %v3523_v56 }
0x1d6b   :  { %v3528_v57 = vpop.xlane.xlu0 %3527 }
0x1d6c   :  { %v3530_v59 = vmul.f32 0.03125, %v3528_v57 }
0x1d6d   :  { %v3525_v0 = vpop.xlane.xlu1 %3524 }
0x1d6e   :  { %v7386_v1 = vsub.f32 %v3522_v53, %v3530_v59  ;;  %v3529_v2 = vmul.f32 0.03125, %v3525_v0 }
0x1d70   :  { %v7388_v3 = vsub.f32 %v3521_v55, %v3529_v2  ;;  %v3534_v14 = vmul.f32 %v7386_v1, %v7386_v1 }
0x1d72   :  { %v3538_v13 = vsel %vm164_vm2, %v3534_v14, 0.0  ;;  %v3533_v5 = vmul.f32 %v7388_v3, %v7388_v3 }
0x1d73   :  { %3539 = vadd.xlane.f32.xlu1 %v3538_v13 }
0x1d74   :  { %v3535_v6 = vsel %vm164_vm2, %v3533_v5, 0.0 }
0x1d75   :  { %3536 = vadd.xlane.f32.xlu0 %v3535_v6 }
0x1dfc   :  { %v3540_v27 = vpop.xlane.xlu1 %3539 }
0x1dfd   :  { %v3542_v28 = vmul.f32 0.03125, %v3540_v27  ;;  %v5824_v27 = vld [vmem:[%s7811_s1 + $0x2b1] ss:$0 sm:$0xff] }
0x1dfe   :  { %v3537_v16 = vpop.xlane.xlu0 %3536 }
0x1dff   :  { %v3544_v29 = vadd.f32 1e-05, %v3542_v28  ;;  %v3541_v17 = vmul.f32 0.03125, %v3537_v16 }
0x1e01   :  { %6681 = vrsqrt.f32 %v3544_v29  ;;  %v3543_v24 = vadd.f32 1e-05, %v3541_v17 }
0x1e03   :  { %6683 = vrsqrt.f32 %v3543_v24 }
0x1e0e   :  { %v6682_v30 = vpop.eup %6681 }
0x1e0f   :  { %v3548_v31 = vmul.f32 %v6682_v30, %v7386_v1 }
0x1e10   :  { %v6684_v32 = vpop.eup %6683 }
0x1e11   :  { %v3547_v33 = vmul.f32 %v6684_v32, %v7388_v3  ;;  %v3554_v34 = vmul.f32 %v5782_v26, %v3548_v31 }
0x1e13   :  { %v3553_v38 = vmul.f32 %v5782_v26, %v3547_v33  ;;  %v3560_v39 = vadd.f32 %v5783_v36, %v3554_v34 }
0x1e15   :  { %v3559_v35 = vadd.f32 %v5783_v36, %v3553_v38 }
0x1e17   :  { %6386 = vmatprep.mubr.msk.f32.mxu1 %vm164_vm2, %v3559_v35 }
0x1e18   :  { %6387 = vmatmul.mubr.msk.f32.vlgmr.msra.gmra.mxu1 %vm164_vm2, %v3560_v39 }
0x1e19   :  { %6425 = vmatpush3.msra.mxu1 %v5791_v7 }
0x1e1a   :  { %6426 = vmatprep.subr.mxu1 %v5790_v8 }
0x1e1b   :  { %6427 = vmatpush3.msra.mxu1 %v5790_v8 }
0x1e1c   :  { %6428 = vmatprep.subr.mxu1 %v5789_v9 }
0x1e1d   :  { %6429 = vmatpush3.msra.mxu1 %v5789_v9 }
0x1e1e   :  { %6430 = vmatprep.subr.mxu1 %v5788_v10 }
0x1e1f   :  { %6431 = vmatpush3.msra.mxu1 %v5788_v10 }
0x1e20   :  { %6435 = vmatprep.subr.mxu1 %v6753_v61 }
0x1ed8   :  { %v6388_v44 = vpop.f32.mrf.mxu1 }
0x1ed9   :  { %v3643_v45 = vadd.f32 %v6388_v44, %v5784_v37 }
0x1eda   :  { %v3637_v46 = vpop.f32.mrf.mxu1 }
0x1edb   :  { %v3638_v47 = vadd.f32 %v5784_v37, %v3637_v46  ;;  %v3647_v51 = vmax.f32 %v3643_v45, 0.0 }
0x1edd   :  { %v3646_v49 = vmax.f32 %v3638_v47, 0.0 }
0x1edf   :  { %6421 = vmatprep.mubr.f32.mxu0 %v3646_v49 }
0x1ee0   :  { %6422 = vmatmul.mubr.f32.vlgmr.msra.gmra.mxu0 %v3647_v51 }
0x1ee1   :  { %6467 = vmatprep.mubr.msk.f32.mxu0 %vm6754_vm3, %v6753_v61 }
0x1fa0   :  { %v6423_v60 = vpop.f32.mrf.mxu0 }
0x1fa1   :  { %v3724_v58 = vadd.f32 %v6423_v60, %v5787_v48 }
0x1fa2   :  { %v3718_v52 = vpop.f32.mrf.mxu0 }
0x1fa3   :  { %v3728_v53 = vadd.f32 %v3724_v58, %v3560_v39  ;;  %v3719_v54 = vadd.f32 %v5787_v48, %v3718_v52 }
0x1fa5   :  { %v3727_v55 = vadd.f32 %v3719_v54, %v3559_v35  ;;  %v3768_v50 = vsel %vm164_vm2, %v3728_v53, 0.0 }
0x1fa6   :  { %3769 = vadd.xlane.f32.xlu1 %v3768_v50 }
0x1fa7   :  { %v3765_v56 = vsel %vm164_vm2, %v3727_v55, 0.0 }
0x1fa8   :  { %3766 = vadd.xlane.f32.xlu0 %v3765_v56 }
0x202f   :  { %v3770_v57 = vpop.xlane.xlu1 %3769 }
0x2030   :  { %v3772_v59 = vmul.f32 0.03125, %v3770_v57 }
0x2031   :  { %v3767_v0 = vpop.xlane.xlu0 %3766 }
0x2032   :  { %v3774_v1 = vsub.f32 %v3728_v53, %v3772_v59  ;;  %v3771_v2 = vmul.f32 0.03125, %v3767_v0 }
0x2034   :  { %v3773_v3 = vsub.f32 %v3727_v55, %v3771_v2  ;;  %v3776_v14 = vmul.f32 %v3774_v1, %v3774_v1 }
0x2036   :  { %v3780_v13 = vsel %vm164_vm2, %v3776_v14, 0.0  ;;  %v3775_v5 = vmul.f32 %v3773_v3, %v3773_v3 }
0x2037   :  { %3781 = vadd.xlane.f32.xlu1 %v3780_v13 }
0x2038   :  { %v3777_v6 = vsel %vm164_vm2, %v3775_v5, 0.0 }
0x2039   :  { %3778 = vadd.xlane.f32.xlu0 %v3777_v6 }
0x20c0   :  { %v3782_v11 = vpop.xlane.xlu1 %3781 }
0x20c1   :  { %v3784_v12 = vmul.f32 0.03125, %v3782_v11 }
0x20c2   :  { %v3779_v63 = vpop.xlane.xlu0 %3778 }
0x20c3   :  { %v3786_v18 = vadd.f32 1e-05, %v3784_v12  ;;  %v3783_v62 = vmul.f32 0.03125, %v3779_v63 }
0x20c5   :  { %6685 = vrsqrt.f32 %v3786_v18  ;;  %v3785_v15 = vadd.f32 1e-05, %v3783_v62 }
0x20c7   :  { %6687 = vrsqrt.f32 %v3785_v15 }
0x20d2   :  { %v6686_v19 = vpop.eup %6685 }
0x20d3   :  { %v3790_v21 = vmul.f32 %v6686_v19, %v3774_v1 }
0x20d4   :  { %v6688_v22 = vpop.eup %6687 }
0x20d5   :  { %v3789_v23 = vmul.f32 %v6688_v22, %v3773_v3  ;;  %v3796_v25 = vmul.f32 %v5823_v20, %v3790_v21 }
0x20d7   :  { %v3795_v28 = vmul.f32 %v5823_v20, %v3789_v23  ;;  %v7500_v29 = vadd.f32 %v5824_v27, %v3796_v25 }
0x20d9   :  { %v7498_v16 = vadd.f32 %v5824_v27, %v3795_v28 }
0x20db   :  { %6432 = vmatprep.mubr.msk.f32.mxu1 %vm164_vm2, %v7498_v16 }
0x20dc   :  { %6433 = vmatmul.mubr.msk.f32.vlgmr.msra.gmra.mxu1 %vm164_vm2, %v7500_v29 }
0x20dd   :  { %6437 = vmatprep.mubr.msk.f32.mxu1 %vm6754_vm3, %v6753_v61 }
0x219c   :  { %v7508_v17 = vpop.f32.mrf.mxu1 }
0x219d   :  { %3962 = vrot.lane.b32.xlu1 %v7508_v17, %s6755_s6 }
0x219e   :  { %v7512_v24 = vpop.f32.mrf.mxu1 }
0x219f   :  { %3885 = vrot.lane.b32.xlu0 %v7512_v24, %s6755_s6 }
0x220f   :  { %v3963_v26 = vpop.permute.xlu1 %3962 }
0x2211   :  { %v3886_v30 = vpop.permute.xlu0 %3885 }
0x2212   :  { %6436 = vmatpush3.xpose.msk.msra.mxu1 %vm288_vm4, %v3886_v30 }
0x2213   :  { %6440 = vmatprep.subr.mxu1 %v6753_v61 }
0x2215   :  { %6438 = vmatmul.mubr.msk.f32.vlgmr.msra.gmra.mxu1 %vm288_vm4, %v7512_v24 }
0x2216   :  { %6441 = vmatpush3.xpose.msk.msra.mxu1 %vm288_vm4, %v3963_v26  ;;  %6442 = vmatprep.mubr.msk.f32.mxu1 %vm6754_vm3, %v6753_v61 }
0x2217   :  { %6445 = vmatprep.subr.mxu1 %v6753_v61 }
0x2219   :  { %6443 = vmatmul.mubr.msk.f32.vlgmr.msra.gmra.mxu1 %vm288_vm4, %v7508_v17 }
0x221a   :  { %6447 = vmatprep.mubr.msk.f32.mxu1 %vm6754_vm3, %v6753_v61 }
0x22d5   :  { %v3957_v31 = vpop.f32.mrf.mxu1 }
0x22d6   :  { %v3958_v32 = vadd.f32 %v3957_v31, %v6912_v4 }
0x22d7   :  { %v6439_v33 = vpop.f32.mrf.mxu1 }
0x22d8   :  { %v4038_v34 = vsel %vm288_vm4, %v3958_v32, -inf }
0x22d9   :  { %4039 = vmax.xlane.f32.xlu1 %v4038_v34  ;;  %v4034_v36 = vpop.f32.mrf.mxu1 }
0x22da   :  { %v4035_v38 = vadd.f32 %v4034_v36, %v6912_v4 }
0x22db   :  { %v6444_v35 = vpop.f32.mrf.mxu1 }
0x22dc   :  { %v4041_v39 = vsel %vm288_vm4, %v4035_v38, -inf }
0x22dd   :  { %4042 = vmax.xlane.f32.xlu0 %v4041_v39 }
0x22ea   :  { %4136 = vrot.lane.b32.xlu1 %v7508_v17, %s6757_s7 }
0x22ee   :  { %4214 = vrot.lane.b32.xlu1 %v7512_v24, %s6758_s8 }
0x2362   :  { %v4040_v40 = vpop.xlane.xlu1 %4039 }
0x2363   :  { %v4044_v41 = vsub.f32 %v3958_v32, %v4040_v40 }
0x2365   :  { %v4046_v42 = vmul.f32 1.442695, %v4044_v41 }
0x2366   :  { %v4043_v43 = vpop.xlane.xlu0 %4042  ;;  %v4137_v51 = vpop.permute.xlu1 %4136 }
0x2367   :  { %6689 = vpow2.f32 %v4046_v42  ;;  %v4045_v37 = vsub.f32 %v4035_v38, %v4043_v43 }
0x2369   :  { %v4048_v44 = vmul.f32 1.442695, %v4045_v37 }
0x236a   :  { %v4215_v48 = vpop.permute.xlu1 %4214 }
0x236b   :  { %6691 = vpow2.f32 %v4048_v44 }
0x2374   :  { %v6690_v45 = vpop.eup %6689 }
0x2375   :  { %v4050_v46 = vsel %vm288_vm4, %v6690_v45, 0.0 }
0x2376   :  { %4051 = vadd.xlane.f32.xlu0 %v4050_v46 }
0x2378   :  { %v6692_v47 = vpop.eup %6691 }
0x2379   :  { %v4053_v49 = vsel %vm288_vm4, %v6692_v47, 0.0 }
0x237a   :  { %4054 = vadd.xlane.f32.xlu1 %v4053_v49 }
0x238b   :  { %4292 = vrot.lane.b32.xlu1 %v7508_v17, %s6758_s8 }
0x238c   :  { %4060 = vrot.lane.b32.xlu0 %v7512_v24, %s6757_s7 }
0x2390   :  { %4212 = vrot.lane.b32.xlu0 %v7512_v24, %s6759_s9 }
0x2394   :  { %4290 = vrot.lane.b32.xlu0 %v7508_v17, %s6759_s9 }
0x23ff   :  { %v4052_v60 = vpop.xlane.xlu0 %4051 }
0x2400   :  { %6693 = vrcp.f32 %v4052_v60 }
0x2403   :  { %v4055_v58 = vpop.xlane.xlu1 %4054  ;;  %v4061_v52 = vpop.permute.xlu0 %4060 }
0x2404   :  { %6695 = vrcp.f32 %v4055_v58  ;;  %6446 = vmatpush3.msra.mxu1 %v4061_v52 }
0x2405   :  { %6450 = vmatprep.subr.mxu1 %v6753_v61 }
0x2407   :  { %v4213_v56 = vpop.permute.xlu0 %4212  ;;  %v4293_v57 = vpop.permute.xlu1 %4292 }
0x240b   :  { %v4291_v59 = vpop.permute.xlu0 %4290 }
0x240d   :  { %v6694_v53 = vpop.eup %6693 }
0x240e   :  { %v4057_v54 = vmul.f32 %v6694_v53, %v6690_v45 }
0x2410   :  { %6448 = vmatmul.mubr.msk.f32.vlgmr.msra.gmra.mxu1 %vm288_vm4, %v4057_v54 }
0x2411   :  { %v6696_v55 = vpop.eup %6695  ;;  %6451 = vmatpush3.msra.mxu1 %v4137_v51  ;;  %6452 = vmatprep.mubr.msk.f32.mxu1 %vm6754_vm3, %v6753_v61 }
0x2412   :  { %6455 = vmatprep.subr.mxu1 %v6753_v61  ;;  %v4059_v50 = vmul.f32 %v6696_v55, %v6692_v47 }
0x2414   :  { %6453 = vmatmul.mubr.msk.f32.vlgmr.msra.gmra.mxu1 %vm288_vm4, %v4059_v50 }
0x2415   :  { %6456 = vmatpush3.xpose.msk.msra.mxu1 %vm288_vm4, %v4215_v48  ;;  %6457 = vmatprep.mubr.msk.f32.mxu1 %vm6754_vm3, %v6753_v61 }
0x2416   :  { %6460 = vmatprep.subr.mxu1 %v6753_v61 }
0x2418   :  { %6458 = vmatmul.mubr.msk.f32.vlgmr.msra.gmra.mxu1 %vm288_vm4, %v4213_v56 }
0x2419   :  { %6461 = vmatpush3.xpose.msk.msra.mxu1 %vm288_vm4, %v4293_v57  ;;  %6462 = vmatprep.mubr.msk.f32.mxu1 %vm6754_vm3, %v6753_v61 }
0x241a   :  { %6470 = vmatprep.subr.mxu1 %v6753_v61 }
0x241c   :  { %6463 = vmatmul.mubr.msk.f32.vlgmr.msra.gmra.mxu1 %vm288_vm4, %v4291_v59 }
0x241d   :  { %6472 = vmatprep.mubr.msk.f32.mxu1 %vm6754_vm3, %v6753_v61 }
0x24d0   :  { %v7564_v0 = vpop.f32.mrf.mxu1 }
0x24d2   :  { %v6449_v1 = vpop.f32.mrf.mxu1 }
0x24d4   :  { %v7566_v2 = vpop.f32.mrf.mxu1 }
0x24d6   :  { %v6454_v3 = vpop.f32.mrf.mxu1 }
0x24d8   :  { %v4286_v14 = vpop.f32.mrf.mxu1 }
0x24d9   :  { %v4287_v13 = vadd.f32 %v4286_v14, %v6912_v4 }
0x24da   :  { %v6459_v5 = vpop.f32.mrf.mxu1 }
0x24db   :  { %v4368_v6 = vsel %vm288_vm4, %v4287_v13, -inf }
0x24dc   :  { %4369 = vmax.xlane.f32.xlu1 %v4368_v6  ;;  %v4364_v7 = vpop.f32.mrf.mxu1 }
0x24dd   :  { %v4365_v8 = vadd.f32 %v4364_v7, %v6912_v4 }
0x24de   :  { %v6464_v9 = vpop.f32.mrf.mxu1 }
0x24df   :  { %v4371_v10 = vsel %vm288_vm4, %v4365_v8, -inf }
0x24e0   :  { %4372 = vmax.xlane.f32.xlu0 %v4371_v10 }
0x24ed   :  { %4466 = vrot.lane.b32.xlu1 %v7508_v17, %s6760_s10 }
0x24f1   :  { %4544 = vrot.lane.b32.xlu1 %v7512_v24, %s6761_s11 }
0x24f6   :  { %4390 = vrot.lane.b32.xlu0 %v7512_v24, %s6760_s10 }
0x2565   :  { %v4370_v11 = vpop.xlane.xlu1 %4369 }
0x2566   :  { %v4374_v12 = vsub.f32 %v4287_v13, %v4370_v11 }
0x2568   :  { %v4376_v63 = vmul.f32 1.442695, %v4374_v12 }
0x2569   :  { %v4467_v18 = vpop.permute.xlu1 %4466  ;;  %v4373_v62 = vpop.xlane.xlu0 %4372 }
0x256a   :  { %6697 = vpow2.f32 %v4376_v63  ;;  %v4375_v15 = vsub.f32 %v4365_v8, %v4373_v62  ;;  %6471 = vmatpush3.msra.mxu1 %v4467_v18 }
0x256b   :  { %6480 = vmatprep.subr.mxu1 %v6753_v61 }
0x256c   :  { %v4378_v19 = vmul.f32 1.442695, %v4375_v15 }
0x256d   :  { %v4391_v20 = vpop.permute.xlu0 %4390  ;;  %v4545_v27 = vpop.permute.xlu1 %4544 }
0x256e   :  { %6699 = vpow2.f32 %v4378_v19  ;;  %6466 = vmatpush3.msra.mxu0 %v4391_v20 }
0x256f   :  { %6475 = vmatprep.subr.mxu0 %v6753_v61 }
0x2577   :  { %v6698_v21 = vpop.eup %6697 }
0x2578   :  { %v4380_v22 = vsel %vm288_vm4, %v6698_v21, 0.0 }
0x2579   :  { %4381 = vadd.xlane.f32.xlu0 %v4380_v22 }
0x257b   :  { %v6700_v23 = vpop.eup %6699 }
0x257c   :  { %v4383_v25 = vsel %vm288_vm4, %v6700_v23, 0.0 }
0x257d   :  { %4384 = vadd.xlane.f32.xlu1 %v4383_v25 }
0x258e   :  { %4542 = vrot.lane.b32.xlu1 %v7512_v24, %s6762_s12 }
0x258f   :  { %4622 = vrot.lane.b32.xlu0 %v7508_v17, %s6761_s11 }
0x2593   :  { %4620 = vrot.lane.b32.xlu0 %v7508_v17, %s6762_s12 }
0x2602   :  { %v4382_v28 = vpop.xlane.xlu0 %4381 }
0x2603   :  { %6701 = vrcp.f32 %v4382_v28 }
0x2606   :  { %v4385_v30 = vpop.xlane.xlu1 %4384  ;;  %v4623_v33 = vpop.permute.xlu0 %4622 }
0x2607   :  { %6703 = vrcp.f32 %v4385_v30 }
0x260a   :  { %v4543_v36 = vpop.permute.xlu1 %4542  ;;  %v4621_v38 = vpop.permute.xlu0 %4620 }
0x2610   :  { %v6702_v26 = vpop.eup %6701 }
0x2611   :  { %v4387_v31 = vmul.f32 %v6702_v26, %v6698_v21 }
0x2613   :  { %6468 = vmatmul.mubr.msk.f32.vlgmr.msra.gmra.mxu0 %vm288_vm4, %v4387_v31 }
0x2614   :  { %v6704_v32 = vpop.eup %6703  ;;  %6476 = vmatpush3.xpose.msk.msra.mxu0 %vm288_vm4, %v4545_v27  ;;  %6477 = vmatprep.mubr.msk.f32.mxu0 %vm6754_vm3, %v6753_v61 }
0x2615   :  { %v4389_v34 = vmul.f32 %v6704_v32, %v6700_v23  ;;  %6485 = vmatprep.subr.mxu0 %v6753_v61 }
0x2617   :  { %6473 = vmatmul.mubr.msk.f32.vlgmr.msra.gmra.mxu1 %vm288_vm4, %v4389_v34  ;;  %6478 = vmatmul.mubr.msk.f32.vlgmr.msra.gmra.mxu0 %vm288_vm4, %v4543_v36 }
0x2618   :  { %6481 = vmatpush3.xpose.msk.msra.mxu1 %vm288_vm4, %v4623_v33  ;;  %6482 = vmatprep.mubr.msk.f32.mxu1 %vm6754_vm3, %v6753_v61 }
0x2619   :  { %6490 = vmatprep.subr.mxu1 %v6753_v61  ;;  %6487 = vmatprep.mubr.msk.f32.mxu0 %vm6754_vm3, %v6753_v61 }
0x261b   :  { %6483 = vmatmul.mubr.msk.f32.vlgmr.msra.gmra.mxu1 %vm288_vm4, %v4621_v38 }
0x261c   :  { %6492 = vmatprep.mubr.msk.f32.mxu1 %vm6754_vm3, %v6753_v61 }
0x26d3   :  { %v7604_v35 = vpop.f32.mrf.mxu0 }
0x26d5   :  { %v6469_v39 = vpop.f32.mrf.mxu0 }
0x26d7   :  { %v7606_v40 = vpop.f32.mrf.mxu1  ;;  %v4616_v41 = vpop.f32.mrf.mxu0 }
0x26d8   :  { %v4617_v42 = vadd.f32 %v4616_v41, %v6912_v4 }
0x26d9   :  { %v6474_v43 = vpop.f32.mrf.mxu1  ;;  %v6479_v37 = vpop.f32.mrf.mxu0 }
0x26da   :  { %v4698_v44 = vsel %vm288_vm4, %v4617_v42, -inf  ;;  %v5794_v43 = vld [vmem:[%s7811_s1 + $0x200] sm:$0xff]  ;;  %v5793_v37 = vld [vmem:[%s7811_s1 + $0x1f8] sm:$0xff] }
0x26db   :  { %4699 = vmax.xlane.f32.xlu1 %v4698_v44  ;;  %v4694_v45 = vpop.f32.mrf.mxu1  ;;  %v5792_v44 = vld [vmem:[%s7811_s1 + $0x1f0] sm:$0xff] }
0x26dc   :  { %v4695_v46 = vadd.f32 %v4694_v45, %v6912_v4 }
0x26dd   :  { %v6484_v47 = vpop.f32.mrf.mxu1 }
0x26de   :  { %v4701_v49 = vsel %vm288_vm4, %v4695_v46, -inf }
0x26df   :  { %4702 = vmax.xlane.f32.xlu0 %v4701_v49 }
0x26ec   :  { %4796 = vrot.lane.b32.xlu1 %v7508_v17, %s6763_s13 }
0x26f0   :  { %4874 = vrot.lane.b32.xlu1 %v7512_v24, %s6764_s14 }
0x26f5   :  { %4720 = vrot.lane.b32.xlu0 %v7512_v24, %s6763_s13 }
0x2764   :  { %v4700_v51 = vpop.xlane.xlu1 %4699 }
0x2765   :  { %v4704_v48 = vsub.f32 %v4617_v42, %v4700_v51 }
0x2767   :  { %v4706_v60 = vmul.f32 1.442695, %v4704_v48 }
0x2768   :  { %v4797_v58 = vpop.permute.xlu1 %4796  ;;  %v4703_v52 = vpop.xlane.xlu0 %4702 }
0x2769   :  { %6705 = vpow2.f32 %v4706_v60  ;;  %v4705_v53 = vsub.f32 %v4695_v46, %v4703_v52  ;;  %6491 = vmatpush3.msra.mxu1 %v4797_v58 }
0x276a   :  { %6500 = vmatprep.subr.mxu1 %v6753_v61 }
0x276b   :  { %v4708_v54 = vmul.f32 1.442695, %v4705_v53 }
0x276c   :  { %v4721_v55 = vpop.permute.xlu0 %4720  ;;  %v4875_v1 = vpop.permute.xlu1 %4874 }
0x276d   :  { %6707 = vpow2.f32 %v4708_v54  ;;  %6486 = vmatpush3.msra.mxu0 %v4721_v55 }
0x276e   :  { %6495 = vmatprep.subr.mxu0 %v6753_v61 }
0x2776   :  { %v6706_v50 = vpop.eup %6705 }
0x2777   :  { %v4710_v56 = vsel %vm288_vm4, %v6706_v50, 0.0 }
0x2778   :  { %4711 = vadd.xlane.f32.xlu0 %v4710_v56 }
0x277a   :  { %v6708_v57 = vpop.eup %6707 }
0x277b   :  { %v4713_v59 = vsel %vm288_vm4, %v6708_v57, 0.0 }
0x277c   :  { %4714 = vadd.xlane.f32.xlu1 %v4713_v59 }
0x278d   :  { %4872 = vrot.lane.b32.xlu1 %v7512_v24, %s6765_s15 }
0x278e   :  { %4952 = vrot.lane.b32.xlu0 %v7508_v17, %s6764_s14 }
0x2792   :  { %4950 = vrot.lane.b32.xlu0 %v7508_v17, %s6765_s15 }
0x2801   :  { %v4712_v3 = vpop.xlane.xlu0 %4711 }
0x2802   :  { %6709 = vrcp.f32 %v4712_v3 }
0x2805   :  { %v4715_v14 = vpop.xlane.xlu1 %4714  ;;  %v4953_v7 = vpop.permute.xlu0 %4952 }
0x2806   :  { %6711 = vrcp.f32 %v4715_v14 }
0x2809   :  { %v4873_v9 = vpop.permute.xlu1 %4872  ;;  %v4951_v10 = vpop.permute.xlu0 %4950 }
0x280f   :  { %v6710_v13 = vpop.eup %6709 }
0x2810   :  { %v4717_v5 = vmul.f32 %v6710_v13, %v6706_v50 }
0x2812   :  { %6488 = vmatmul.mubr.msk.f32.vlgmr.msra.gmra.mxu0 %vm288_vm4, %v4717_v5 }
0x2813   :  { %v6712_v6 = vpop.eup %6711  ;;  %6496 = vmatpush3.xpose.msk.msra.mxu0 %vm288_vm4, %v4875_v1  ;;  %6497 = vmatprep.mubr.msk.f32.mxu0 %vm6754_vm3, %v6753_v61 }
0x2814   :  { %v4719_v8 = vmul.f32 %v6712_v6, %v6708_v57  ;;  %6505 = vmatprep.subr.mxu0 %v6753_v61 }
0x2816   :  { %6493 = vmatmul.mubr.msk.f32.vlgmr.msra.gmra.mxu1 %vm288_vm4, %v4719_v8  ;;  %6498 = vmatmul.mubr.msk.f32.vlgmr.msra.gmra.mxu0 %vm288_vm4, %v4873_v9 }
0x2817   :  { %6501 = vmatpush3.xpose.msk.msra.mxu1 %vm288_vm4, %v4953_v7  ;;  %6502 = vmatprep.mubr.msk.f32.mxu1 %vm6754_vm3, %v6753_v61 }
0x2818   :  { %6510 = vmatprep.subr.mxu1 %v6753_v61  ;;  %6507 = vmatprep.mubr.msk.f32.mxu0 %vm6754_vm3, %v6753_v61 }
0x281a   :  { %6503 = vmatmul.mubr.msk.f32.vlgmr.msra.gmra.mxu1 %vm288_vm4, %v4951_v10 }
0x281b   :  { %6512 = vmatprep.mubr.msk.f32.mxu1 %vm6754_vm3, %v6753_v61 }
0x28d2   :  { %v4792_v11 = vpop.f32.mrf.mxu0 }
0x28d4   :  { %v6489_v12 = vpop.f32.mrf.mxu0 }
0x28d6   :  { %v4868_v63 = vpop.f32.mrf.mxu1  ;;  %v4946_v18 = vpop.f32.mrf.mxu0 }
0x28d7   :  { %v4947_v62 = vadd.f32 %v4946_v18, %v6912_v4 }
0x28d8   :  { %v6494_v15 = vpop.f32.mrf.mxu1  ;;  %v6499_v19 = vpop.f32.mrf.mxu0 }
0x28d9   :  { %v5028_v20 = vsel %vm288_vm4, %v4947_v62, -inf  ;;  %v5799_v15 = vld [vmem:[%s7811_s1 + $0x228] sm:$0xff]  ;;  %v5798_v19 = vld [vmem:[%s7811_s1 + $0x220] sm:$0xff] }
0x28da   :  { %5029 = vmax.xlane.f32.xlu1 %v5028_v20  ;;  %v5024_v21 = vpop.f32.mrf.mxu1  ;;  %v5797_v20 = vld [vmem:[%s7811_s1 + $0x218] sm:$0xff] }
0x28db   :  { %v5025_v22 = vadd.f32 %v5024_v21, %v6912_v4  ;;  %v5796_v21 = vld [vmem:[%s7811_s1 + $0x210] sm:$0xff] }
0x28dc   :  { %v6504_v23 = vpop.f32.mrf.mxu1 }
0x28dd   :  { %v5031_v25 = vsel %vm288_vm4, %v5025_v22, -inf  ;;  %v5814_v23 = vld [vmem:[%s7811_s1 + $0x2a0] sm:$0xff] }
0x28de   :  { %5032 = vmax.xlane.f32.xlu0 %v5031_v25  ;;  %v5813_v25 = vld [vmem:[%s7811_s1 + $0x298] sm:$0xff] }
0x2963   :  { %v5030_v27 = vpop.xlane.xlu1 %5029 }
0x2964   :  { %v5034_v61 = vsub.f32 %v4947_v62, %v5030_v27  ;;  %v5812_v27 = vld [vmem:[%s7811_s1 + $0x290] sm:$0xff] }
0x2966   :  { %v5036_v28 = vmul.f32 1.442695, %v5034_v61  ;;  %v5811_v61 = vld [vmem:[%s7811_s1 + $0x288] sm:$0xff] }
0x2967   :  { %v5033_v30 = vpop.xlane.xlu0 %5032 }
0x2968   :  { %6713 = vpow2.f32 %v5036_v28  ;;  %v5035_v26 = vsub.f32 %v5025_v22, %v5033_v30  ;;  %v5815_v22 = vld [vmem:[%s7811_s1 + $0x2a8] sm:$0xff]  ;;  %v5810_v28 = vld [vmem:[%s7811_s1 + $0x280] sm:$0xff]  ;;  %v5809_v30 = vld [vmem:[%s7811_s1 + $0x278] sm:$0xff] }
0x296a   :  { %v5038_v31 = vmul.f32 1.442695, %v5035_v26  ;;  %v5808_v26 = vld [vmem:[%s7811_s1 + $0x270] sm:$0xff] }
0x296c   :  { %6715 = vpow2.f32 %v5038_v31  ;;  %v5807_v31 = vld [vmem:[%s7811_s1 + $0x268] sm:$0xff] }
0x2975   :  { %v6714_v32 = vpop.eup %6713 }
0x2976   :  { %v5040_v33 = vsel %vm288_vm4, %v6714_v32, 0.0 }
0x2977   :  { %5041 = vadd.xlane.f32.xlu0 %v5040_v33  ;;  %v5805_v33 = vld [vmem:[%s7811_s1 + $0x258] sm:$0xff] }
0x2979   :  { %v6716_v34 = vpop.eup %6715 }
0x297a   :  { %v5043_v36 = vsel %vm288_vm4, %v6716_v34, 0.0 }
0x297b   :  { %5044 = vadd.xlane.f32.xlu1 %v5043_v36 }
0x298c   :  { %5126 = vrot.lane.b32.xlu1 %v7508_v17, %s6766_s16 }
0x298d   :  { %5050 = vrot.lane.b32.xlu0 %v7512_v24, %s6766_s16 }
0x2990   :  { %5204 = vrot.lane.b32.xlu1 %v7604_v35, %s6767_s17 }
0x2991   :  { %5206 = vrot.lane.b32.xlu0 %v7606_v40, %s6767_s17  ;;  %v5795_v40 = vld [vmem:[%s7811_s1 + $0x208] sm:$0xff] }
0x2994   :  { %5212 = vrot.lane.b32.xlu1 %v4792_v11, %s6768_s18 }
0x2995   :  { %5214 = vrot.lane.b32.xlu0 %v4868_v63, %s6768_s18 }
0x2a00   :  { %v5042_v4 = vpop.xlane.xlu0 %5041 }
0x2a01   :  { %6717 = vrcp.f32 %v5042_v4 }
0x2a04   :  { %v5045_v38 = vpop.xlane.xlu1 %5044  ;;  %v5051_v39 = vpop.permute.xlu0 %5050 }
0x2a05   :  { %6719 = vrcp.f32 %v5045_v38  ;;  %6506 = vmatpush3.msra.mxu0 %v5051_v39 }
0x2a06   :  { %6515 = vmatprep.subr.mxu0 %v5795_v40 }
0x2a08   :  { %v5127_v17 = vpop.permute.xlu1 %5126  ;;  %v5207_v48 = vpop.permute.xlu0 %5206 }
0x2a09   :  { %6511 = vmatpush3.msra.mxu1 %v5127_v17  ;;  %v5227_v50 = vsel %vm288_vm4, %v7566_v2, %v5207_v48  ;;  %v5801_v48 = vld [vmem:[%s7811_s1 + $0x238] sm:$0xff] }
0x2a0a   :  { %6526 = vmatprep.subr.mxu1 %v5799_v15 }
0x2a0c   :  { %v5205_v51 = vpop.permute.xlu1 %5204  ;;  %v5215_v52 = vpop.permute.xlu0 %5214 }
0x2a0d   :  { %v5226_v58 = vsel %vm288_vm4, %v7564_v0, %v5205_v51  ;;  %v5229_v56 = vsel %vm1630_vm7, %v5227_v50, %v5215_v52  ;;  %v5853_v0 = vld [vmem:[%s7811_s1 + $0x2b4] ss:$0 sm:$0xff]  ;;  %v5802_v51 = vld [vmem:[%s7811_s1 + $0x240] sm:$0xff] }
0x2a0e   :  { %v6718_v41 = vpop.eup %6717 }
0x2a0f   :  { %v5047_v24 = vmul.f32 %v6718_v41, %v6714_v32  ;;  %v5806_v32 = vld [vmem:[%s7811_s1 + $0x260] sm:$0xff] }
0x2a10   :  { %v5213_v60 = vpop.permute.xlu1 %5212 }
0x2a11   :  { %6508 = vmatmul.mubr.msk.f32.vlgmr.msra.gmra.mxu0 %vm288_vm4, %v5047_v24  ;;  %v5228_v53 = vsel %vm1630_vm7, %v5226_v58, %v5213_v60  ;;  %v5800_v60 = vld [vmem:[%s7811_s1 + $0x230] sm:$0xff] }
0x2a12   :  { %v6720_v35 = vpop.eup %6719  ;;  %6516 = vmatpush3.msra.mxu0 %v5795_v40  ;;  %v5856_v58 = vld [vmem:[%s7811_s1 + $0x2b6] ss:$0 sm:$0xff] }
0x2a13   :  { %v5049_v42 = vmul.f32 %v6720_v35, %v6716_v34  ;;  %6517 = vmatprep.subr.mxu0 %v5794_v43  ;;  %v5804_v34 = vld [vmem:[%s7811_s1 + $0x250] sm:$0xff] }
0x2a14   :  { %6518 = vmatpush3.msra.mxu0 %v5794_v43  ;;  %v5854_v35 = vld [vmem:[%s7811_s1 + $0x2b2] ss:$0 sm:$0xff] }
0x2a15   :  { %6513 = vmatmul.mubr.msk.f32.vlgmr.msra.gmra.mxu1 %vm288_vm4, %v5049_v42  ;;  %6519 = vmatprep.subr.mxu0 %v5793_v37 }
0x2a16   :  { %6520 = vmatpush3.msra.mxu0 %v5793_v37  ;;  %6527 = vmatpush3.msra.mxu1 %v5799_v15  ;;  %v5568_v15 = vld [vmem:[%s7812_s2 + $0x90] sm:$0xff] }
0x2a17   :  { %6521 = vmatprep.subr.mxu0 %v5792_v44  ;;  %6528 = vmatprep.subr.mxu1 %v5798_v19 }
0x2a18   :  { %6522 = vmatpush3.msra.mxu0 %v5792_v44  ;;  %6529 = vmatpush3.msra.mxu1 %v5798_v19  ;;  %v5855_v44 = vld [vmem:[%s7811_s1 + $0x2b3] ss:$0 sm:$0xff]  ;;  %v5567_v19 = vld [vmem:[%s7812_s2 + $0x88] sm:$0xff] }
0x2a19   :  { %6530 = vmatprep.subr.mxu1 %v5797_v20  ;;  %6537 = vmatprep.subr.mxu0 %v5815_v22 }
0x2a1a   :  { %6531 = vmatpush3.msra.mxu1 %v5797_v20 }
0x2a1b   :  { %6532 = vmatprep.subr.mxu1 %v5796_v21 }
0x2a1c   :  { %6533 = vmatpush3.msra.mxu1 %v5796_v21 }
0x2ad1   :  { %v5122_v45 = vpop.f32.mrf.mxu0 }
0x2ad2   :  { %5220 = vrot.lane.b32.xlu1 %v5122_v45, %s6769_s27 }
0x2ad3   :  { %v6509_v46 = vpop.f32.mrf.mxu0 }
0x2ad5   :  { %v5198_v47 = vpop.f32.mrf.mxu1 }
0x2ad6   :  { %5222 = vrot.lane.b32.xlu0 %v5198_v47, %s6769_s27 }
0x2ad7   :  { %v6514_v49 = vpop.f32.mrf.mxu1 }
0x2ad8   :  { %v5803_v49 = vld [vmem:[%s7811_s1 + $0x248] sm:$0xff] }
0x2b44   :  { %v5221_v54 = vpop.permute.xlu1 %5220 }
0x2b45   :  { %v5230_v55 = vsel %vm1633_vm6, %v5228_v53, %v5221_v54 }
0x2b46   :  { %6523 = vmatprep.mubr.msk.f32.mxu0 %vm164_vm2, %v5230_v55 }
0x2b48   :  { %v5223_v57 = vpop.permute.xlu0 %5222 }
0x2b49   :  { %v5231_v59 = vsel %vm1633_vm6, %v5229_v56, %v5223_v57  ;;  %v5859_v57 = vld [vmem:[%s7811_s1 + $0x2b5] ss:$0 sm:$0xff] }
0x2b4a   :  { %6524 = vmatmul.mubr.msk.f32.vlgmr.msra.gmra.mxu0 %vm164_vm2, %v5231_v59 }
0x2b4b   :  { %6538 = vmatpush3.msra.mxu0 %v5815_v22 }
0x2b4c   :  { %6539 = vmatprep.subr.mxu0 %v5814_v23 }
0x2b4d   :  { %6540 = vmatpush3.msra.mxu0 %v5814_v23 }
0x2b4e   :  { %6541 = vmatprep.subr.mxu0 %v5813_v25 }
0x2b4f   :  { %6542 = vmatpush3.msra.mxu0 %v5813_v25 }
0x2b50   :  { %6543 = vmatprep.subr.mxu0 %v5812_v27 }
0x2b51   :  { %6544 = vmatpush3.msra.mxu0 %v5812_v27 }
0x2b52   :  { %6545 = vmatprep.subr.mxu0 %v5811_v61 }
0x2b53   :  { %6546 = vmatpush3.msra.mxu0 %v5811_v61 }
0x2b54   :  { %6547 = vmatprep.subr.mxu0 %v5810_v28 }
0x2b55   :  { %6548 = vmatpush3.msra.mxu0 %v5810_v28  ;;  %v5860_v28 = vld [vmem:[%s7812_s2 + $0xa8] ss:$0 sm:$0xff] }
0x2b56   :  { %6549 = vmatprep.subr.mxu0 %v5809_v30 }
0x2b57   :  { %6550 = vmatpush3.msra.mxu0 %v5809_v30 }
0x2b58   :  { %6551 = vmatprep.subr.mxu0 %v5808_v26 }
0x2b59   :  { %6552 = vmatpush3.msra.mxu0 %v5808_v26 }
0x2b5a   :  { %6553 = vmatprep.subr.mxu0 %v5807_v31 }
0x2b5b   :  { %6554 = vmatpush3.msra.mxu0 %v5807_v31 }
0x2b5c   :  { %6555 = vmatprep.subr.mxu0 %v5806_v32 }
0x2b5d   :  { %6556 = vmatpush3.msra.mxu0 %v5806_v32 }
0x2b5e   :  { %6557 = vmatprep.subr.mxu0 %v5805_v33 }
0x2b5f   :  { %6558 = vmatpush3.msra.mxu0 %v5805_v33  ;;  %v5861_v33 = vld [vmem:[%s7812_s2 + $0xa9] ss:$0 sm:$0xff] }
0x2b60   :  { %6559 = vmatprep.subr.mxu0 %v5804_v34 }
0x2b61   :  { %6560 = vmatpush3.msra.mxu0 %v5804_v34 }
0x2b62   :  { %6561 = vmatprep.subr.mxu0 %v5803_v49 }
0x2b63   :  { %6562 = vmatpush3.msra.mxu0 %v5803_v49 }
0x2b64   :  { %6563 = vmatprep.subr.mxu0 %v5802_v51 }
0x2b65   :  { %6564 = vmatpush3.msra.mxu0 %v5802_v51 }
0x2b66   :  { %6565 = vmatprep.subr.mxu0 %v5801_v48 }
0x2b67   :  { %6566 = vmatpush3.msra.mxu0 %v5801_v48 }
0x2b68   :  { %6567 = vmatprep.subr.mxu0 %v5800_v60 }
0x2b69   :  { %6568 = vmatpush3.msra.mxu0 %v5800_v60 }
0x2c0a   :  { %v6525_v1 = vpop.f32.mrf.mxu0 }
0x2c0b   :  { %v5314_v3 = vadd.f32 %v6525_v1, %v7500_v29 }
0x2c0c   :  { %v5304_v14 = vpop.f32.mrf.mxu0 }
0x2c0d   :  { %v5320_v13 = vadd.f32 %v5853_v0, %v5314_v3  ;;  %v5313_v5 = vadd.f32 %v5304_v14, %v7498_v16 }
0x2c0f   :  { %v5319_v6 = vadd.f32 %v5853_v0, %v5313_v5  ;;  %v5324_v2 = vsel %vm164_vm2, %v5320_v13, 0.0 }
0x2c10   :  { %5325 = vadd.xlane.f32.xlu0 %v5324_v2 }
0x2c11   :  { %v5321_v7 = vsel %vm164_vm2, %v5319_v6, 0.0 }
0x2c12   :  { %5322 = vadd.xlane.f32.xlu1 %v5321_v7 }
0x2c99   :  { %v5326_v8 = vpop.xlane.xlu0 %5325 }
0x2c9a   :  { %v5328_v9 = vmul.f32 0.03125, %v5326_v8 }
0x2c9b   :  { %v5323_v10 = vpop.xlane.xlu1 %5322 }
0x2c9c   :  { %v7693_v11 = vsub.f32 %v5320_v13, %v5328_v9  ;;  %v5327_v12 = vmul.f32 0.03125, %v5323_v10 }
0x2c9e   :  { %v7695_v63 = vsub.f32 %v5319_v6, %v5327_v12  ;;  %v5332_v29 = vmul.f32 %v7693_v11, %v7693_v11 }
0x2ca0   :  { %v5336_v16 = vsel %vm164_vm2, %v5332_v29, 0.0  ;;  %v5331_v18 = vmul.f32 %v7695_v63, %v7695_v63 }
0x2ca1   :  { %5337 = vadd.xlane.f32.xlu1 %v5336_v16 }
0x2ca2   :  { %v5333_v62 = vsel %vm164_vm2, %v5331_v18, 0.0  ;;  %v5570_v18 = vld [vmem:[%s7812_s2 + $0xa0] sm:$0xff] }
0x2ca3   :  { %5334 = vadd.xlane.f32.xlu0 %v5333_v62  ;;  %v5569_v62 = vld [vmem:[%s7812_s2 + $0x98] sm:$0xff]  ;;  %6572 = vmatprep.subr.mxu1 %v5570_v18 }
0x2d2a   :  { %v5338_v36 = vpop.xlane.xlu1 %5337 }
0x2d2b   :  { %v5340_v4 = vmul.f32 0.03125, %v5338_v36 }
0x2d2c   :  { %v5335_v38 = vpop.xlane.xlu0 %5334 }
0x2d2d   :  { %v5342_v39 = vadd.f32 1e-05, %v5340_v4  ;;  %v5339_v17 = vmul.f32 0.03125, %v5335_v38  ;;  %v5862_v38 = vld [vmem:[%s7812_s2 + $0xaa] ss:$0 sm:$0xff] }
0x2d2f   :  { %6721 = vrsqrt.f32 %v5342_v39  ;;  %v5341_v41 = vadd.f32 1e-05, %v5339_v17 }
0x2d31   :  { %6723 = vrsqrt.f32 %v5341_v41 }
0x2d3c   :  { %v6722_v24 = vpop.eup %6721 }
0x2d3d   :  { %v5346_v42 = vmul.f32 %v6722_v24, %v7693_v11 }
0x2d3e   :  { %v6724_v40 = vpop.eup %6723 }
0x2d3f   :  { %v5345_v43 = vmul.f32 %v6724_v40, %v7695_v63  ;;  %v5352_v37 = vmul.f32 %v5854_v35, %v5346_v42 }
0x2d41   :  { %v5351_v45 = vmul.f32 %v5854_v35, %v5345_v43  ;;  %v5358_v47 = vadd.f32 %v5855_v44, %v5352_v37 }
0x2d43   :  { %v5357_v46 = vadd.f32 %v5855_v44, %v5351_v45 }
0x2d45   :  { %6534 = vmatprep.mubr.msk.f32.mxu1 %vm164_vm2, %v5357_v46 }
0x2d46   :  { %6535 = vmatmul.mubr.msk.f32.vlgmr.msra.gmra.mxu1 %vm164_vm2, %v5358_v47 }
0x2d47   :  { %6573 = vmatpush3.msra.mxu1 %v5570_v18 }
0x2d48   :  { %6574 = vmatprep.subr.mxu1 %v5569_v62 }
0x2d49   :  { %6575 = vmatpush3.msra.mxu1 %v5569_v62 }
0x2d4a   :  { %6576 = vmatprep.subr.mxu1 %v5568_v15 }
0x2d4b   :  { %6577 = vmatpush3.msra.mxu1 %v5568_v15 }
0x2d4c   :  { %6578 = vmatprep.subr.mxu1 %v5567_v19 }
0x2d4d   :  { %6579 = vmatpush3.msra.mxu1 %v5567_v19 }
0x2e06   :  { %v6536_v52 = vpop.f32.mrf.mxu1 }
0x2e07   :  { %v5441_v53 = vadd.f32 %v6536_v52, %v5856_v58 }
0x2e08   :  { %v5435_v54 = vpop.f32.mrf.mxu1 }
0x2e09   :  { %v5436_v55 = vadd.f32 %v5856_v58, %v5435_v54  ;;  %v5445_v56 = vmax.f32 %v5441_v53, 0.0 }
0x2e0b   :  { %v5444_v50 = vmax.f32 %v5436_v55, 0.0 }
0x2e0d   :  { %6569 = vmatprep.mubr.f32.mxu0 %v5444_v50 }
0x2e0e   :  { %6570 = vmatmul.mubr.f32.vlgmr.msra.gmra.mxu0 %v5445_v56 }
0x2ece   :  { %v6571_v59 = vpop.f32.mrf.mxu0 }
0x2ecf   :  { %v5522_v0 = vadd.f32 %v6571_v59, %v5859_v57 }
0x2ed0   :  { %v5516_v1 = vpop.f32.mrf.mxu0 }
0x2ed1   :  { %v5526_v3 = vadd.f32 %v5522_v0, %v5358_v47  ;;  %v5517_v14 = vadd.f32 %v5859_v57, %v5516_v1 }
0x2ed3   :  { %v5525_v13 = vadd.f32 %v5517_v14, %v5357_v46  ;;  %v5532_v5 = vsel %vm164_vm2, %v5526_v3, 0.0 }
0x2ed4   :  { %5533 = vadd.xlane.f32.xlu1 %v5532_v5 }
0x2ed5   :  { %v5529_v6 = vsel %vm164_vm2, %v5525_v13, 0.0 }
0x2ed6   :  { %5530 = vadd.xlane.f32.xlu0 %v5529_v6 }
0x2f5d   :  { %v5534_v2 = vpop.xlane.xlu1 %5533 }
0x2f5e   :  { %v5536_v7 = vmul.f32 0.03125, %v5534_v2 }
0x2f5f   :  { %v5531_v8 = vpop.xlane.xlu0 %5530 }
0x2f60   :  { %v5538_v9 = vsub.f32 %v5526_v3, %v5536_v7  ;;  %v5535_v10 = vmul.f32 0.03125, %v5531_v8 }
0x2f62   :  { %v5537_v11 = vsub.f32 %v5525_v13, %v5535_v10  ;;  %v5540_v12 = vmul.f32 %v5538_v9, %v5538_v9 }
0x2f64   :  { %v5544_v63 = vsel %vm164_vm2, %v5540_v12, 0.0  ;;  %v5539_v29 = vmul.f32 %v5537_v11, %v5537_v11 }
0x2f65   :  { %5545 = vadd.xlane.f32.xlu1 %v5544_v63 }
0x2f66   :  { %v5541_v16 = vsel %vm164_vm2, %v5539_v29, 0.0 }
0x2f67   :  { %5542 = vadd.xlane.f32.xlu0 %v5541_v16 }
0x2fee   :  { %v5546_v20 = vpop.xlane.xlu1 %5545 }
0x2fef   :  { %v5548_v21 = vmul.f32 0.03125, %v5546_v20 }
0x2ff0   :  { %v5543_v22 = vpop.xlane.xlu0 %5542 }
0x2ff1   :  { %v5550_v23 = vadd.f32 1e-05, %v5548_v21  ;;  %v5547_v25 = vmul.f32 0.03125, %v5543_v22 }
0x2ff3   :  { %6725 = vrsqrt.f32 %v5550_v23  ;;  %v5549_v27 = vadd.f32 1e-05, %v5547_v25 }
0x2ff5   :  { %6727 = vrsqrt.f32 %v5549_v27 }
0x3000   :  { %v6726_v61 = vpop.eup %6725 }
0x3001   :  { %v5554_v30 = vmul.f32 %v6726_v61, %v5538_v9 }
0x3002   :  { %v6728_v26 = vpop.eup %6727 }
0x3003   :  { %v5553_v31 = vmul.f32 %v6728_v26, %v5537_v11  ;;  %v5560_v32 = vmul.f32 %v5860_v28, %v5554_v30 }
0x3005   :  { %v5559_v34 = vmul.f32 %v5860_v28, %v5553_v31  ;;  %v5566_v4 = vadd.f32 %v5861_v33, %v5560_v32 }
0x3007   :  { %v5565_v36 = vadd.f32 %v5861_v33, %v5559_v34 }
0x3009   :  { %6580 = vmatprep.mubr.msk.f32.mxu1 %vm164_vm2, %v5565_v36 }
0x300a   :  { %6581 = vmatmul.mubr.msk.f32.vlgmr.msra.gmra.mxu1 %vm164_vm2, %v5566_v4 }
0x30ca   :  { %v6582_v39 = vpop.f32.mrf.mxu1 }
0x30cb   :  { %v5654_v17 = vadd.f32 %v6582_v39, %v5862_v38 }
0x30cc   :  { %v5648_v41 = vpop.f32.mrf.mxu1 }
0x30cd   :  { %5658 = vst [vmem:[#allocation2 + $0x8] sm:$0xff] %v5654_v17  ;;  %v5649_v24 = vadd.f32 %v5862_v38, %v5648_v41 }
0x30cf   :  { %5657 = vst [vmem:[#allocation2] sm:$0xff] %v5649_v24 }
0x30d0   :  { %6740 = shalt.err (!%p6737_p4)
}
0x30d1   :  { %s6771_s26 = smov 128  }
0x30d2   :  { %5670 = dma.vmem_to_hbm [thread:$0]  %s5665_s24, 256, %s7813_s3, [#allocation3], %s6771_s26, %s6771_s26, %s6767_s17  }
0x30d3   :  { %6749 = dma.done.wait [#allocation3], 256  }
0x30d4   :  { %6750 = vsyncadd [#allocation3], 4294967040 }
0x30d5   :  { %5674 = vsyncpa [#allocation3], 1 }

</bundles_post_ra>
